<compile_context>
chip_gen: v7x
topology: tpu7x:2x2x1
jax: 0.10.0
libtpu: 0.0.40
codegen_flags: <defaults>
</compile_context>

<pallas_src>
import functools

import jax
import jax.numpy as jnp
from jax.experimental import pallas as pl
from jax.experimental.pallas import tpu as pltpu

LANE = 128
WO_TILE_CAP = 32           # max output-width tile (sublane rows) per grid step


def _round_up(x, m):
    return ((x + m - 1) // m) * m


def _preferred_tn():
    """256-wide cout tiles on v6e/v7x (256x256 MXU); 128 on v5e and older."""
    try:
        kind = jax.devices()[0].device_kind.lower()
    except Exception:
        return 256
    if any(g in kind for g in ("v2", "v3", "v4", "v5")):
        return 128
    return 256


def _pick_wo_tile(wo, cap=WO_TILE_CAP):
    """Pad wo to a multiple of 8 and pick a tile (multiple of 8) dividing it."""
    wo_pad = _round_up(wo, 8)
    wt = min(cap, wo_pad)
    wt -= wt % 8
    while wo_pad % wt != 0:
        wt -= 8
    return wt, wo_pad


# ----------------------------------------------------------------------------
# Pallas kernels: conv (tap-accumulated MXU matmuls) -> folded-BN affine
#                 -> [residual add] -> [ReLU], fully fused.
# ----------------------------------------------------------------------------
def _conv_bn_kernel(x_ref, w_ref, scale_ref, bias_ref, o_ref, *,
                    taps, slab_idx, stride, hpp, ho, wo_t, relu):
    cin = x_ref.shape[-1]
    tn = o_ref.shape[-1]
    m = ho * wo_t
    acc = None
    # statically unrolled loop over the kh*kw taps; acc starts from tap 0
    for t, (dh, dw) in enumerate(taps):
        ph, ah = dh % stride, dh // stride
        base = slab_idx[(ph, dw)] * hpp + ah
        patch = x_ref[0, base:base + ho, :, :].reshape(m, cin)   # free view (wo_t%8==0)
        contrib = jnp.dot(patch, w_ref[t], preferred_element_type=jnp.float32)
        acc = contrib if acc is None else acc + contrib
    acc = acc * scale_ref[...] + bias_ref[...]                   # folded BN (f32)
    if relu:
        acc = jnp.maximum(acc, 0.0)
    o_ref[...] = acc.reshape(1, ho, wo_t, tn).astype(o_ref.dtype)


def _conv_bn_add_relu_kernel(x_ref, w_ref, scale_ref, bias_ref, s_ref, o_ref, *,
                             taps, slab_idx, stride, hpp, ho, wo_t):
    cin = x_ref.shape[-1]
    tn = o_ref.shape[-1]
    m = ho * wo_t
    acc = None
    for t, (dh, dw) in enumerate(taps):
        ph, ah = dh % stride, dh // stride
        base = slab_idx[(ph, dw)] * hpp + ah
        patch = x_ref[0, base:base + ho, :, :].reshape(m, cin)
        contrib = jnp.dot(patch, w_ref[t], preferred_element_type=jnp.float32)
        acc = contrib if acc is None else acc + contrib
    acc = acc * scale_ref[...] + bias_ref[...]
    acc = acc + s_ref[0].reshape(m, tn).astype(jnp.float32)      # residual add
    o_ref[...] = jnp.maximum(acc, 0.0).reshape(1, ho, wo_t, tn).astype(o_ref.dtype)


# ----------------------------------------------------------------------------
# Glue: build stride-phased, W-pre-shifted slabs (pure pad/slice/concat).
# ----------------------------------------------------------------------------
def _prep_input(x, k, stride, pad, wo_pad):
    """x: (N,H,W,C) -> (N, n_slab*hpp, wo_pad, C) slab tensor.

    slab (dh%stride, dw) holds the W-shifted, stride-subsampled window; the
    remaining H shift (dh//stride) is an outer-dim slice inside the kernel.
    The W (sublane) axis is zero-padded to wo_pad (multiple of 8).
    """
    n, h, w, c = x.shape
    s = stride
    ho = (h + 2 * pad - k) // s + 1
    wo = (w + 2 * pad - k) // s + 1
    hpp = ho + (k - 1) // s
    ph_list = sorted({dh % s for dh in range(k)})
    hp_needed = max(ph_list) + s * (hpp - 1) + 1
    wp_needed = (k - 1) + s * (wo - 1) + 1
    xp = jnp.pad(x, ((0, 0),
                     (pad, max(0, hp_needed - h - pad)),
                     (pad, max(0, wp_needed - w - pad)),
                     (0, 0)))
    slabs, slab_idx = [], {}
    for ph in ph_list:
        row_slab = xp[:, ph::s, :, :][:, :hpp, :, :]
        for dw in range(k):
            slab_idx[(ph, dw)] = len(slabs)
            slabs.append(row_slab[:, :, dw::s, :][:, :, :wo, :])
    xph = jnp.concatenate(slabs, axis=1)                  # (N, n_slab*hpp, wo, C)
    if wo_pad > wo:
        xph = jnp.pad(xph, ((0, 0), (0, 0), (0, wo_pad - wo), (0, 0)))
    return xph, slab_idx, hpp


# ----------------------------------------------------------------------------
# ConvNormLayer forward (conv -> folded BN -> [relu] / [add+relu])
# ----------------------------------------------------------------------------
def conv_norm(x, params, stride, relu, short=None):
    """x: (N,H,W,cin_pad) bf16 channel-padded; returns (N,Ho,Wo,cout_pad) bf16."""
    w2, scale2, bias2 = params["w2"], params["scale2"], params["bias2"]
    k, cin_pad, cout_pad = params["k"], params["cin_pad"], params["cout_pad"]
    pad = (k - 1) // 2
    n, h, w, cin_pad_x = x.shape
    assert cin_pad_x == cin_pad, (cin_pad_x, cin_pad)

    ho = (h + 2 * pad - k) // stride + 1
    wo = (w + 2 * pad - k) // stride + 1
    wo_t, wo_pad = _pick_wo_tile(wo)          # spatial tile (no halo needed)
    n_wq = wo_pad // wo_t

    tn_pref = _preferred_tn()
    tn = tn_pref if cout_pad % tn_pref == 0 else LANE
    n_co = cout_pad // tn

    xph, slab_idx, hpp = _prep_input(x, k, stride, pad, wo_pad)
    n_slab = xph.shape[1] // hpp
    taps = [(dh, dw) for dh in range(k) for dw in range(k)]
    kern_kwargs = dict(taps=taps, slab_idx=slab_idx, stride=stride,
                       hpp=hpp, ho=ho, wo_t=wo_t)

    in_specs = [
        # slab tile: block index constant across the innermost cout axis, so
        # it stays resident (revisited) in VMEM across all j steps.
        pl.BlockSpec((1, n_slab * hpp, wo_t, cin_pad), lambda i, q, j: (i, 0, q, 0)),
        pl.BlockSpec((k * k, cin_pad, tn), lambda i, q, j: (0, 0, j)),
        pl.BlockSpec((1, tn), lambda i, q, j: (0, j)),
        pl.BlockSpec((1, tn), lambda i, q, j: (0, j)),
    ]
    out_spec = pl.BlockSpec((1, ho, wo_t, tn), lambda i, q, j: (i, 0, q, j))
    out_shape = jax.ShapeDtypeStruct((n, ho, wo_pad, cout_pad), jnp.bfloat16)

    flops = 2 * n * ho * wo_pad * cin_pad * cout_pad * k * k
    bytes_accessed = (xph.size * 2 + w2.size * 2
                      + (scale2.size + bias2.size) * 4
                      + n * ho * wo_pad * cout_pad * 2)

    cparams = pltpu.CompilerParams(
        dimension_semantics=("parallel", "parallel", "arbitrary"),
        vmem_limit_bytes=40 * 1024 * 1024,    # headroom under v7x's 64 MiB VMEM
    )

    if short is None:
        out = pl.pallas_call(
            functools.partial(_conv_bn_kernel, relu=relu, **kern_kwargs),
            out_shape=out_shape, grid=(n, n_wq, n_co),
            in_specs=in_specs, out_specs=out_spec,
            compiler_params=cparams,
            cost_estimate=pl.CostEstimate(flops=flops, transcendentals=0,
                                          bytes_accessed=bytes_accessed),
        )(xph, w2, scale2, bias2)
    else:
        assert short.shape == (n, ho, wo, cout_pad), short.shape
        if wo_pad > wo:
            short = jnp.pad(short, ((0, 0), (0, 0), (0, wo_pad - wo), (0, 0)))
        out = pl.pallas_call(
            functools.partial(_conv_bn_add_relu_kernel, **kern_kwargs),
            out_shape=out_shape, grid=(n, n_wq, n_co),
            in_specs=in_specs + [pl.BlockSpec((1, ho, wo_t, tn),
                                              lambda i, q, j: (i, 0, q, j))],
            out_specs=out_spec,
            compiler_params=cparams,
            cost_estimate=pl.CostEstimate(
                flops=flops, transcendentals=0,
                bytes_accessed=bytes_accessed + short.size * 2),
        )(xph, w2, scale2, bias2, short)

    if wo_pad > wo:
        out = out[:, :, :wo, :]               # drop padded output columns
    return out


# ----------------------------------------------------------------------------
# Parameter init (deterministic, synthetic; frozen BN folded to scale/bias;
# channel-padded bf16 kernel operands precomputed once here)
# ----------------------------------------------------------------------------
def _init_conv_norm(key, kh, kw, cin, cout, eps=1e-5):
    k0, k1, k2, k3, k4 = jax.random.split(key, 5)
    w = jax.random.normal(k0, (kh, kw, cin, cout), jnp.float32) * 0.1
    gamma = 0.5 + jax.random.uniform(k1, (cout,), jnp.float32)
    beta = jax.random.normal(k2, (cout,), jnp.float32) * 0.1
    mean = jax.random.normal(k3, (cout,), jnp.float32) * 0.1
    var = 0.5 + jax.random.uniform(k4, (cout,), jnp.float32)
    scale = gamma / jnp.sqrt(var + eps)
    bias = beta - mean * scale

    cin_pad, cout_pad = _round_up(cin, LANE), _round_up(cout, LANE)
    w2 = jnp.zeros((kh * kw, cin_pad, cout_pad), jnp.bfloat16)
    w2 = w2.at[:, :cin, :cout].set(
        w.reshape(kh * kw, cin, cout).astype(jnp.bfloat16))
    # padded channel lanes get scale=bias=0 so they stay exactly 0 everywhere
    scale2 = jnp.zeros((1, cout_pad), jnp.float32).at[:, :cout].set(scale)
    bias2 = jnp.zeros((1, cout_pad), jnp.float32).at[:, :cout].set(bias)
    return {"w2": w2, "scale2": scale2, "bias2": bias2,
            "k": kh, "cin": cin, "cout": cout,
            "cin_pad": cin_pad, "cout_pad": cout_pad}


def init_basic_block(key, ch_in, ch_out, shortcut):
    ka, kb, ks = jax.random.split(key, 3)
    params = {
        "branch2a": _init_conv_norm(ka, 3, 3, ch_in, ch_out),
        "branch2b": _init_conv_norm(kb, 3, 3, ch_out, ch_out),
    }
    if not shortcut:                      # variant 'b': 1x1 strided shortcut conv
        params["short"] = _init_conv_norm(ks, 1, 1, ch_in, ch_out)
    return params


def init_blocks(key, ch_in, ch_out, count, stage_num):
    blocks, expansion, cin = [], 1, ch_in
    for i in range(count):
        key, sub = jax.random.split(key)
        stride = 2 if (i == 0 and stage_num != 2) else 1
        shortcut = False if i == 0 else True
        blocks.append({"params": init_basic_block(sub, cin, ch_out, shortcut),
                       "stride": stride, "shortcut": shortcut})
        if i == 0:
            cin = ch_out * expansion
    return blocks


# ----------------------------------------------------------------------------
# Forward
# ----------------------------------------------------------------------------
def basic_block_forward(x, blk):
    p, stride, shortcut = blk["params"], blk["stride"], blk["shortcut"]
    y = conv_norm(x, p["branch2a"], stride, relu=True)
    short = x if shortcut else conv_norm(x, p["short"], stride, relu=False)
    # branch2b conv+BN fused with residual add + ReLU
    return conv_norm(y, p["branch2b"], 1, relu=False, short=short)


def blocks_forward(x_nchw, blocks):
    # PyTorch gives NCHW f32; compute in channel-padded bf16 NHWC internally.
    x = jnp.transpose(x_nchw, (0, 2, 3, 1))
    c = x.shape[-1]
    c_pad = _round_up(c, LANE)
    x = jnp.pad(x, ((0, 0), (0, 0), (0, 0), (0, c_pad - c))).astype(jnp.bfloat16)
    for blk in blocks:
        x = basic_block_forward(x, blk)
    cout = blocks[-1]["params"]["branch2b"]["cout"]
    x = x[..., :cout].astype(jnp.float32)
    return jnp.transpose(x, (0, 3, 1, 2))


# ----------------------------------------------------------------------------
if __name__ == "__main__":
    key = jax.random.PRNGKey(0)
    k_in, k_params = jax.random.split(key)

    batch, ch_in, ch_out, spatial = 2, 4, 8, 16
    count, stage_num = 2, 3                 # first block downsamples (stride 2)

    x = jax.random.normal(k_in, (batch, ch_in, spatial, spatial), jnp.float32)
    blocks = init_blocks(k_params, ch_in, ch_out, count, stage_num)

    fwd = jax.jit(lambda inp: blocks_forward(inp, blocks))
    out = fwd(x)
    jax.block_until_ready(out)
    assert out.shape == (batch, ch_out, spatial // 2, spatial // 2), out.shape
    print("KERNEL_OK")
</pallas_src>

<mosaic_0001>
module attributes {stable_mosaic.version = 11 : i64} {
  func.func @_conv_bn_kernel(%arg0: i32, %arg1: i32, %arg2: i32, %arg3: memref<1x8x8x128xbf16, #tpu.memory_space<vmem>>, %arg4: memref<1x128x128xbf16, #tpu.memory_space<vmem>>, %arg5: memref<1x128xf32, #tpu.memory_space<vmem>>, %arg6: memref<1x128xf32, #tpu.memory_space<vmem>>, %arg7: memref<1x8x8x128xbf16, #tpu.memory_space<vmem>>) attributes {dimension_semantics = [#tpu.dimension_semantics<parallel>, #tpu.dimension_semantics<parallel>, #tpu.dimension_semantics<arbitrary>], iteration_bounds = array<i64: 2, 1, 1>, scalar_prefetch = 0 : i64, scratch_operands = 0 : i64, tpu.core_type = #tpu.core_type<tc>, window_params = [{transform_indices = @transform_0, window_bounds = array<i64: 1, 8, 8, 128>}, {transform_indices = @transform_1, window_bounds = array<i64: 1, 128, 128>}, {transform_indices = @transform_2, window_bounds = array<i64: 1, 128>}, {transform_indices = @transform_3, window_bounds = array<i64: 1, 128>}, {transform_indices = @transform_4, window_bounds = array<i64: 1, 8, 8, 128>}]} {
    %c0 = arith.constant 0 : index
    %c0_0 = arith.constant 0 : index
    %c0_1 = arith.constant 0 : index
    %c0_2 = arith.constant 0 : index
    %0 = vector.load %arg3[%c0, %c0_0, %c0_1, %c0_2] : memref<1x8x8x128xbf16, #tpu.memory_space<vmem>>, vector<1x8x8x128xbf16>
    %1 = vector.shape_cast %0 : vector<1x8x8x128xbf16> to vector<8x8x128xbf16>
    %2 = vector.shape_cast %1 : vector<8x8x128xbf16> to vector<64x128xbf16>
    %c0_3 = arith.constant 0 : index
    %c0_4 = arith.constant 0 : index
    %c0_5 = arith.constant 0 : index
    %3 = vector.load %arg4[%c0_3, %c0_4, %c0_5] : memref<1x128x128xbf16, #tpu.memory_space<vmem>>, vector<1x128x128xbf16>
    %4 = vector.shape_cast %3 : vector<1x128x128xbf16> to vector<128x128xbf16>
    %cst = arith.constant dense<0.000000e+00> : vector<64x128xf32>
    %5 = tpu.matmul %2, %4, %cst {dimension_numbers = #tpu.dot_dimension_numbers<[1], [0], [0], [1], [0, 0, 1, 1], [], []>} : vector<64x128xbf16>, vector<128x128xbf16>, vector<64x128xf32> -> vector<64x128xf32>
    %c0_6 = arith.constant 0 : index
    %c0_7 = arith.constant 0 : index
    %6 = vector.load %arg5[%c0_6, %c0_7] : memref<1x128xf32, #tpu.memory_space<vmem>>, vector<1x128xf32>
    %7 = vector.broadcast %6 : vector<1x128xf32> to vector<64x128xf32>
    %8 = arith.mulf %5, %7 : vector<64x128xf32>
    %c0_8 = arith.constant 0 : index
    %c0_9 = arith.constant 0 : index
    %9 = vector.load %arg6[%c0_8, %c0_9] : memref<1x128xf32, #tpu.memory_space<vmem>>, vector<1x128xf32>
    %10 = vector.broadcast %9 : vector<1x128xf32> to vector<64x128xf32>
    %11 = arith.addf %8, %10 : vector<64x128xf32>
    %12 = vector.shape_cast %11 : vector<64x128xf32> to vector<1x8x8x128xf32>
    %13 = arith.truncf %12 : vector<1x8x8x128xf32> to vector<1x8x8x128xbf16>
    %c0_10 = arith.constant 0 : index
    %c0_11 = arith.constant 0 : index
    %c0_12 = arith.constant 0 : index
    %c0_13 = arith.constant 0 : index
    %14 = vector.load %arg7[%c0_10, %c0_11, %c0_12, %c0_13] : memref<1x8x8x128xbf16, #tpu.memory_space<vmem>>, vector<1x8x8x128xbf16>
    tpu.vector_store %arg7[%c0_10, %c0_11, %c0_12, %c0_13], %13 {strides = array<i32>} : memref<1x8x8x128xbf16, #tpu.memory_space<vmem>>, vector<1x8x8x128xbf16>,
    return
  }
  func.func @transform_0(%arg0: i32, %arg1: i32, %arg2: i32) -> (i32, i32, i32, i32) {
    %c0_i32 = arith.constant 0 : i32
    %c0_i32_0 = arith.constant 0 : i32
    %c0_i32_1 = arith.constant 0 : i32
    return %arg0, %c0_i32, %arg1, %c0_i32_0 : i32, i32, i32, i32
  }
  func.func @transform_1(%arg0: i32, %arg1: i32, %arg2: i32) -> (i32, i32, i32) {
    %c0_i32 = arith.constant 0 : i32
    %c0_i32_0 = arith.constant 0 : i32
    %c0_i32_1 = arith.constant 0 : i32
    return %c0_i32, %c0_i32_0, %arg2 : i32, i32, i32
  }
  func.func @transform_2(%arg0: i32, %arg1: i32, %arg2: i32) -> (i32, i32) {
    %c0_i32 = arith.constant 0 : i32
    %c0_i32_0 = arith.constant 0 : i32
    return %c0_i32, %arg2 : i32, i32
  }
  func.func @transform_3(%arg0: i32, %arg1: i32, %arg2: i32) -> (i32, i32) {
    %c0_i32 = arith.constant 0 : i32
    %c0_i32_0 = arith.constant 0 : i32
    return %c0_i32, %arg2 : i32, i32
  }
  func.func @transform_4(%arg0: i32, %arg1: i32, %arg2: i32) -> (i32, i32, i32, i32) {
    %c0_i32 = arith.constant 0 : i32
    %c0_i32_0 = arith.constant 0 : i32
    return %arg0, %c0_i32, %arg1, %arg2 : i32, i32, i32, i32
  }
}

module attributes {stable_mosaic.version = 11 : i64} {
  func.func @_conv_bn_kernel(%arg0: i32, %arg1: i32, %arg2: i32, %arg3: memref<1x54x8x128xbf16, #tpu.memory_space<vmem>>, %arg4: memref<9x128x128xbf16, #tpu.memory_space<vmem>>, %arg5: memref<1x128xf32, #tpu.memory_space<vmem>>, %arg6: memref<1x128xf32, #tpu.memory_space<vmem>>, %arg7: memref<1x8x8x128xbf16, #tpu.memory_space<vmem>>) attributes {dimension_semantics = [#tpu.dimension_semantics<parallel>, #tpu.dimension_semantics<parallel>, #tpu.dimension_semantics<arbitrary>], iteration_bounds = array<i64: 2, 1, 1>, scalar_prefetch = 0 : i64, scratch_operands = 0 : i64, tpu.core_type = #tpu.core_type<tc>, window_params = [{transform_indices = @transform_0, window_bounds = array<i64: 1, 54, 8, 128>}, {transform_indices = @transform_1, window_bounds = array<i64: 9, 128, 128>}, {transform_indices = @transform_2, window_bounds = array<i64: 1, 128>}, {transform_indices = @transform_3, window_bounds = array<i64: 1, 128>}, {transform_indices = @transform_4, window_bounds = array<i64: 1, 8, 8, 128>}]} {
    %c0 = arith.constant 0 : index
    %c0_0 = arith.constant 0 : index
    %c0_1 = arith.constant 0 : index
    %c0_2 = arith.constant 0 : index
    %0 = vector.load %arg3[%c0, %c0_0, %c0_1, %c0_2] : memref<1x54x8x128xbf16, #tpu.memory_space<vmem>>, vector<1x8x8x128xbf16>
    %1 = vector.shape_cast %0 : vector<1x8x8x128xbf16> to vector<8x8x128xbf16>
    %2 = vector.shape_cast %1 : vector<8x8x128xbf16> to vector<64x128xbf16>
    %c0_3 = arith.constant 0 : index
    %c0_4 = arith.constant 0 : index
    %c0_5 = arith.constant 0 : index
    %3 = vector.load %arg4[%c0_3, %c0_4, %c0_5] : memref<9x128x128xbf16, #tpu.memory_space<vmem>>, vector<1x128x128xbf16>
    %4 = vector.shape_cast %3 : vector<1x128x128xbf16> to vector<128x128xbf16>
    %cst = arith.constant dense<0.000000e+00> : vector<64x128xf32>
    %5 = tpu.matmul %2, %4, %cst {dimension_numbers = #tpu.dot_dimension_numbers<[1], [0], [0], [1], [0, 0, 1, 1], [], []>} : vector<64x128xbf16>, vector<128x128xbf16>, vector<64x128xf32> -> vector<64x128xf32>
    %c0_6 = arith.constant 0 : index
    %c9 = arith.constant 9 : index
    %c0_7 = arith.constant 0 : index
    %c0_8 = arith.constant 0 : index
    %6 = vector.load %arg3[%c0_6, %c9, %c0_7, %c0_8] : memref<1x54x8x128xbf16, #tpu.memory_space<vmem>>, vector<1x8x8x128xbf16>
    %7 = vector.shape_cast %6 : vector<1x8x8x128xbf16> to vector<8x8x128xbf16>
    %8 = vector.shape_cast %7 : vector<8x8x128xbf16> to vector<64x128xbf16>
    %c1 = arith.constant 1 : index
    %c0_9 = arith.constant 0 : index
    %c0_10 = arith.constant 0 : index
    %9 = vector.load %arg4[%c1, %c0_9, %c0_10] : memref<9x128x128xbf16, #tpu.memory_space<vmem>>, vector<1x128x128xbf16>
    %10 = vector.shape_cast %9 : vector<1x128x128xbf16> to vector<128x128xbf16>
    %cst_11 = arith.constant dense<0.000000e+00> : vector<64x128xf32>
    %11 = tpu.matmul %8, %10, %cst_11 {dimension_numbers = #tpu.dot_dimension_numbers<[1], [0], [0], [1], [0, 0, 1, 1], [], []>} : vector<64x128xbf16>, vector<128x128xbf16>, vector<64x128xf32> -> vector<64x128xf32>
    %12 = arith.addf %5, %11 : vector<64x128xf32>
    %c0_12 = arith.constant 0 : index
    %c18 = arith.constant 18 : index
    %c0_13 = arith.constant 0 : index
    %c0_14 = arith.constant 0 : index
    %13 = vector.load %arg3[%c0_12, %c18, %c0_13, %c0_14] : memref<1x54x8x128xbf16, #tpu.memory_space<vmem>>, vector<1x8x8x128xbf16>
    %14 = vector.shape_cast %13 : vector<1x8x8x128xbf16> to vector<8x8x128xbf16>
    %15 = vector.shape_cast %14 : vector<8x8x128xbf16> to vector<64x128xbf16>
    %c2 = arith.constant 2 : index
    %c0_15 = arith.constant 0 : index
    %c0_16 = arith.constant 0 : index
    %16 = vector.load %arg4[%c2, %c0_15, %c0_16] : memref<9x128x128xbf16, #tpu.memory_space<vmem>>, vector<1x128x128xbf16>
    %17 = vector.shape_cast %16 : vector<1x128x128xbf16> to vector<128x128xbf16>
    %cst_17 = arith.constant dense<0.000000e+00> : vector<64x128xf32>
    %18 = tpu.matmul %15, %17, %cst_17 {dimension_numbers = #tpu.dot_dimension_numbers<[1], [0], [0], [1], [0, 0, 1, 1], [], []>} : vector<64x128xbf16>, vector<128x128xbf16>, vector<64x128xf32> -> vector<64x128xf32>
    %19 = arith.addf %12, %18 : vector<64x128xf32>
    %c0_18 = arith.constant 0 : index
    %c27 = arith.constant 27 : index
    %c0_19 = arith.constant 0 : index
    %c0_20 = arith.constant 0 : index
    %20 = vector.load %arg3[%c0_18, %c27, %c0_19, %c0_20] : memref<1x54x8x128xbf16, #tpu.memory_space<vmem>>, vector<1x8x8x128xbf16>
    %21 = vector.shape_cast %20 : vector<1x8x8x128xbf16> to vector<8x8x128xbf16>
    %22 = vector.shape_cast %21 : vector<8x8x128xbf16> to vector<64x128xbf16>
    %c3 = arith.constant 3 : index
    %c0_21 = arith.constant 0 : index
    %c0_22 = arith.constant 0 : index
    %23 = vector.load %arg4[%c3, %c0_21, %c0_22] : memref<9x128x128xbf16, #tpu.memory_space<vmem>>, vector<1x128x128xbf16>
    %24 = vector.shape_cast %23 : vector<1x128x128xbf16> to vector<128x128xbf16>
    %cst_23 = arith.constant dense<0.000000e+00> : vector<64x128xf32>
    %25 = tpu.matmul %22, %24, %cst_23 {dimension_numbers = #tpu.dot_dimension_numbers<[1], [0], [0], [1], [0, 0, 1, 1], [], []>} : vector<64x128xbf16>, vector<128x128xbf16>, vector<64x128xf32> -> vector<64x128xf32>
    %26 = arith.addf %19, %25 : vector<64x128xf32>
    %c0_24 = arith.constant 0 : index
    %c36 = arith.constant 36 : index
    %c0_25 = arith.constant 0 : index
    %c0_26 = arith.constant 0 : index
    %27 = vector.load %arg3[%c0_24, %c36, %c0_25, %c0_26] : memref<1x54x8x128xbf16, #tpu.memory_space<vmem>>, vector<1x8x8x128xbf16>
    %28 = vector.shape_cast %27 : vector<1x8x8x128xbf16> to vector<8x8x128xbf16>
    %29 = vector.shape_cast %28 : vector<8x8x128xbf16> to vector<64x128xbf16>
    %c4 = arith.constant 4 : index
    %c0_27 = arith.constant 0 : index
    %c0_28 = arith.constant 0 : index
    %30 = vector.load %arg4[%c4, %c0_27, %c0_28] : memref<9x128x128xbf16, #tpu.memory_space<vmem>>, vector<1x128x128xbf16>
    %31 = vector.shape_cast %30 : vector<1x128x128xbf16> to vector<128x128xbf16>
    %cst_29 = arith.constant dense<0.000000e+00> : vector<64x128xf32>
    %32 = tpu.matmul %29, %31, %cst_29 {dimension_numbers = #tpu.dot_dimension_numbers<[1], [0], [0], [1], [0, 0, 1, 1], [], []>} : vector<64x128xbf16>, vector<128x128xbf16>, vector<64x128xf32> -> vector<64x128xf32>
    %33 = arith.addf %26, %32 : vector<64x128xf32>
    %c0_30 = arith.constant 0 : index
    %c45 = arith.constant 45 : index
    %c0_31 = arith.constant 0 : index
    %c0_32 = arith.constant 0 : index
    %34 = vector.load %arg3[%c0_30, %c45, %c0_31, %c0_32] : memref<1x54x8x128xbf16, #tpu.memory_space<vmem>>, vector<1x8x8x128xbf16>
    %35 = vector.shape_cast %34 : vector<1x8x8x128xbf16> to vector<8x8x128xbf16>
    %36 = vector.shape_cast %35 : vector<8x8x128xbf16> to vector<64x128xbf16>
    %c5 = arith.constant 5 : index
    %c0_33 = arith.constant 0 : index
    %c0_34 = arith.constant 0 : index
    %37 = vector.load %arg4[%c5, %c0_33, %c0_34] : memref<9x128x128xbf16, #tpu.memory_space<vmem>>, vector<1x128x128xbf16>
    %38 = vector.shape_cast %37 : vector<1x128x128xbf16> to vector<128x128xbf16>
    %cst_35 = arith.constant dense<0.000000e+00> : vector<64x128xf32>
    %39 = tpu.matmul %36, %38, %cst_35 {dimension_numbers = #tpu.dot_dimension_numbers<[1], [0], [0], [1], [0, 0, 1, 1], [], []>} : vector<64x128xbf16>, vector<128x128xbf16>, vector<64x128xf32> -> vector<64x128xf32>
    %40 = arith.addf %33, %39 : vector<64x128xf32>
    %c0_36 = arith.constant 0 : index
    %c1_37 = arith.constant 1 : index
    %c0_38 = arith.constant 0 : index
    %c0_39 = arith.constant 0 : index
    %41 = vector.load %arg3[%c0_36, %c1_37, %c0_38, %c0_39] : memref<1x54x8x128xbf16, #tpu.memory_space<vmem>>, vector<1x8x8x128xbf16>
    %42 = vector.shape_cast %41 : vector<1x8x8x128xbf16> to vector<8x8x128xbf16>
    %43 = vector.shape_cast %42 : vector<8x8x128xbf16> to vector<64x128xbf16>
    %c6 = arith.constant 6 : index
    %c0_40 = arith.constant 0 : index
    %c0_41 = arith.constant 0 : index
    %44 = vector.load %arg4[%c6, %c0_40, %c0_41] : memref<9x128x128xbf16, #tpu.memory_space<vmem>>, vector<1x128x128xbf16>
    %45 = vector.shape_cast %44 : vector<1x128x128xbf16> to vector<128x128xbf16>
    %cst_42 = arith.constant dense<0.000000e+00> : vector<64x128xf32>
    %46 = tpu.matmul %43, %45, %cst_42 {dimension_numbers = #tpu.dot_dimension_numbers<[1], [0], [0], [1], [0, 0, 1, 1], [], []>} : vector<64x128xbf16>, vector<128x128xbf16>, vector<64x128xf32> -> vector<64x128xf32>
    %47 = arith.addf %40, %46 : vector<64x128xf32>
    %c0_43 = arith.constant 0 : index
    %c10 = arith.constant 10 : index
    %c0_44 = arith.constant 0 : index
    %c0_45 = arith.constant 0 : index
    %48 = vector.load %arg3[%c0_43, %c10, %c0_44, %c0_45] : memref<1x54x8x128xbf16, #tpu.memory_space<vmem>>, vector<1x8x8x128xbf16>
    %49 = vector.shape_cast %48 : vector<1x8x8x128xbf16> to vector<8x8x128xbf16>
    %50 = vector.shape_cast %49 : vector<8x8x128xbf16> to vector<64x128xbf16>
    %c7 = arith.constant 7 : index
    %c0_46 = arith.constant 0 : index
    %c0_47 = arith.constant 0 : index
    %51 = vector.load %arg4[%c7, %c0_46, %c0_47] : memref<9x128x128xbf16, #tpu.memory_space<vmem>>, vector<1x128x128xbf16>
    %52 = vector.shape_cast %51 : vector<1x128x128xbf16> to vector<128x128xbf16>
    %cst_48 = arith.constant dense<0.000000e+00> : vector<64x128xf32>
    %53 = tpu.matmul %50, %52, %cst_48 {dimension_numbers = #tpu.dot_dimension_numbers<[1], [0], [0], [1], [0, 0, 1, 1], [], []>} : vector<64x128xbf16>, vector<128x128xbf16>, vector<64x128xf32> -> vector<64x128xf32>
    %54 = arith.addf %47, %53 : vector<64x128xf32>
    %c0_49 = arith.constant 0 : index
    %c19 = arith.constant 19 : index
    %c0_50 = arith.constant 0 : index
    %c0_51 = arith.constant 0 : index
    %55 = vector.load %arg3[%c0_49, %c19, %c0_50, %c0_51] : memref<1x54x8x128xbf16, #tpu.memory_space<vmem>>, vector<1x8x8x128xbf16>
    %56 = vector.shape_cast %55 : vector<1x8x8x128xbf16> to vector<8x8x128xbf16>
    %57 = vector.shape_cast %56 : vector<8x8x128xbf16> to vector<64x128xbf16>
    %c8 = arith.constant 8 : index
    %c0_52 = arith.constant 0 : index
    %c0_53 = arith.constant 0 : index
    %58 = vector.load %arg4[%c8, %c0_52, %c0_53] : memref<9x128x128xbf16, #tpu.memory_space<vmem>>, vector<1x128x128xbf16>
    %59 = vector.shape_cast %58 : vector<1x128x128xbf16> to vector<128x128xbf16>
    %cst_54 = arith.constant dense<0.000000e+00> : vector<64x128xf32>
    %60 = tpu.matmul %57, %59, %cst_54 {dimension_numbers = #tpu.dot_dimension_numbers<[1], [0], [0], [1], [0, 0, 1, 1], [], []>} : vector<64x128xbf16>, vector<128x128xbf16>, vector<64x128xf32> -> vector<64x128xf32>
    %61 = arith.addf %54, %60 : vector<64x128xf32>
    %c0_55 = arith.constant 0 : index
    %c0_56 = arith.constant 0 : index
    %62 = vector.load %arg5[%c0_55, %c0_56] : memref<1x128xf32, #tpu.memory_space<vmem>>, vector<1x128xf32>
    %63 = vector.broadcast %62 : vector<1x128xf32> to vector<64x128xf32>
    %64 = arith.mulf %61, %63 : vector<64x128xf32>
    %c0_57 = arith.constant 0 : index
    %c0_58 = arith.constant 0 : index
    %65 = vector.load %arg6[%c0_57, %c0_58] : memref<1x128xf32, #tpu.memory_space<vmem>>, vector<1x128xf32>
    %66 = vector.broadcast %65 : vector<1x128xf32> to vector<64x128xf32>
    %67 = arith.addf %64, %66 : vector<64x128xf32>
    %cst_59 = arith.constant 0.000000e+00 : f32
    %68 = vector.broadcast %cst_59 : f32 to vector<64x128xf32>
    %69 = arith.maximumf %67, %68 : vector<64x128xf32>
    %70 = vector.shape_cast %69 : vector<64x128xf32> to vector<1x8x8x128xf32>
    %71 = arith.truncf %70 : vector<1x8x8x128xf32> to vector<1x8x8x128xbf16>
    %c0_60 = arith.constant 0 : index
    %c0_61 = arith.constant 0 : index
    %c0_62 = arith.constant 0 : index
    %c0_63 = arith.constant 0 : index
    %72 = vector.load %arg7[%c0_60, %c0_61, %c0_62, %c0_63] : memref<1x8x8x128xbf16, #tpu.memory_space<vmem>>, vector<1x8x8x128xbf16>
    tpu.vector_store %arg7[%c0_60, %c0_61, %c0_62, %c0_63], %71 {strides = array<i32>} : memref<1x8x8x128xbf16, #tpu.memory_space<vmem>>, vector<1x8x8x128xbf16>,
    return
  }
  func.func @transform_0(%arg0: i32, %arg1: i32, %arg2: i32) -> (i32, i32, i32, i32) {
    %c0_i32 = arith.constant 0 : i32
    %c0_i32_0 = arith.constant 0 : i32
    %c0_i32_1 = arith.constant 0 : i32
    return %arg0, %c0_i32, %arg1, %c0_i32_0 : i32, i32, i32, i32
  }
  func.func @transform_1(%arg0: i32, %arg1: i32, %arg2: i32) -> (i32, i32, i32) {
    %c0_i32 = arith.constant 0 : i32
    %c0_i32_0 = arith.constant 0 : i32
    %c0_i32_1 = arith.constant 0 : i32
    return %c0_i32, %c0_i32_0, %arg2 : i32, i32, i32
  }
  func.func @transform_2(%arg0: i32, %arg1: i32, %arg2: i32) -> (i32, i32) {
    %c0_i32 = arith.constant 0 : i32
    %c0_i32_0 = arith.constant 0 : i32
    return %c0_i32, %arg2 : i32, i32
  }
  func.func @transform_3(%arg0: i32, %arg1: i32, %arg2: i32) -> (i32, i32) {
    %c0_i32 = arith.constant 0 : i32
    %c0_i32_0 = arith.constant 0 : i32
    return %c0_i32, %arg2 : i32, i32
  }
  func.func @transform_4(%arg0: i32, %arg1: i32, %arg2: i32) -> (i32, i32, i32, i32) {
    %c0_i32 = arith.constant 0 : i32
    %c0_i32_0 = arith.constant 0 : i32
    return %arg0, %c0_i32, %arg1, %arg2 : i32, i32, i32, i32
  }
}

module attributes {stable_mosaic.version = 11 : i64} {
  func.func @_conv_bn_add_relu_kernel(%arg0: i32, %arg1: i32, %arg2: i32, %arg3: memref<1x30x8x128xbf16, #tpu.memory_space<vmem>>, %arg4: memref<9x128x128xbf16, #tpu.memory_space<vmem>>, %arg5: memref<1x128xf32, #tpu.memory_space<vmem>>, %arg6: memref<1x128xf32, #tpu.memory_space<vmem>>, %arg7: memref<1x8x8x128xbf16, #tpu.memory_space<vmem>>, %arg8: memref<1x8x8x128xbf16, #tpu.memory_space<vmem>>) attributes {dimension_semantics = [#tpu.dimension_semantics<parallel>, #tpu.dimension_semantics<parallel>, #tpu.dimension_semantics<arbitrary>], iteration_bounds = array<i64: 2, 1, 1>, scalar_prefetch = 0 : i64, scratch_operands = 0 : i64, tpu.core_type = #tpu.core_type<tc>, window_params = [{transform_indices = @transform_0, window_bounds = array<i64: 1, 30, 8, 128>}, {transform_indices = @transform_1, window_bounds = array<i64: 9, 128, 128>}, {transform_indices = @transform_2, window_bounds = array<i64: 1, 128>}, {transform_indices = @transform_3, window_bounds = array<i64: 1, 128>}, {transform_indices = @transform_4, window_bounds = array<i64: 1, 8, 8, 128>}, {transform_indices = @transform_5, window_bounds = array<i64: 1, 8, 8, 128>}]} {
    %c0 = arith.constant 0 : index
    %c0_0 = arith.constant 0 : index
    %c0_1 = arith.constant 0 : index
    %c0_2 = arith.constant 0 : index
    %0 = vector.load %arg3[%c0, %c0_0, %c0_1, %c0_2] : memref<1x30x8x128xbf16, #tpu.memory_space<vmem>>, vector<1x8x8x128xbf16>
    %1 = vector.shape_cast %0 : vector<1x8x8x128xbf16> to vector<8x8x128xbf16>
    %2 = vector.shape_cast %1 : vector<8x8x128xbf16> to vector<64x128xbf16>
    %c0_3 = arith.constant 0 : index
    %c0_4 = arith.constant 0 : index
    %c0_5 = arith.constant 0 : index
    %3 = vector.load %arg4[%c0_3, %c0_4, %c0_5] : memref<9x128x128xbf16, #tpu.memory_space<vmem>>, vector<1x128x128xbf16>
    %4 = vector.shape_cast %3 : vector<1x128x128xbf16> to vector<128x128xbf16>
    %cst = arith.constant dense<0.000000e+00> : vector<64x128xf32>
    %5 = tpu.matmul %2, %4, %cst {dimension_numbers = #tpu.dot_dimension_numbers<[1], [0], [0], [1], [0, 0, 1, 1], [], []>} : vector<64x128xbf16>, vector<128x128xbf16>, vector<64x128xf32> -> vector<64x128xf32>
    %c0_6 = arith.constant 0 : index
    %c10 = arith.constant 10 : index
    %c0_7 = arith.constant 0 : index
    %c0_8 = arith.constant 0 : index
    %6 = vector.load %arg3[%c0_6, %c10, %c0_7, %c0_8] : memref<1x30x8x128xbf16, #tpu.memory_space<vmem>>, vector<1x8x8x128xbf16>
    %7 = vector.shape_cast %6 : vector<1x8x8x128xbf16> to vector<8x8x128xbf16>
    %8 = vector.shape_cast %7 : vector<8x8x128xbf16> to vector<64x128xbf16>
    %c1 = arith.constant 1 : index
    %c0_9 = arith.constant 0 : index
    %c0_10 = arith.constant 0 : index
    %9 = vector.load %arg4[%c1, %c0_9, %c0_10] : memref<9x128x128xbf16, #tpu.memory_space<vmem>>, vector<1x128x128xbf16>
    %10 = vector.shape_cast %9 : vector<1x128x128xbf16> to vector<128x128xbf16>
    %cst_11 = arith.constant dense<0.000000e+00> : vector<64x128xf32>
    %11 = tpu.matmul %8, %10, %cst_11 {dimension_numbers = #tpu.dot_dimension_numbers<[1], [0], [0], [1], [0, 0, 1, 1], [], []>} : vector<64x128xbf16>, vector<128x128xbf16>, vector<64x128xf32> -> vector<64x128xf32>
    %12 = arith.addf %5, %11 : vector<64x128xf32>
    %c0_12 = arith.constant 0 : index
    %c20 = arith.constant 20 : index
    %c0_13 = arith.constant 0 : index
    %c0_14 = arith.constant 0 : index
    %13 = vector.load %arg3[%c0_12, %c20, %c0_13, %c0_14] : memref<1x30x8x128xbf16, #tpu.memory_space<vmem>>, vector<1x8x8x128xbf16>
    %14 = vector.shape_cast %13 : vector<1x8x8x128xbf16> to vector<8x8x128xbf16>
    %15 = vector.shape_cast %14 : vector<8x8x128xbf16> to vector<64x128xbf16>
    %c2 = arith.constant 2 : index
    %c0_15 = arith.constant 0 : index
    %c0_16 = arith.constant 0 : index
    %16 = vector.load %arg4[%c2, %c0_15, %c0_16] : memref<9x128x128xbf16, #tpu.memory_space<vmem>>, vector<1x128x128xbf16>
    %17 = vector.shape_cast %16 : vector<1x128x128xbf16> to vector<128x128xbf16>
    %cst_17 = arith.constant dense<0.000000e+00> : vector<64x128xf32>
    %18 = tpu.matmul %15, %17, %cst_17 {dimension_numbers = #tpu.dot_dimension_numbers<[1], [0], [0], [1], [0, 0, 1, 1], [], []>} : vector<64x128xbf16>, vector<128x128xbf16>, vector<64x128xf32> -> vector<64x128xf32>
    %19 = arith.addf %12, %18 : vector<64x128xf32>
    %c0_18 = arith.constant 0 : index
    %c1_19 = arith.constant 1 : index
    %c0_20 = arith.constant 0 : index
    %c0_21 = arith.constant 0 : index
    %20 = vector.load %arg3[%c0_18, %c1_19, %c0_20, %c0_21] : memref<1x30x8x128xbf16, #tpu.memory_space<vmem>>, vector<1x8x8x128xbf16>
    %21 = vector.shape_cast %20 : vector<1x8x8x128xbf16> to vector<8x8x128xbf16>
    %22 = vector.shape_cast %21 : vector<8x8x128xbf16> to vector<64x128xbf16>
    %c3 = arith.constant 3 : index
    %c0_22 = arith.constant 0 : index
    %c0_23 = arith.constant 0 : index
    %23 = vector.load %arg4[%c3, %c0_22, %c0_23] : memref<9x128x128xbf16, #tpu.memory_space<vmem>>, vector<1x128x128xbf16>
    %24 = vector.shape_cast %23 : vector<1x128x128xbf16> to vector<128x128xbf16>
    %cst_24 = arith.constant dense<0.000000e+00> : vector<64x128xf32>
    %25 = tpu.matmul %22, %24, %cst_24 {dimension_numbers = #tpu.dot_dimension_numbers<[1], [0], [0], [1], [0, 0, 1, 1], [], []>} : vector<64x128xbf16>, vector<128x128xbf16>, vector<64x128xf32> -> vector<64x128xf32>
    %26 = arith.addf %19, %25 : vector<64x128xf32>
    %c0_25 = arith.constant 0 : index
    %c11 = arith.constant 11 : index
    %c0_26 = arith.constant 0 : index
    %c0_27 = arith.constant 0 : index
    %27 = vector.load %arg3[%c0_25, %c11, %c0_26, %c0_27] : memref<1x30x8x128xbf16, #tpu.memory_space<vmem>>, vector<1x8x8x128xbf16>
    %28 = vector.shape_cast %27 : vector<1x8x8x128xbf16> to vector<8x8x128xbf16>
    %29 = vector.shape_cast %28 : vector<8x8x128xbf16> to vector<64x128xbf16>
    %c4 = arith.constant 4 : index
    %c0_28 = arith.constant 0 : index
    %c0_29 = arith.constant 0 : index
    %30 = vector.load %arg4[%c4, %c0_28, %c0_29] : memref<9x128x128xbf16, #tpu.memory_space<vmem>>, vector<1x128x128xbf16>
    %31 = vector.shape_cast %30 : vector<1x128x128xbf16> to vector<128x128xbf16>
    %cst_30 = arith.constant dense<0.000000e+00> : vector<64x128xf32>
    %32 = tpu.matmul %29, %31, %cst_30 {dimension_numbers = #tpu.dot_dimension_numbers<[1], [0], [0], [1], [0, 0, 1, 1], [], []>} : vector<64x128xbf16>, vector<128x128xbf16>, vector<64x128xf32> -> vector<64x128xf32>
    %33 = arith.addf %26, %32 : vector<64x128xf32>
    %c0_31 = arith.constant 0 : index
    %c21 = arith.constant 21 : index
    %c0_32 = arith.constant 0 : index
    %c0_33 = arith.constant 0 : index
    %34 = vector.load %arg3[%c0_31, %c21, %c0_32, %c0_33] : memref<1x30x8x128xbf16, #tpu.memory_space<vmem>>, vector<1x8x8x128xbf16>
    %35 = vector.shape_cast %34 : vector<1x8x8x128xbf16> to vector<8x8x128xbf16>
    %36 = vector.shape_cast %35 : vector<8x8x128xbf16> to vector<64x128xbf16>
    %c5 = arith.constant 5 : index
    %c0_34 = arith.constant 0 : index
    %c0_35 = arith.constant 0 : index
    %37 = vector.load %arg4[%c5, %c0_34, %c0_35] : memref<9x128x128xbf16, #tpu.memory_space<vmem>>, vector<1x128x128xbf16>
    %38 = vector.shape_cast %37 : vector<1x128x128xbf16> to vector<128x128xbf16>
    %cst_36 = arith.constant dense<0.000000e+00> : vector<64x128xf32>
    %39 = tpu.matmul %36, %38, %cst_36 {dimension_numbers = #tpu.dot_dimension_numbers<[1], [0], [0], [1], [0, 0, 1, 1], [], []>} : vector<64x128xbf16>, vector<128x128xbf16>, vector<64x128xf32> -> vector<64x128xf32>
    %40 = arith.addf %33, %39 : vector<64x128xf32>
    %c0_37 = arith.constant 0 : index
    %c2_38 = arith.constant 2 : index
    %c0_39 = arith.constant 0 : index
    %c0_40 = arith.constant 0 : index
    %41 = vector.load %arg3[%c0_37, %c2_38, %c0_39, %c0_40] : memref<1x30x8x128xbf16, #tpu.memory_space<vmem>>, vector<1x8x8x128xbf16>
    %42 = vector.shape_cast %41 : vector<1x8x8x128xbf16> to vector<8x8x128xbf16>
    %43 = vector.shape_cast %42 : vector<8x8x128xbf16> to vector<64x128xbf16>
    %c6 = arith.constant 6 : index
    %c0_41 = arith.constant 0 : index
    %c0_42 = arith.constant 0 : index
    %44 = vector.load %arg4[%c6, %c0_41, %c0_42] : memref<9x128x128xbf16, #tpu.memory_space<vmem>>, vector<1x128x128xbf16>
    %45 = vector.shape_cast %44 : vector<1x128x128xbf16> to vector<128x128xbf16>
    %cst_43 = arith.constant dense<0.000000e+00> : vector<64x128xf32>
    %46 = tpu.matmul %43, %45, %cst_43 {dimension_numbers = #tpu.dot_dimension_numbers<[1], [0], [0], [1], [0, 0, 1, 1], [], []>} : vector<64x128xbf16>, vector<128x128xbf16>, vector<64x128xf32> -> vector<64x128xf32>
    %47 = arith.addf %40, %46 : vector<64x128xf32>
    %c0_44 = arith.constant 0 : index
    %c12 = arith.constant 12 : index
    %c0_45 = arith.constant 0 : index
    %c0_46 = arith.constant 0 : index
    %48 = vector.load %arg3[%c0_44, %c12, %c0_45, %c0_46] : memref<1x30x8x128xbf16, #tpu.memory_space<vmem>>, vector<1x8x8x128xbf16>
    %49 = vector.shape_cast %48 : vector<1x8x8x128xbf16> to vector<8x8x128xbf16>
    %50 = vector.shape_cast %49 : vector<8x8x128xbf16> to vector<64x128xbf16>
    %c7 = arith.constant 7 : index
    %c0_47 = arith.constant 0 : index
    %c0_48 = arith.constant 0 : index
    %51 = vector.load %arg4[%c7, %c0_47, %c0_48] : memref<9x128x128xbf16, #tpu.memory_space<vmem>>, vector<1x128x128xbf16>
    %52 = vector.shape_cast %51 : vector<1x128x128xbf16> to vector<128x128xbf16>
    %cst_49 = arith.constant dense<0.000000e+00> : vector<64x128xf32>
    %53 = tpu.matmul %50, %52, %cst_49 {dimension_numbers = #tpu.dot_dimension_numbers<[1], [0], [0], [1], [0, 0, 1, 1], [], []>} : vector<64x128xbf16>, vector<128x128xbf16>, vector<64x128xf32> -> vector<64x128xf32>
    %54 = arith.addf %47, %53 : vector<64x128xf32>
    %c0_50 = arith.constant 0 : index
    %c22 = arith.constant 22 : index
    %c0_51 = arith.constant 0 : index
    %c0_52 = arith.constant 0 : index
    %55 = vector.load %arg3[%c0_50, %c22, %c0_51, %c0_52] : memref<1x30x8x128xbf16, #tpu.memory_space<vmem>>, vector<1x8x8x128xbf16>
    %56 = vector.shape_cast %55 : vector<1x8x8x128xbf16> to vector<8x8x128xbf16>
    %57 = vector.shape_cast %56 : vector<8x8x128xbf16> to vector<64x128xbf16>
    %c8 = arith.constant 8 : index
    %c0_53 = arith.constant 0 : index
    %c0_54 = arith.constant 0 : index
    %58 = vector.load %arg4[%c8, %c0_53, %c0_54] : memref<9x128x128xbf16, #tpu.memory_space<vmem>>, vector<1x128x128xbf16>
    %59 = vector.shape_cast %58 : vector<1x128x128xbf16> to vector<128x128xbf16>
    %cst_55 = arith.constant dense<0.000000e+00> : vector<64x128xf32>
    %60 = tpu.matmul %57, %59, %cst_55 {dimension_numbers = #tpu.dot_dimension_numbers<[1], [0], [0], [1], [0, 0, 1, 1], [], []>} : vector<64x128xbf16>, vector<128x128xbf16>, vector<64x128xf32> -> vector<64x128xf32>
    %61 = arith.addf %54, %60 : vector<64x128xf32>
    %c0_56 = arith.constant 0 : index
    %c0_57 = arith.constant 0 : index
    %62 = vector.load %arg5[%c0_56, %c0_57] : memref<1x128xf32, #tpu.memory_space<vmem>>, vector<1x128xf32>
    %63 = vector.broadcast %62 : vector<1x128xf32> to vector<64x128xf32>
    %64 = arith.mulf %61, %63 : vector<64x128xf32>
    %c0_58 = arith.constant 0 : index
    %c0_59 = arith.constant 0 : index
    %65 = vector.load %arg6[%c0_58, %c0_59] : memref<1x128xf32, #tpu.memory_space<vmem>>, vector<1x128xf32>
    %66 = vector.broadcast %65 : vector<1x128xf32> to vector<64x128xf32>
    %67 = arith.addf %64, %66 : vector<64x128xf32>
    %c0_60 = arith.constant 0 : index
    %c0_61 = arith.constant 0 : index
    %c0_62 = arith.constant 0 : index
    %c0_63 = arith.constant 0 : index
    %68 = vector.load %arg7[%c0_60, %c0_61, %c0_62, %c0_63] : memref<1x8x8x128xbf16, #tpu.memory_space<vmem>>, vector<1x8x8x128xbf16>
    %69 = vector.shape_cast %68 : vector<1x8x8x128xbf16> to vector<8x8x128xbf16>
    %70 = vector.shape_cast %69 : vector<8x8x128xbf16> to vector<64x128xbf16>
    %71 = arith.extf %70 : vector<64x128xbf16> to vector<64x128xf32>
    %72 = arith.addf %67, %71 : vector<64x128xf32>
    %cst_64 = arith.constant 0.000000e+00 : f32
    %73 = vector.broadcast %cst_64 : f32 to vector<64x128xf32>
    %74 = arith.maximumf %72, %73 : vector<64x128xf32>
    %75 = vector.shape_cast %74 : vector<64x128xf32> to vector<1x8x8x128xf32>
    %76 = arith.truncf %75 : vector<1x8x8x128xf32> to vector<1x8x8x128xbf16>
    %c0_65 = arith.constant 0 : index
    %c0_66 = arith.constant 0 : index
    %c0_67 = arith.constant 0 : index
    %c0_68 = arith.constant 0 : index
    %77 = vector.load %arg8[%c0_65, %c0_66, %c0_67, %c0_68] : memref<1x8x8x128xbf16, #tpu.memory_space<vmem>>, vector<1x8x8x128xbf16>
    tpu.vector_store %arg8[%c0_65, %c0_66, %c0_67, %c0_68], %76 {strides = array<i32>} : memref<1x8x8x128xbf16, #tpu.memory_space<vmem>>, vector<1x8x8x128xbf16>,
    return
  }
  func.func @transform_0(%arg0: i32, %arg1: i32, %arg2: i32) -> (i32, i32, i32, i32) {
    %c0_i32 = arith.constant 0 : i32
    %c0_i32_0 = arith.constant 0 : i32
    %c0_i32_1 = arith.constant 0 : i32
    return %arg0, %c0_i32, %arg1, %c0_i32_0 : i32, i32, i32, i32
  }
  func.func @transform_1(%arg0: i32, %arg1: i32, %arg2: i32) -> (i32, i32, i32) {
    %c0_i32 = arith.constant 0 : i32
    %c0_i32_0 = arith.constant 0 : i32
    %c0_i32_1 = arith.constant 0 : i32
    return %c0_i32, %c0_i32_0, %arg2 : i32, i32, i32
  }
  func.func @transform_2(%arg0: i32, %arg1: i32, %arg2: i32) -> (i32, i32) {
    %c0_i32 = arith.constant 0 : i32
    %c0_i32_0 = arith.constant 0 : i32
    return %c0_i32, %arg2 : i32, i32
  }
  func.func @transform_3(%arg0: i32, %arg1: i32, %arg2: i32) -> (i32, i32) {
    %c0_i32 = arith.constant 0 : i32
    %c0_i32_0 = arith.constant 0 : i32
    return %c0_i32, %arg2 : i32, i32
  }
  func.func @transform_4(%arg0: i32, %arg1: i32, %arg2: i32) -> (i32, i32, i32, i32) {
    %c0_i32 = arith.constant 0 : i32
    %c0_i32_0 = arith.constant 0 : i32
    return %arg0, %c0_i32, %arg1, %arg2 : i32, i32, i32, i32
  }
  func.func @transform_5(%arg0: i32, %arg1: i32, %arg2: i32) -> (i32, i32, i32, i32) {
    %c0_i32 = arith.constant 0 : i32
    %c0_i32_0 = arith.constant 0 : i32
    return %arg0, %c0_i32, %arg1, %arg2 : i32, i32, i32, i32
  }
}

module attributes {stable_mosaic.version = 11 : i64} {
  func.func @_conv_bn_kernel(%arg0: i32, %arg1: i32, %arg2: i32, %arg3: memref<1x30x8x128xbf16, #tpu.memory_space<vmem>>, %arg4: memref<9x128x128xbf16, #tpu.memory_space<vmem>>, %arg5: memref<1x128xf32, #tpu.memory_space<vmem>>, %arg6: memref<1x128xf32, #tpu.memory_space<vmem>>, %arg7: memref<1x8x8x128xbf16, #tpu.memory_space<vmem>>) attributes {dimension_semantics = [#tpu.dimension_semantics<parallel>, #tpu.dimension_semantics<parallel>, #tpu.dimension_semantics<arbitrary>], iteration_bounds = array<i64: 2, 1, 1>, scalar_prefetch = 0 : i64, scratch_operands = 0 : i64, tpu.core_type = #tpu.core_type<tc>, window_params = [{transform_indices = @transform_0, window_bounds = array<i64: 1, 30, 8, 128>}, {transform_indices = @transform_1, window_bounds = array<i64: 9, 128, 128>}, {transform_indices = @transform_2, window_bounds = array<i64: 1, 128>}, {transform_indices = @transform_3, window_bounds = array<i64: 1, 128>}, {transform_indices = @transform_4, window_bounds = array<i64: 1, 8, 8, 128>}]} {
    %c0 = arith.constant 0 : index
    %c0_0 = arith.constant 0 : index
    %c0_1 = arith.constant 0 : index
    %c0_2 = arith.constant 0 : index
    %0 = vector.load %arg3[%c0, %c0_0, %c0_1, %c0_2] : memref<1x30x8x128xbf16, #tpu.memory_space<vmem>>, vector<1x8x8x128xbf16>
    %1 = vector.shape_cast %0 : vector<1x8x8x128xbf16> to vector<8x8x128xbf16>
    %2 = vector.shape_cast %1 : vector<8x8x128xbf16> to vector<64x128xbf16>
    %c0_3 = arith.constant 0 : index
    %c0_4 = arith.constant 0 : index
    %c0_5 = arith.constant 0 : index
    %3 = vector.load %arg4[%c0_3, %c0_4, %c0_5] : memref<9x128x128xbf16, #tpu.memory_space<vmem>>, vector<1x128x128xbf16>
    %4 = vector.shape_cast %3 : vector<1x128x128xbf16> to vector<128x128xbf16>
    %cst = arith.constant dense<0.000000e+00> : vector<64x128xf32>
    %5 = tpu.matmul %2, %4, %cst {dimension_numbers = #tpu.dot_dimension_numbers<[1], [0], [0], [1], [0, 0, 1, 1], [], []>} : vector<64x128xbf16>, vector<128x128xbf16>, vector<64x128xf32> -> vector<64x128xf32>
    %c0_6 = arith.constant 0 : index
    %c10 = arith.constant 10 : index
    %c0_7 = arith.constant 0 : index
    %c0_8 = arith.constant 0 : index
    %6 = vector.load %arg3[%c0_6, %c10, %c0_7, %c0_8] : memref<1x30x8x128xbf16, #tpu.memory_space<vmem>>, vector<1x8x8x128xbf16>
    %7 = vector.shape_cast %6 : vector<1x8x8x128xbf16> to vector<8x8x128xbf16>
    %8 = vector.shape_cast %7 : vector<8x8x128xbf16> to vector<64x128xbf16>
    %c1 = arith.constant 1 : index
    %c0_9 = arith.constant 0 : index
    %c0_10 = arith.constant 0 : index
    %9 = vector.load %arg4[%c1, %c0_9, %c0_10] : memref<9x128x128xbf16, #tpu.memory_space<vmem>>, vector<1x128x128xbf16>
    %10 = vector.shape_cast %9 : vector<1x128x128xbf16> to vector<128x128xbf16>
    %cst_11 = arith.constant dense<0.000000e+00> : vector<64x128xf32>
    %11 = tpu.matmul %8, %10, %cst_11 {dimension_numbers = #tpu.dot_dimension_numbers<[1], [0], [0], [1], [0, 0, 1, 1], [], []>} : vector<64x128xbf16>, vector<128x128xbf16>, vector<64x128xf32> -> vector<64x128xf32>
    %12 = arith.addf %5, %11 : vector<64x128xf32>
    %c0_12 = arith.constant 0 : index
    %c20 = arith.constant 20 : index
    %c0_13 = arith.constant 0 : index
    %c0_14 = arith.constant 0 : index
    %13 = vector.load %arg3[%c0_12, %c20, %c0_13, %c0_14] : memref<1x30x8x128xbf16, #tpu.memory_space<vmem>>, vector<1x8x8x128xbf16>
    %14 = vector.shape_cast %13 : vector<1x8x8x128xbf16> to vector<8x8x128xbf16>
    %15 = vector.shape_cast %14 : vector<8x8x128xbf16> to vector<64x128xbf16>
    %c2 = arith.constant 2 : index
    %c0_15 = arith.constant 0 : index
    %c0_16 = arith.constant 0 : index
    %16 = vector.load %arg4[%c2, %c0_15, %c0_16] : memref<9x128x128xbf16, #tpu.memory_space<vmem>>, vector<1x128x128xbf16>
    %17 = vector.shape_cast %16 : vector<1x128x128xbf16> to vector<128x128xbf16>
    %cst_17 = arith.constant dense<0.000000e+00> : vector<64x128xf32>
    %18 = tpu.matmul %15, %17, %cst_17 {dimension_numbers = #tpu.dot_dimension_numbers<[1], [0], [0], [1], [0, 0, 1, 1], [], []>} : vector<64x128xbf16>, vector<128x128xbf16>, vector<64x128xf32> -> vector<64x128xf32>
    %19 = arith.addf %12, %18 : vector<64x128xf32>
    %c0_18 = arith.constant 0 : index
    %c1_19 = arith.constant 1 : index
    %c0_20 = arith.constant 0 : index
    %c0_21 = arith.constant 0 : index
    %20 = vector.load %arg3[%c0_18, %c1_19, %c0_20, %c0_21] : memref<1x30x8x128xbf16, #tpu.memory_space<vmem>>, vector<1x8x8x128xbf16>
    %21 = vector.shape_cast %20 : vector<1x8x8x128xbf16> to vector<8x8x128xbf16>
    %22 = vector.shape_cast %21 : vector<8x8x128xbf16> to vector<64x128xbf16>
    %c3 = arith.constant 3 : index
    %c0_22 = arith.constant 0 : index
    %c0_23 = arith.constant 0 : index
    %23 = vector.load %arg4[%c3, %c0_22, %c0_23] : memref<9x128x128xbf16, #tpu.memory_space<vmem>>, vector<1x128x128xbf16>
    %24 = vector.shape_cast %23 : vector<1x128x128xbf16> to vector<128x128xbf16>
    %cst_24 = arith.constant dense<0.000000e+00> : vector<64x128xf32>
    %25 = tpu.matmul %22, %24, %cst_24 {dimension_numbers = #tpu.dot_dimension_numbers<[1], [0], [0], [1], [0, 0, 1, 1], [], []>} : vector<64x128xbf16>, vector<128x128xbf16>, vector<64x128xf32> -> vector<64x128xf32>
    %26 = arith.addf %19, %25 : vector<64x128xf32>
    %c0_25 = arith.constant 0 : index
    %c11 = arith.constant 11 : index
    %c0_26 = arith.constant 0 : index
    %c0_27 = arith.constant 0 : index
    %27 = vector.load %arg3[%c0_25, %c11, %c0_26, %c0_27] : memref<1x30x8x128xbf16, #tpu.memory_space<vmem>>, vector<1x8x8x128xbf16>
    %28 = vector.shape_cast %27 : vector<1x8x8x128xbf16> to vector<8x8x128xbf16>
    %29 = vector.shape_cast %28 : vector<8x8x128xbf16> to vector<64x128xbf16>
    %c4 = arith.constant 4 : index
    %c0_28 = arith.constant 0 : index
    %c0_29 = arith.constant 0 : index
    %30 = vector.load %arg4[%c4, %c0_28, %c0_29] : memref<9x128x128xbf16, #tpu.memory_space<vmem>>, vector<1x128x128xbf16>
    %31 = vector.shape_cast %30 : vector<1x128x128xbf16> to vector<128x128xbf16>
    %cst_30 = arith.constant dense<0.000000e+00> : vector<64x128xf32>
    %32 = tpu.matmul %29, %31, %cst_30 {dimension_numbers = #tpu.dot_dimension_numbers<[1], [0], [0], [1], [0, 0, 1, 1], [], []>} : vector<64x128xbf16>, vector<128x128xbf16>, vector<64x128xf32> -> vector<64x128xf32>
    %33 = arith.addf %26, %32 : vector<64x128xf32>
    %c0_31 = arith.constant 0 : index
    %c21 = arith.constant 21 : index
    %c0_32 = arith.constant 0 : index
    %c0_33 = arith.constant 0 : index
    %34 = vector.load %arg3[%c0_31, %c21, %c0_32, %c0_33] : memref<1x30x8x128xbf16, #tpu.memory_space<vmem>>, vector<1x8x8x128xbf16>
    %35 = vector.shape_cast %34 : vector<1x8x8x128xbf16> to vector<8x8x128xbf16>
    %36 = vector.shape_cast %35 : vector<8x8x128xbf16> to vector<64x128xbf16>
    %c5 = arith.constant 5 : index
    %c0_34 = arith.constant 0 : index
    %c0_35 = arith.constant 0 : index
    %37 = vector.load %arg4[%c5, %c0_34, %c0_35] : memref<9x128x128xbf16, #tpu.memory_space<vmem>>, vector<1x128x128xbf16>
    %38 = vector.shape_cast %37 : vector<1x128x128xbf16> to vector<128x128xbf16>
    %cst_36 = arith.constant dense<0.000000e+00> : vector<64x128xf32>
    %39 = tpu.matmul %36, %38, %cst_36 {dimension_numbers = #tpu.dot_dimension_numbers<[1], [0], [0], [1], [0, 0, 1, 1], [], []>} : vector<64x128xbf16>, vector<128x128xbf16>, vector<64x128xf32> -> vector<64x128xf32>
    %40 = arith.addf %33, %39 : vector<64x128xf32>
    %c0_37 = arith.constant 0 : index
    %c2_38 = arith.constant 2 : index
    %c0_39 = arith.constant 0 : index
    %c0_40 = arith.constant 0 : index
    %41 = vector.load %arg3[%c0_37, %c2_38, %c0_39, %c0_40] : memref<1x30x8x128xbf16, #tpu.memory_space<vmem>>, vector<1x8x8x128xbf16>
    %42 = vector.shape_cast %41 : vector<1x8x8x128xbf16> to vector<8x8x128xbf16>
    %43 = vector.shape_cast %42 : vector<8x8x128xbf16> to vector<64x128xbf16>
    %c6 = arith.constant 6 : index
    %c0_41 = arith.constant 0 : index
    %c0_42 = arith.constant 0 : index
    %44 = vector.load %arg4[%c6, %c0_41, %c0_42] : memref<9x128x128xbf16, #tpu.memory_space<vmem>>, vector<1x128x128xbf16>
    %45 = vector.shape_cast %44 : vector<1x128x128xbf16> to vector<128x128xbf16>
    %cst_43 = arith.constant dense<0.000000e+00> : vector<64x128xf32>
    %46 = tpu.matmul %43, %45, %cst_43 {dimension_numbers = #tpu.dot_dimension_numbers<[1], [0], [0], [1], [0, 0, 1, 1], [], []>} : vector<64x128xbf16>, vector<128x128xbf16>, vector<64x128xf32> -> vector<64x128xf32>
    %47 = arith.addf %40, %46 : vector<64x128xf32>
    %c0_44 = arith.constant 0 : index
    %c12 = arith.constant 12 : index
    %c0_45 = arith.constant 0 : index
    %c0_46 = arith.constant 0 : index
    %48 = vector.load %arg3[%c0_44, %c12, %c0_45, %c0_46] : memref<1x30x8x128xbf16, #tpu.memory_space<vmem>>, vector<1x8x8x128xbf16>
    %49 = vector.shape_cast %48 : vector<1x8x8x128xbf16> to vector<8x8x128xbf16>
    %50 = vector.shape_cast %49 : vector<8x8x128xbf16> to vector<64x128xbf16>
    %c7 = arith.constant 7 : index
    %c0_47 = arith.constant 0 : index
    %c0_48 = arith.constant 0 : index
    %51 = vector.load %arg4[%c7, %c0_47, %c0_48] : memref<9x128x128xbf16, #tpu.memory_space<vmem>>, vector<1x128x128xbf16>
    %52 = vector.shape_cast %51 : vector<1x128x128xbf16> to vector<128x128xbf16>
    %cst_49 = arith.constant dense<0.000000e+00> : vector<64x128xf32>
    %53 = tpu.matmul %50, %52, %cst_49 {dimension_numbers = #tpu.dot_dimension_numbers<[1], [0], [0], [1], [0, 0, 1, 1], [], []>} : vector<64x128xbf16>, vector<128x128xbf16>, vector<64x128xf32> -> vector<64x128xf32>
    %54 = arith.addf %47, %53 : vector<64x128xf32>
    %c0_50 = arith.constant 0 : index
    %c22 = arith.constant 22 : index
    %c0_51 = arith.constant 0 : index
    %c0_52 = arith.constant 0 : index
    %55 = vector.load %arg3[%c0_50, %c22, %c0_51, %c0_52] : memref<1x30x8x128xbf16, #tpu.memory_space<vmem>>, vector<1x8x8x128xbf16>
    %56 = vector.shape_cast %55 : vector<1x8x8x128xbf16> to vector<8x8x128xbf16>
    %57 = vector.shape_cast %56 : vector<8x8x128xbf16> to vector<64x128xbf16>
    %c8 = arith.constant 8 : index
    %c0_53 = arith.constant 0 : index
    %c0_54 = arith.constant 0 : index
    %58 = vector.load %arg4[%c8, %c0_53, %c0_54] : memref<9x128x128xbf16, #tpu.memory_space<vmem>>, vector<1x128x128xbf16>
    %59 = vector.shape_cast %58 : vector<1x128x128xbf16> to vector<128x128xbf16>
    %cst_55 = arith.constant dense<0.000000e+00> : vector<64x128xf32>
    %60 = tpu.matmul %57, %59, %cst_55 {dimension_numbers = #tpu.dot_dimension_numbers<[1], [0], [0], [1], [0, 0, 1, 1], [], []>} : vector<64x128xbf16>, vector<128x128xbf16>, vector<64x128xf32> -> vector<64x128xf32>
    %61 = arith.addf %54, %60 : vector<64x128xf32>
    %c0_56 = arith.constant 0 : index
    %c0_57 = arith.constant 0 : index
    %62 = vector.load %arg5[%c0_56, %c0_57] : memref<1x128xf32, #tpu.memory_space<vmem>>, vector<1x128xf32>
    %63 = vector.broadcast %62 : vector<1x128xf32> to vector<64x128xf32>
    %64 = arith.mulf %61, %63 : vector<64x128xf32>
    %c0_58 = arith.constant 0 : index
    %c0_59 = arith.constant 0 : index
    %65 = vector.load %arg6[%c0_58, %c0_59] : memref<1x128xf32, #tpu.memory_space<vmem>>, vector<1x128xf32>
    %66 = vector.broadcast %65 : vector<1x128xf32> to vector<64x128xf32>
    %67 = arith.addf %64, %66 : vector<64x128xf32>
    %cst_60 = arith.constant 0.000000e+00 : f32
    %68 = vector.broadcast %cst_60 : f32 to vector<64x128xf32>
    %69 = arith.maximumf %67, %68 : vector<64x128xf32>
    %70 = vector.shape_cast %69 : vector<64x128xf32> to vector<1x8x8x128xf32>
    %71 = arith.truncf %70 : vector<1x8x8x128xf32> to vector<1x8x8x128xbf16>
    %c0_61 = arith.constant 0 : index
    %c0_62 = arith.constant 0 : index
    %c0_63 = arith.constant 0 : index
    %c0_64 = arith.constant 0 : index
    %72 = vector.load %arg7[%c0_61, %c0_62, %c0_63, %c0_64] : memref<1x8x8x128xbf16, #tpu.memory_space<vmem>>, vector<1x8x8x128xbf16>
    tpu.vector_store %arg7[%c0_61, %c0_62, %c0_63, %c0_64], %71 {strides = array<i32>} : memref<1x8x8x128xbf16, #tpu.memory_space<vmem>>, vector<1x8x8x128xbf16>,
    return
  }
  func.func @transform_0(%arg0: i32, %arg1: i32, %arg2: i32) -> (i32, i32, i32, i32) {
    %c0_i32 = arith.constant 0 : i32
    %c0_i32_0 = arith.constant 0 : i32
    %c0_i32_1 = arith.constant 0 : i32
    return %arg0, %c0_i32, %arg1, %c0_i32_0 : i32, i32, i32, i32
  }
  func.func @transform_1(%arg0: i32, %arg1: i32, %arg2: i32) -> (i32, i32, i32) {
    %c0_i32 = arith.constant 0 : i32
    %c0_i32_0 = arith.constant 0 : i32
    %c0_i32_1 = arith.constant 0 : i32
    return %c0_i32, %c0_i32_0, %arg2 : i32, i32, i32
  }
  func.func @transform_2(%arg0: i32, %arg1: i32, %arg2: i32) -> (i32, i32) {
    %c0_i32 = arith.constant 0 : i32
    %c0_i32_0 = arith.constant 0 : i32
    return %c0_i32, %arg2 : i32, i32
  }
  func.func @transform_3(%arg0: i32, %arg1: i32, %arg2: i32) -> (i32, i32) {
    %c0_i32 = arith.constant 0 : i32
    %c0_i32_0 = arith.constant 0 : i32
    return %c0_i32, %arg2 : i32, i32
  }
  func.func @transform_4(%arg0: i32, %arg1: i32, %arg2: i32) -> (i32, i32, i32, i32) {
    %c0_i32 = arith.constant 0 : i32
    %c0_i32_0 = arith.constant 0 : i32
    return %arg0, %c0_i32, %arg1, %arg2 : i32, i32, i32, i32
  }
}

</mosaic_0001>

<bundles_post_ra>
// kernel: _lambda_.6
= control target key start
LH: loop header
LB: loop body
LE: loop exit
PB: predicated region body
PF: predicated region fallthrough
CT: control target
= control target key end

     0   :  { %s823_s15 = smov 0   ;;  %s825_s16 = smov 0   ;;  %s899_s0 = inlined_call_operand.vmem [shape: bf16[2,8,8,128], index: 0, kind: input, shape index: {}]   ;;  %s900_s1 = inlined_call_operand.vmem [shape: bf16[1,128,128], index: 1, kind: input, shape index: {}]   ;;  %s901_s2 = inlined_call_operand.vmem [shape: f32[1,128], index: 2, kind: input, shape index: {}]   ;;  %s902_s3 = inlined_call_operand.vmem [shape: f32[1,128], index: 3, kind: input, shape index: {}]   ;;  %s903_s4 = inlined_call_operand.vmem [shape: bf16[2,8,8,128], index: 4, kind: output, shape index: {}]  }
   0x1   :  { %s827_s17 = smov 0  }
   0x2 LB: > { %s33_s18 = sadd.s32 1, %s792_s16  ;;  %p640_p0 = scmp.ge.s32.totalorder %s796_s17, 1  ;;  %s796_s17 = sphi %s827_s17, %s14_s17   ;;  %s792_s16 = sphi %s825_s16, %s905_s16   ;;  %s788_s15 = sphi %s823_s15, %s904_s15  }
   0x3   : > { %p35_p1 = scmp.ge.s32.totalorder %s33_s18, 2  ;;  %p215_p2 = scmp.lt.s32.totalorder %s796_s17, 3 }
   0x5   : > { %s907_s18 = smov (%p35_p1, %s33_s18), 0  ;;  %p216_p3 = pnand %p640_p0, %p215_p2 }
   0x6   : > { %v762_v0 = vld [vmem:[%s900_s1] sm:$0xff] (!%p216_p3)   ;;  %p260_p4 = scmp.lt.s32.totalorder (!%p216_p3), %s788_s15, 1  ;;  %v763_v1 = vld [vmem:[%s900_s1 + $0x8] sm:$0xff] (!%p216_p3)   ;;  %v764_v2 = vld [vmem:[%s900_s1 + $0x10] sm:$0xff] (!%p216_p3)  }
   0x7   : > { %219 = sbr.rel (%p216_p3) target bundleno = 261 (0x105), region = 36  ;;  %698 = vmatprep.subr.bf16.mxu0 (!%p216_p3), %v762_v0  ;;  %722 = vmatprep.subr.bf16.mxu1 (!%p216_p3), %v762_v0  ;;  %v765_v3 = vld [vmem:[%s900_s1 + $0x18] sm:$0xff] (!%p216_p3)   ;;  %v766_v6 = vld [vmem:[%s900_s1 + $0x20] sm:$0xff] (!%p216_p3)   ;;  %v767_v7 = vld [vmem:[%s900_s1 + $0x28] sm:$0xff] (!%p216_p3)  }
   0x8   : > { %699 = vmatpush3.bf16.msra.mxu0 (!%p216_p3), %v762_v0  ;;  %730 = vmatpush3.bf16.msra.mxu1 (!%p216_p3), %v762_v0  ;;  %v768_v8 = vld [vmem:[%s900_s1 + $0x30] sm:$0xff] (!%p216_p3)   ;;  %v769_v9 = vld [vmem:[%s900_s1 + $0x38] sm:$0xff] (!%p216_p3)   ;;  %v657_v12 = vld [vmem:[%s901_s2] ss:$0 sm:$0xff] (!%p216_p3) }
   0x9   : > { %700 = vmatprep.subr.bf16.mxu0 (!%p216_p3), %v763_v1  ;;  %723 = vmatprep.subr.bf16.mxu1 (!%p216_p3), %v763_v1  ;;  %v658_v19 = vld [vmem:[%s902_s3] ss:$0 sm:$0xff] (!%p216_p3) }
   0xc   : > { %701 = vmatpush3.bf16.msra.mxu0 (!%p216_p3), %v763_v1  ;;  %731 = vmatpush3.bf16.msra.mxu1 (!%p216_p3), %v763_v1 }
   0xd   : > { %702 = vmatprep.subr.bf16.mxu0 (!%p216_p3), %v764_v2  ;;  %724 = vmatprep.subr.bf16.mxu1 (!%p216_p3), %v764_v2 }
   0xe   : > { %s909_s15 = smov (!%p260_p4, %s788_s15), 1 }
   0xf   : > { %s661_s25 = sshll.u32 %s909_s15, 5 }
  0x10   : > { %s858_s28 = scalar_lea.vmem %s899_s0, %s661_s25  ;;  %703 = vmatpush3.bf16.msra.mxu0 %v764_v2  ;;  %732 = vmatpush3.bf16.msra.mxu1 %v764_v2  ;;  %s288_s23 = scalar_lea.vmem %s903_s4, %s661_s25 }
  0x11   : > { %v770_v4 = vld [vmem:[%s858_s28] sm:$0xff]   ;;  %v771_v5 = vld [vmem:[%s858_s28 + $0x10] sm:$0xff]   ;;  %704 = vmatprep.subr.bf16.mxu0 %v765_v3  ;;  %725 = vmatprep.subr.bf16.mxu1 %v765_v3  ;;  %v772_v10 = vld [vmem:[%s858_s28 + $0x8] sm:$0xff]  }
  0x12   : > { %714 = vmatprep.mubr.bf16.mxu0 %v770_v4  ;;  %718 = vmatprep.mubr.bf16.mxu1 %v771_v5  ;;  %v773_v11 = vld [vmem:[%s858_s28 + $0x18] sm:$0xff]  }
  0x14   : > { %705 = vmatpush3.bf16.msra.mxu0 %v765_v3  ;;  %733 = vmatpush3.bf16.msra.mxu1 %v765_v3 }
  0x15   : > { %706 = vmatprep.subr.bf16.mxu0 %v766_v6  ;;  %726 = vmatprep.subr.bf16.mxu1 %v766_v6 }
  0x18   : > { %707 = vmatpush3.bf16.msra.mxu0 %v766_v6  ;;  %734 = vmatpush3.bf16.msra.mxu1 %v766_v6 }
  0x19   : > { %708 = vmatprep.subr.bf16.mxu0 %v767_v7  ;;  %727 = vmatprep.subr.bf16.mxu1 %v767_v7 }
  0x1c   : > { %709 = vmatpush3.bf16.msra.mxu0 %v767_v7  ;;  %735 = vmatpush3.bf16.msra.mxu1 %v767_v7 }
  0x1d   : > { %710 = vmatprep.subr.bf16.mxu0 %v768_v8  ;;  %728 = vmatprep.subr.bf16.mxu1 %v768_v8 }
  0x20   : > { %711 = vmatpush3.bf16.msra.mxu0 %v768_v8  ;;  %736 = vmatpush3.bf16.msra.mxu1 %v768_v8 }
  0x21   : > { %712 = vmatprep.subr.bf16.mxu0 %v769_v9  ;;  %729 = vmatprep.subr.bf16.mxu1 %v769_v9 }
  0x24   : > { %713 = vmatpush3.bf16.msra.mxu0 %v769_v9  ;;  %737 = vmatpush3.bf16.msra.mxu1 %v769_v9 }
  0x27   : > { %715 = vmatmul.mubr.bf16.vlgmr.msra.gmra.mrb[0].mxu0 %v772_v10  ;;  %719 = vmatmul.mubr.bf16.vlgmr.msra.gmra.mrb[0].mxu1 %v773_v11 }
  0xfa   : > { %v716_v13 = vpop.f32.mrb[0].mxu0  ;;  %v720_v14 = vpop.f32.mrb[0].mxu1 }
  0xfb   : > { %v460_v15 = vmul.f32 %v716_v13, %v657_v12  ;;  %v464_v16 = vmul.f32 %v720_v14, %v657_v12  ;;  %v420_v17 = vpop.f32.mrb[1].mxu0  ;;  %v436_v18 = vpop.f32.mrb[1].mxu1 }
  0xfc   : > { %v458_v20 = vmul.f32 %v657_v12, %v420_v17  ;;  %v462_v21 = vmul.f32 %v657_v12, %v436_v18  ;;  %v717_v22 = vpop.f32.mrb[2].mxu0  ;;  %v721_v23 = vpop.f32.mrb[2].mxu1 }
  0xfd   : > { %v461_v24 = vmul.f32 %v717_v22, %v657_v12  ;;  %v465_v25 = vmul.f32 %v721_v23, %v657_v12  ;;  %v423_v26 = vpop.f32.mrb[3].mxu0  ;;  %v439_v27 = vpop.f32.mrb[3].mxu1  ;;  %v475_v30 = vadd.f32 %v658_v19, %v460_v15  ;;  %v479_v31 = vadd.f32 %v658_v19, %v464_v16 }
  0xfe   : > { %v459_v28 = vmul.f32 %v657_v12, %v423_v26  ;;  %v463_v29 = vmul.f32 %v657_v12, %v439_v27  ;;  %v473_v34 = vadd.f32 %v658_v19, %v458_v20  ;;  %v477_v35 = vadd.f32 %v658_v19, %v462_v21 }
  0xff   : > { %v476_v32 = vadd.f32 %v658_v19, %v461_v24  ;;  %v480_v33 = vadd.f32 %v658_v19, %v465_v25 }
 0x100   : > { %v474_v36 = vadd.f32 %v658_v19, %v459_v28  ;;  %v478_v37 = vadd.f32 %v658_v19, %v463_v29 }
 0x101   : > { %v671_v38 = vpack.c.bf16 %v476_v32, %v475_v30  ;;  %v681_v39 = vpack.c.bf16 %v480_v33, %v479_v31 }
 0x102   : > { %v666_v40 = vpack.c.bf16 %v474_v36, %v473_v34  ;;  %v676_v41 = vpack.c.bf16 %v478_v37, %v477_v35 }
 0x103   : > { %683 = vst [vmem:[%s288_s23 + $0x8] sm:$0xff] %v671_v38   ;;  %685 = vst [vmem:[%s288_s23 + $0x18] sm:$0xff] %v681_v39  }
 0x104   : > { %667 = vst [vmem:[%s288_s23] sm:$0xff] %v666_v40   ;;  %684 = vst [vmem:[%s288_s23 + $0x10] sm:$0xff] %v676_v41  }
 0x105 PF: > { %s14_s17 = sadd.s32 1, %s796_s17   ;;  %s904_s15 = smov %s792_s16 }
 0x106   : > { %p11_p5 = scmp.ge.s32.totalorder %s14_s17, 4   ;;  %s905_s16 = smov %s907_s18 }
 0x108   :  { %13 = sbr.rel (!%p11_p5) target bundleno = 2 (0x2), region = 75 }

// kernel: _lambda_.5
= control target key start
LH: loop header
LB: loop body
LE: loop exit
PB: predicated region body
PF: predicated region fallthrough
CT: control target
= control target key end

     0   :  { %s2926_s15 = smov 0   ;;  %s2928_s16 = smov 0   ;;  %s3223_s0 = inlined_call_operand.vmem [shape: bf16[2,54,8,128], index: 0, kind: input, shape index: {}]   ;;  %s3224_s1 = inlined_call_operand.vmem [shape: bf16[9,128,128], index: 1, kind: input, shape index: {}]   ;;  %s3225_s2 = inlined_call_operand.vmem [shape: f32[1,128], index: 2, kind: input, shape index: {}]   ;;  %s3226_s3 = inlined_call_operand.vmem [shape: f32[1,128], index: 3, kind: input, shape index: {}]   ;;  %s3227_s4 = inlined_call_operand.vmem [shape: bf16[2,8,8,128], index: 4, kind: output, shape index: {}]  }
   0x1   :  { %s2930_s17 = smov 0  }
   0x2 LB: > { %s33_s18 = sadd.s32 1, %s2895_s16  ;;  %p2008_p0 = scmp.ge.s32.totalorder %s2899_s17, 1  ;;  %s2899_s17 = sphi %s2930_s17, %s14_s17   ;;  %s2895_s16 = sphi %s2928_s16, %s3229_s16   ;;  %s2891_s15 = sphi %s2926_s15, %s3228_s15  }
   0x3   : > { %p35_p1 = scmp.ge.s32.totalorder %s33_s18, 2  ;;  %p215_p2 = scmp.lt.s32.totalorder %s2899_s17, 3 }
   0x5   : > { %s3231_s18 = smov (%p35_p1, %s33_s18), 0  ;;  %p216_p3 = pnand %p2008_p0, %p215_p2 }
   0x6   : > { %v2769_v0 = vld [vmem:[%s3224_s1 + $0x40] sm:$0xff] (!%p216_p3)   ;;  %p260_p4 = scmp.lt.s32.totalorder (!%p216_p3), %s2891_s15, 1  ;;  %v2771_v2 = vld [vmem:[%s3224_s1 + $0x48] sm:$0xff] (!%p216_p3)   ;;  %v2773_v4 = vld [vmem:[%s3224_s1 + $0x50] sm:$0xff] (!%p216_p3)  }
   0x7   : > { %219 = sbr.rel (%p216_p3) target bundleno = 394 (0x18a), region = 36  ;;  %v2770_v1 = vld [vmem:[%s3224_s1 + $0x100] sm:$0xff] (!%p216_p3)   ;;  %2448 = vmatprep.subr.bf16.mxu1 (!%p216_p3), %v2769_v0  ;;  %v2772_v3 = vld [vmem:[%s3224_s1 + $0x108] sm:$0xff] (!%p216_p3)   ;;  %v2774_v5 = vld [vmem:[%s3224_s1 + $0x110] sm:$0xff] (!%p216_p3)  }
   0x8   : > { %2544 = vmatprep.subr.bf16.mxu0 (!%p216_p3), %v2770_v1  ;;  %2449 = vmatpush3.bf16.msra.mxu1 (!%p216_p3), %v2769_v0  ;;  %v2775_v6 = vld [vmem:[%s3224_s1 + $0x58] sm:$0xff] (!%p216_p3)   ;;  %v2777_v8 = vld [vmem:[%s3224_s1 + $0x60] sm:$0xff] (!%p216_p3)   ;;  %v2779_v10 = vld [vmem:[%s3224_s1 + $0x68] sm:$0xff] (!%p216_p3)  }
   0x9   : > { %2545 = vmatpush3.bf16.msra.mxu0 (!%p216_p3), %v2770_v1  ;;  %2450 = vmatprep.subr.bf16.mxu1 (!%p216_p3), %v2771_v2  ;;  %v2776_v7 = vld [vmem:[%s3224_s1 + $0x118] sm:$0xff] (!%p216_p3)   ;;  %v2778_v9 = vld [vmem:[%s3224_s1 + $0x120] sm:$0xff] (!%p216_p3)   ;;  %v2780_v12 = vld [vmem:[%s3224_s1 + $0x128] sm:$0xff] (!%p216_p3)  }
   0xa   : > { %2546 = vmatprep.subr.bf16.mxu0 (!%p216_p3), %v2772_v3  ;;  %v2781_v14 = vld [vmem:[%s3224_s1 + $0x70] sm:$0xff] (!%p216_p3)   ;;  %v2783_v16 = vld [vmem:[%s3224_s1 + $0x78] sm:$0xff] (!%p216_p3)   ;;  %v2786_v18 = vld [vmem:[%s3224_s1] sm:$0xff] (!%p216_p3)  }
   0xb   : > { %v2782_v15 = vld [vmem:[%s3224_s1 + $0x130] sm:$0xff] (!%p216_p3)   ;;  %v2784_v17 = vld [vmem:[%s3224_s1 + $0x138] sm:$0xff] (!%p216_p3)   ;;  %v2788_v19 = vld [vmem:[%s3224_s1 + $0x140] sm:$0xff] (!%p216_p3)  }
   0xc   : > { %2451 = vmatpush3.bf16.msra.mxu1 (!%p216_p3), %v2771_v2  ;;  %v2791_v22 = vld [vmem:[%s3224_s1 + $0x8] sm:$0xff] (!%p216_p3)   ;;  %v2793_v26 = vld [vmem:[%s3224_s1 + $0x10] sm:$0xff] (!%p216_p3)   ;;  %v2795_v28 = vld [vmem:[%s3224_s1 + $0x18] sm:$0xff] (!%p216_p3)  }
   0xd   : > { %2547 = vmatpush3.bf16.msra.mxu0 (!%p216_p3), %v2772_v3  ;;  %2452 = vmatprep.subr.bf16.mxu1 (!%p216_p3), %v2773_v4  ;;  %v2792_v23 = vld [vmem:[%s3224_s1 + $0x148] sm:$0xff] (!%p216_p3)   ;;  %v2794_v27 = vld [vmem:[%s3224_s1 + $0x150] sm:$0xff] (!%p216_p3)   ;;  %v2796_v31 = vld [vmem:[%s3224_s1 + $0x158] sm:$0xff] (!%p216_p3)  }
   0xe   : > { %s3233_s15 = smov (!%p260_p4, %s2891_s15), 1  ;;  %2548 = vmatprep.subr.bf16.mxu0 %v2774_v5  ;;  %v2797_v34 = vld [vmem:[%s3224_s1 + $0x20] sm:$0xff]   ;;  %v2799_v36 = vld [vmem:[%s3224_s1 + $0x28] sm:$0xff]   ;;  %v2802_v38 = vld [vmem:[%s3224_s1 + $0x30] sm:$0xff]  }
   0xf   : > { %s2744_s9 = smul.u32 216, %s3233_s15  ;;  %v2798_v35 = vld [vmem:[%s3224_s1 + $0x160] sm:$0xff]   ;;  %v2800_v37 = vld [vmem:[%s3224_s1 + $0x168] sm:$0xff]   ;;  %v2804_v39 = vld [vmem:[%s3224_s1 + $0x170] sm:$0xff]   ;;  %s2316_s22 = sshll.u32 %s3233_s15, 5 }
  0x10   : > { %2453 = vmatpush3.bf16.msra.mxu1 %v2773_v4  ;;  %v2807_v40 = vld [vmem:[%s3224_s1 + $0x38] sm:$0xff]   ;;  %v2810_v42 = vld [vmem:[%s3224_s1 + $0x80] sm:$0xff]   ;;  %v2815_v46 = vld [vmem:[%s3224_s1 + $0x88] sm:$0xff]   ;;  %s288_s25 = scalar_lea.vmem %s3227_s4, %s2316_s22 }
  0x11   : > { %2549 = vmatpush3.bf16.msra.mxu0 %v2774_v5  ;;  %2454 = vmatprep.subr.bf16.mxu1 %v2775_v6  ;;  %s2980_s20 = scalar_lea.vmem %s3223_s0, %s2744_s9  ;;  %v2808_v41 = vld [vmem:[%s3224_s1 + $0x178] sm:$0xff]   ;;  %v2812_v43 = vld [vmem:[%s3224_s1 + $0x180] sm:$0xff]   ;;  %v2816_v47 = vld [vmem:[%s3224_s1 + $0x188] sm:$0xff]  }
  0x12   : > { %2550 = vmatprep.subr.bf16.mxu0 %v2776_v7  ;;  %v2785_v11 = vld [vmem:[%s2980_s20 + $0x24] sm:$0xff]   ;;  %v2787_v13 = vld [vmem:[%s2980_s20 + $0x90] sm:$0xff]   ;;  %v2790_v21 = vld [vmem:[%s2980_s20 + $0x98] sm:$0xff]  }
  0x13   : > { %2464 = vmatprep.mubr.bf16.mxu1 %v2785_v11  ;;  %2560 = vmatprep.mubr.bf16.mxu0 %v2787_v13  ;;  %v2789_v20 = vld [vmem:[%s2980_s20 + $0x2c] sm:$0xff]   ;;  %v2801_v24 = vld [vmem:[%s2980_s20 + $0x34] sm:$0xff]   ;;  %v2803_v25 = vld [vmem:[%s2980_s20 + $0xa0] sm:$0xff]  }
  0x14   : > { %2455 = vmatpush3.bf16.msra.mxu1 %v2775_v6  ;;  %v2805_v29 = vld [vmem:[%s2980_s20 + $0x3c] sm:$0xff]   ;;  %v2806_v30 = vld [vmem:[%s2980_s20 + $0xa8] sm:$0xff]   ;;  %v2811_v33 = vld [vmem:[%s2980_s20 + $0xb4] sm:$0xff]  }
  0x15   : > { %2551 = vmatpush3.bf16.msra.mxu0 %v2776_v7  ;;  %2456 = vmatprep.subr.bf16.mxu1 %v2777_v8  ;;  %v2809_v32 = vld [vmem:[%s2980_s20] sm:$0xff]   ;;  %v2813_v44 = vld [vmem:[%s2980_s20 + $0x8] sm:$0xff]   ;;  %v2825_v48 = vld [vmem:[%s2980_s20 + $0x10] sm:$0xff]  }
  0x16   : > { %2552 = vmatprep.subr.bf16.mxu0 %v2778_v9  ;;  %v2814_v45 = vld [vmem:[%s2980_s20 + $0xbc] sm:$0xff]   ;;  %v2827_v49 = vld [vmem:[%s2980_s20 + $0xc4] sm:$0xff]   ;;  %v2817_v50 = vld [vmem:[%s3224_s1 + $0x90] sm:$0xff]  }
  0x17   : > { %v2818_v51 = vld [vmem:[%s3224_s1 + $0x190] sm:$0xff]   ;;  %v2819_v52 = vld [vmem:[%s3224_s1 + $0x98] sm:$0xff]   ;;  %v2833_v56 = vld [vmem:[%s2980_s20 + $0x48] sm:$0xff]  }
  0x18   : > { %2457 = vmatpush3.bf16.msra.mxu1 %v2777_v8  ;;  %v2829_v53 = vld [vmem:[%s2980_s20 + $0x18] sm:$0xff]   ;;  %v2830_v54 = vld [vmem:[%s2980_s20 + $0xcc] sm:$0xff]   ;;  %v2835_v57 = vld [vmem:[%s2980_s20 + $0x4] sm:$0xff]  }
  0x19   : > { %2553 = vmatpush3.bf16.msra.mxu0 %v2778_v9  ;;  %2458 = vmatprep.subr.bf16.mxu1 %v2779_v10  ;;  %v2820_v55 = vld [vmem:[%s3224_s1 + $0x198] sm:$0xff]   ;;  %v2821_v58 = vld [vmem:[%s3224_s1 + $0xa0] sm:$0xff]   ;;  %v2823_v60 = vld [vmem:[%s3224_s1 + $0xa8] sm:$0xff]  }
  0x1a   : > { %2554 = vmatprep.subr.bf16.mxu0 %v2780_v12  ;;  %v2822_v59 = vld [vmem:[%s3224_s1 + $0x1a0] sm:$0xff]   ;;  %v2824_v61 = vld [vmem:[%s3224_s1 + $0x1a8] sm:$0xff]   ;;  %v2826_v62 = vld [vmem:[%s3224_s1 + $0xb0] sm:$0xff]  }
  0x1b   : > { %v2828_v63 = vld [vmem:[%s3224_s1 + $0x1b0] sm:$0xff]   ;;  %v2831_v0 = vld [vmem:[%s3224_s1 + $0xb8] sm:$0xff]   ;;  %v2834_v2 = vld [vmem:[%s3224_s1 + $0xc0] sm:$0xff]  }
  0x1c   : > { %2459 = vmatpush3.bf16.msra.mxu1 %v2779_v10  ;;  %v2832_v1 = vld [vmem:[%s3224_s1 + $0x1b8] sm:$0xff]   ;;  %v2836_v3 = vld [vmem:[%s3224_s1 + $0x1c0] sm:$0xff]   ;;  %v2837_v4 = vld [vmem:[%s2980_s20 + $0x50] sm:$0xff]  }
  0x1d   : > { %2555 = vmatpush3.bf16.msra.mxu0 %v2780_v12  ;;  %2460 = vmatprep.subr.bf16.mxu1 %v2781_v14  ;;  %v2838_v5 = vld [vmem:[%s2980_s20 + $0xc] sm:$0xff]   ;;  %v2849_v8 = vld [vmem:[%s2980_s20 + $0x58] sm:$0xff]   ;;  %v2851_v13 = vld [vmem:[%s2980_s20 + $0x60] sm:$0xff]  }
  0x1e   : > { %2556 = vmatprep.subr.bf16.mxu0 %v2782_v15  ;;  %v2839_v6 = vld [vmem:[%s3224_s1 + $0xc8] sm:$0xff]   ;;  %v2850_v9 = vld [vmem:[%s2980_s20 + $0x14] sm:$0xff]  }
  0x1f   : > { %v2840_v7 = vld [vmem:[%s3224_s1 + $0x1c8] sm:$0xff]   ;;  %v2841_v10 = vld [vmem:[%s3224_s1 + $0xd0] sm:$0xff]   ;;  %v2843_v12 = vld [vmem:[%s3224_s1 + $0xd8] sm:$0xff]  }
  0x20   : > { %2461 = vmatpush3.bf16.msra.mxu1 %v2781_v14  ;;  %v2842_v11 = vld [vmem:[%s3224_s1 + $0x1d0] sm:$0xff]   ;;  %v2853_v14 = vld [vmem:[%s2980_s20 + $0x1c] sm:$0xff]  }
  0x21   : > { %2557 = vmatpush3.bf16.msra.mxu0 %v2782_v15  ;;  %2462 = vmatprep.subr.bf16.mxu1 %v2783_v16  ;;  %v2844_v15 = vld [vmem:[%s3224_s1 + $0x1d8] sm:$0xff]  }
  0x22   : > { %2558 = vmatprep.subr.bf16.mxu0 %v2784_v17 }
  0x24   : > { %2463 = vmatpush3.bf16.msra.mxu1 %v2783_v16  ;;  %v2857_v16 = vld [vmem:[%s2980_s20 + $0x6c] sm:$0xff]  }
  0x25   : > { %2559 = vmatpush3.bf16.msra.mxu0 %v2784_v17  ;;  %2472 = vmatprep.subr.bf16.mxu1 %v2786_v18  ;;  %v2858_v17 = vld [vmem:[%s2980_s20 + $0x28] sm:$0xff]  }
  0x26   : > { %2568 = vmatprep.subr.bf16.mxu0 %v2788_v19 }
  0x27   : > { %2465 = vmatmul.mubr.bf16.vlgmr.msra.gmra.mrb[0].mxu1 %v2789_v20  ;;  %v2847_v20 = vld [vmem:[%s3224_s1 + $0xe8] sm:$0xff]  }
  0x28   : > { %2473 = vmatpush3.bf16.msra.mxu1 %v2786_v18  ;;  %2561 = vmatmul.mubr.bf16.vlgmr.msra.gmra.mrb[0].mxu0 %v2790_v21  ;;  %v2845_v18 = vld [vmem:[%s3224_s1 + $0xe0] sm:$0xff]   ;;  %v2848_v21 = vld [vmem:[%s3224_s1 + $0x1e8] sm:$0xff]  }
  0x29   : > { %2569 = vmatpush3.bf16.msra.mxu0 %v2788_v19  ;;  %2474 = vmatprep.subr.bf16.mxu1 %v2791_v22  ;;  %v2846_v19 = vld [vmem:[%s3224_s1 + $0x1e0] sm:$0xff]  }
  0x2a   : > { %2570 = vmatprep.subr.bf16.mxu0 %v2792_v23  ;;  %2468 = vmatprep.mubr.bf16.mxu1 %v2801_v24  ;;  %v2855_v24 = vld [vmem:[%s3224_s1 + $0xf8] sm:$0xff]  }
  0x2b   : > { %2564 = vmatprep.mubr.bf16.mxu0 %v2803_v25  ;;  %v2856_v25 = vld [vmem:[%s3224_s1 + $0x1f8] sm:$0xff]  }
  0x2c   : > { %2475 = vmatpush3.bf16.msra.mxu1 %v2791_v22  ;;  %v2852_v22 = vld [vmem:[%s3224_s1 + $0xf0] sm:$0xff]  }
  0x2d   : > { %2571 = vmatpush3.bf16.msra.mxu0 %v2792_v23  ;;  %2476 = vmatprep.subr.bf16.mxu1 %v2793_v26  ;;  %v2854_v23 = vld [vmem:[%s3224_s1 + $0x1f0] sm:$0xff]  }
  0x2e   : > { %2572 = vmatprep.subr.bf16.mxu0 %v2794_v27 }
  0x2f   : > { %2469 = vmatmul.mubr.bf16.gmra.mrb[4].mxu1 %v2805_v29  ;;  %v2862_v29 = vld [vmem:[%s3224_s1 + $0x208] sm:$0xff]  }
  0x30   : > { %2477 = vmatpush3.bf16.msra.mxu1 %v2793_v26  ;;  %2565 = vmatmul.mubr.bf16.gmra.mrb[4].mxu0 %v2806_v30  ;;  %v2861_v26 = vld [vmem:[%s3224_s1 + $0x200] sm:$0xff]  }
  0x31   : > { %2573 = vmatpush3.bf16.msra.mxu0 %v2794_v27  ;;  %2478 = vmatprep.subr.bf16.mxu1 %v2795_v28  ;;  %v2859_v27 = vld [vmem:[%s2980_s20 + $0x74] sm:$0xff]   ;;  %v2863_v30 = vld [vmem:[%s2980_s20 + $0x7c] sm:$0xff]  }
  0x32   : > { %2574 = vmatprep.subr.bf16.mxu0 %v2796_v31  ;;  %2488 = vmatprep.mubr.bf16.mxu1 %v2809_v32  ;;  %v2867_v32 = vld [vmem:[%s3224_s1 + $0x210] sm:$0xff]  }
  0x33   : > { %2584 = vmatprep.mubr.bf16.mxu0 %v2811_v33  ;;  %v2865_v33 = vld [vmem:[%s2980_s20 + $0x84] sm:$0xff]  }
  0x34   : > { %2479 = vmatpush3.bf16.msra.mxu1 %v2795_v28  ;;  %v2860_v28 = vld [vmem:[%s2980_s20 + $0x30] sm:$0xff]  }
  0x35   : > { %2575 = vmatpush3.bf16.msra.mxu0 %v2796_v31  ;;  %2480 = vmatprep.subr.bf16.mxu1 %v2797_v34  ;;  %v2864_v31 = vld [vmem:[%s2980_s20 + $0x38] sm:$0xff]  }
  0x36   : > { %2576 = vmatprep.subr.bf16.mxu0 %v2798_v35 }
  0x38   : > { %2481 = vmatpush3.bf16.msra.mxu1 %v2797_v34  ;;  %v2866_v34 = vld [vmem:[%s2980_s20 + $0x40] sm:$0xff]  }
  0x39   : > { %2577 = vmatpush3.bf16.msra.mxu0 %v2798_v35  ;;  %2482 = vmatprep.subr.bf16.mxu1 %v2799_v36  ;;  %v2868_v35 = vld [vmem:[%s3224_s1 + $0x218] sm:$0xff]  }
  0x3a   : > { %2578 = vmatprep.subr.bf16.mxu0 %v2800_v37 }
  0x3c   : > { %2483 = vmatpush3.bf16.msra.mxu1 %v2799_v36  ;;  %v2873_v36 = vld [vmem:[%s2980_s20 + $0x4c] sm:$0xff]  }
  0x3d   : > { %2579 = vmatpush3.bf16.msra.mxu0 %v2800_v37  ;;  %2484 = vmatprep.subr.bf16.mxu1 %v2802_v38  ;;  %v2874_v37 = vld [vmem:[%s2980_s20 + $0x5c] sm:$0xff]  }
  0x3e   : > { %2580 = vmatprep.subr.bf16.mxu0 %v2804_v39 }
  0x40   : > { %2485 = vmatpush3.bf16.msra.mxu1 %v2802_v38  ;;  %v2869_v38 = vld [vmem:[%s3224_s1 + $0x220] sm:$0xff]  }
  0x41   : > { %2581 = vmatpush3.bf16.msra.mxu0 %v2804_v39  ;;  %2486 = vmatprep.subr.bf16.mxu1 %v2807_v40  ;;  %v2870_v39 = vld [vmem:[%s3224_s1 + $0x228] sm:$0xff]  }
  0x42   : > { %2582 = vmatprep.subr.bf16.mxu0 %v2808_v41 }
  0x44   : > { %2487 = vmatpush3.bf16.msra.mxu1 %v2807_v40  ;;  %v2871_v40 = vld [vmem:[%s3224_s1 + $0x230] sm:$0xff]  }
  0x45   : > { %2583 = vmatpush3.bf16.msra.mxu0 %v2808_v41  ;;  %2496 = vmatprep.subr.bf16.mxu1 %v2810_v42  ;;  %v2872_v41 = vld [vmem:[%s3224_s1 + $0x238] sm:$0xff]  }
  0x46   : > { %2592 = vmatprep.subr.bf16.mxu0 %v2812_v43 }
  0x47   : > { %2489 = vmatmul.mubr.bf16.vlgmr.msra.gmra.mrb[0].mxu1 %v2813_v44 }
  0x48   : > { %2497 = vmatpush3.bf16.msra.mxu1 %v2810_v42  ;;  %2585 = vmatmul.mubr.bf16.vlgmr.msra.gmra.mrb[0].mxu0 %v2814_v45  ;;  %v2876_v42 = vld [vmem:[%s2980_s20 + $0x64] sm:$0xff]  }
  0x49   : > { %2593 = vmatpush3.bf16.msra.mxu0 %v2812_v43  ;;  %2498 = vmatprep.subr.bf16.mxu1 %v2815_v46  ;;  %v2875_v43 = vld [vmem:[%s2980_s20 + $0x54] sm:$0xff]  }
  0x4a   : > { %2594 = vmatprep.subr.bf16.mxu0 %v2816_v47  ;;  %2492 = vmatprep.mubr.bf16.mxu1 %v2825_v48 }
  0x4b   : > { %2588 = vmatprep.mubr.bf16.mxu0 %v2827_v49 }
  0x4c   : > { %2499 = vmatpush3.bf16.msra.mxu1 %v2815_v46 }
  0x4d   : > { %2595 = vmatpush3.bf16.msra.mxu0 %v2816_v47  ;;  %2500 = vmatprep.subr.bf16.mxu1 %v2817_v50 }
  0x4e   : > { %2596 = vmatprep.subr.bf16.mxu0 %v2818_v51 }
  0x4f   : > { %2493 = vmatmul.mubr.bf16.gmra.mrb[4].mxu1 %v2829_v53 }
  0x50   : > { %2501 = vmatpush3.bf16.msra.mxu1 %v2817_v50  ;;  %2589 = vmatmul.mubr.bf16.gmra.mrb[4].mxu0 %v2830_v54 }
  0x51   : > { %2597 = vmatpush3.bf16.msra.mxu0 %v2818_v51  ;;  %2502 = vmatprep.subr.bf16.mxu1 %v2819_v52 }
  0x52   : > { %2598 = vmatprep.subr.bf16.mxu0 %v2820_v55  ;;  %2512 = vmatprep.mubr.bf16.mxu1 %v2833_v56 }
  0x53   : > { %2608 = vmatprep.mubr.bf16.mxu0 %v2835_v57 }
  0x54   : > { %2503 = vmatpush3.bf16.msra.mxu1 %v2819_v52 }
  0x55   : > { %2599 = vmatpush3.bf16.msra.mxu0 %v2820_v55  ;;  %2504 = vmatprep.subr.bf16.mxu1 %v2821_v58 }
  0x56   : > { %2600 = vmatprep.subr.bf16.mxu0 %v2822_v59 }
  0x58   : > { %2505 = vmatpush3.bf16.msra.mxu1 %v2821_v58 }
  0x59   : > { %2601 = vmatpush3.bf16.msra.mxu0 %v2822_v59  ;;  %2506 = vmatprep.subr.bf16.mxu1 %v2823_v60 }
  0x5a   : > { %2602 = vmatprep.subr.bf16.mxu0 %v2824_v61 }
  0x5c   : > { %2507 = vmatpush3.bf16.msra.mxu1 %v2823_v60  ;;  %v2312_v60 = vld [vmem:[%s3225_s2] ss:$0 sm:$0xff] }
  0x5d   : > { %2603 = vmatpush3.bf16.msra.mxu0 %v2824_v61  ;;  %2508 = vmatprep.subr.bf16.mxu1 %v2826_v62 }
  0x5e   : > { %2604 = vmatprep.subr.bf16.mxu0 %v2828_v63 }
  0x60   : > { %2509 = vmatpush3.bf16.msra.mxu1 %v2826_v62 }
  0x61   : > { %2605 = vmatpush3.bf16.msra.mxu0 %v2828_v63  ;;  %2510 = vmatprep.subr.bf16.mxu1 %v2831_v0 }
  0x62   : > { %2606 = vmatprep.subr.bf16.mxu0 %v2832_v1 }
  0x64   : > { %2511 = vmatpush3.bf16.msra.mxu1 %v2831_v0 }
  0x65   : > { %2607 = vmatpush3.bf16.msra.mxu0 %v2832_v1  ;;  %2520 = vmatprep.subr.bf16.mxu1 %v2834_v2 }
  0x66   : > { %2616 = vmatprep.subr.bf16.mxu0 %v2836_v3 }
  0x67   : > { %2513 = vmatmul.mubr.bf16.vlgmr.msra.gmra.mrb[0].mxu1 %v2837_v4 }
  0x68   : > { %2521 = vmatpush3.bf16.msra.mxu1 %v2834_v2  ;;  %2609 = vmatmul.mubr.bf16.vlgmr.msra.gmra.mrb[0].mxu0 %v2838_v5  ;;  %v2313_v2 = vld [vmem:[%s3226_s3] ss:$0 sm:$0xff] }
  0x69   : > { %2617 = vmatpush3.bf16.msra.mxu0 %v2836_v3  ;;  %2522 = vmatprep.subr.bf16.mxu1 %v2839_v6 }
  0x6a   : > { %2618 = vmatprep.subr.bf16.mxu0 %v2840_v7  ;;  %2516 = vmatprep.mubr.bf16.mxu1 %v2849_v8 }
  0x6b   : > { %2612 = vmatprep.mubr.bf16.mxu0 %v2850_v9 }
  0x6c   : > { %2523 = vmatpush3.bf16.msra.mxu1 %v2839_v6 }
  0x6d   : > { %2619 = vmatpush3.bf16.msra.mxu0 %v2840_v7  ;;  %2524 = vmatprep.subr.bf16.mxu1 %v2841_v10 }
  0x6e   : > { %2620 = vmatprep.subr.bf16.mxu0 %v2842_v11 }
  0x6f   : > { %2517 = vmatmul.mubr.bf16.gmra.mrb[4].mxu1 %v2851_v13 }
  0x70   : > { %2525 = vmatpush3.bf16.msra.mxu1 %v2841_v10  ;;  %2613 = vmatmul.mubr.bf16.gmra.mrb[4].mxu0 %v2853_v14 }
  0x71   : > { %2621 = vmatpush3.bf16.msra.mxu0 %v2842_v11  ;;  %2526 = vmatprep.subr.bf16.mxu1 %v2843_v12 }
  0x72   : > { %2622 = vmatprep.subr.bf16.mxu0 %v2844_v15  ;;  %2536 = vmatprep.mubr.bf16.mxu1 %v2857_v16 }
  0x73   : > { %2632 = vmatprep.mubr.bf16.mxu0 %v2858_v17 }
  0x74   : > { %2527 = vmatpush3.bf16.msra.mxu1 %v2843_v12 }
  0x75   : > { %2623 = vmatpush3.bf16.msra.mxu0 %v2844_v15  ;;  %2528 = vmatprep.subr.bf16.mxu1 %v2845_v18 }
  0x76   : > { %2624 = vmatprep.subr.bf16.mxu0 %v2846_v19 }
  0x78   : > { %2529 = vmatpush3.bf16.msra.mxu1 %v2845_v18 }
  0x79   : > { %2625 = vmatpush3.bf16.msra.mxu0 %v2846_v19  ;;  %2530 = vmatprep.subr.bf16.mxu1 %v2847_v20 }
  0x7a   : > { %2626 = vmatprep.subr.bf16.mxu0 %v2848_v21 }
  0x7c   : > { %2531 = vmatpush3.bf16.msra.mxu1 %v2847_v20 }
  0x7d   : > { %2627 = vmatpush3.bf16.msra.mxu0 %v2848_v21  ;;  %2532 = vmatprep.subr.bf16.mxu1 %v2852_v22 }
  0x7e   : > { %2628 = vmatprep.subr.bf16.mxu0 %v2854_v23 }
  0x80   : > { %2533 = vmatpush3.bf16.msra.mxu1 %v2852_v22 }
  0x81   : > { %2629 = vmatpush3.bf16.msra.mxu0 %v2854_v23  ;;  %2534 = vmatprep.subr.bf16.mxu1 %v2855_v24 }
  0x82   : > { %2630 = vmatprep.subr.bf16.mxu0 %v2856_v25 }
  0x84   : > { %2535 = vmatpush3.bf16.msra.mxu1 %v2855_v24 }
  0x85   : > { %2631 = vmatpush3.bf16.msra.mxu0 %v2856_v25  ;;  %2664 = vmatprep.subr.bf16.mxu1 %v2861_v26 }
  0x86   : > { %2640 = vmatprep.subr.bf16.mxu0 %v2861_v26 }
  0x87   : > { %2537 = vmatmul.mubr.bf16.vlgmr.msra.gmra.mrb[0].mxu1 %v2859_v27 }
  0x88   : > { %2633 = vmatmul.mubr.bf16.vlgmr.msra.gmra.mrb[0].mxu0 %v2860_v28  ;;  %2672 = vmatpush3.bf16.msra.mxu1 %v2861_v26 }
  0x89   : > { %2641 = vmatpush3.bf16.msra.mxu0 %v2861_v26  ;;  %2665 = vmatprep.subr.bf16.mxu1 %v2862_v29 }
  0x8a   : > { %2642 = vmatprep.subr.bf16.mxu0 %v2862_v29  ;;  %2540 = vmatprep.mubr.bf16.mxu1 %v2863_v30 }
  0x8b   : > { %2636 = vmatprep.mubr.bf16.mxu0 %v2864_v31 }
  0x8c   : > { %2673 = vmatpush3.bf16.msra.mxu1 %v2862_v29 }
  0x8d   : > { %2643 = vmatpush3.bf16.msra.mxu0 %v2862_v29  ;;  %2666 = vmatprep.subr.bf16.mxu1 %v2867_v32 }
  0x8e   : > { %2644 = vmatprep.subr.bf16.mxu0 %v2867_v32 }
  0x8f   : > { %2541 = vmatmul.mubr.bf16.gmra.mrb[4].mxu1 %v2865_v33 }
  0x90   : > { %2637 = vmatmul.mubr.bf16.gmra.mrb[4].mxu0 %v2866_v34  ;;  %2674 = vmatpush3.bf16.msra.mxu1 %v2867_v32 }
  0x91   : > { %2645 = vmatpush3.bf16.msra.mxu0 %v2867_v32  ;;  %2667 = vmatprep.subr.bf16.mxu1 %v2868_v35 }
  0x92   : > { %2646 = vmatprep.subr.bf16.mxu0 %v2868_v35  ;;  %2656 = vmatprep.mubr.bf16.mxu0 %v2873_v36 }
  0x93   : > { %2660 = vmatprep.mubr.bf16.mxu1 %v2874_v37 }
  0x94   : > { %2675 = vmatpush3.bf16.msra.mxu1 %v2868_v35 }
  0x95   : > { %2647 = vmatpush3.bf16.msra.mxu0 %v2868_v35  ;;  %2668 = vmatprep.subr.bf16.mxu1 %v2869_v38 }
  0x96   : > { %2648 = vmatprep.subr.bf16.mxu0 %v2869_v38 }
  0x98   : > { %2676 = vmatpush3.bf16.msra.mxu1 %v2869_v38 }
  0x99   : > { %2649 = vmatpush3.bf16.msra.mxu0 %v2869_v38  ;;  %2669 = vmatprep.subr.bf16.mxu1 %v2870_v39 }
  0x9a   : > { %2650 = vmatprep.subr.bf16.mxu0 %v2870_v39 }
  0x9c   : > { %2677 = vmatpush3.bf16.msra.mxu1 %v2870_v39 }
  0x9d   : > { %2651 = vmatpush3.bf16.msra.mxu0 %v2870_v39  ;;  %2670 = vmatprep.subr.bf16.mxu1 %v2871_v40 }
  0x9e   : > { %2652 = vmatprep.subr.bf16.mxu0 %v2871_v40 }
  0xa0   : > { %2678 = vmatpush3.bf16.msra.mxu1 %v2871_v40 }
  0xa1   : > { %2653 = vmatpush3.bf16.msra.mxu0 %v2871_v40  ;;  %2671 = vmatprep.subr.bf16.mxu1 %v2872_v41 }
  0xa2   : > { %2654 = vmatprep.subr.bf16.mxu0 %v2872_v41 }
  0xa4   : > { %2679 = vmatpush3.bf16.msra.mxu1 %v2872_v41 }
  0xa5   : > { %2655 = vmatpush3.bf16.msra.mxu0 %v2872_v41 }
  0xa7   : > { %2661 = vmatmul.mubr.bf16.vlgmr.msra.gmra.mrb[8].mxu1 %v2876_v42 }
  0xa8   : > { %2657 = vmatmul.mubr.bf16.vlgmr.msra.gmra.mrb[0].mxu0 %v2875_v43 }
 0x15a   : > { %v2538_v44 = vpop.f32.mrb[0].mxu1 }
 0x15b   : > { %v917_v45 = vpop.f32.mrb[1].mxu1 }
 0x15c   : > { %v2539_v46 = vpop.f32.mrb[2].mxu1 }
 0x15d   : > { %v920_v47 = vpop.f32.mrb[3].mxu1 }
 0x162   : > { %v2542_v48 = vpop.f32.mrb[4].mxu1 }
 0x163   : > { %v2638_v49 = vpop.f32.mrb[4].mxu0  ;;  %v933_v50 = vpop.f32.mrb[5].mxu1 }
 0x164   : > { %v2684_v51 = vadd.f32 %v2638_v49, %v2542_v48  ;;  %v1617_v52 = vpop.f32.mrb[5].mxu0  ;;  %v2543_v53 = vpop.f32.mrb[6].mxu1 }
 0x165   : > { %v2686_v54 = vadd.f32 %v1617_v52, %v933_v50  ;;  %v2639_v55 = vpop.f32.mrb[6].mxu0  ;;  %v936_v56 = vpop.f32.mrb[7].mxu1 }
 0x166   : > { %v2688_v57 = vadd.f32 %v2639_v55, %v2543_v53  ;;  %v1620_v58 = vpop.f32.mrb[7].mxu0 }
 0x167   : > { %v2690_v59 = vadd.f32 %v1620_v58, %v936_v56 }
 0x17a   : > { %v2662_v61 = vpop.f32.mrb[8].mxu1 }
 0x17b   : > { %v2658_v62 = vpop.f32.mrb[0].mxu0  ;;  %v2685_v63 = vadd.f32 %v2684_v51, %v2662_v61  ;;  %v1788_v0 = vpop.f32.mrb[9].mxu1 }
 0x17c   : > { %v2680_v1 = vadd.f32 %v2658_v62, %v2538_v44  ;;  %v1772_v3 = vpop.f32.mrb[1].mxu0  ;;  %v2687_v4 = vadd.f32 %v2686_v54, %v1788_v0  ;;  %v2663_v5 = vpop.f32.mrb[10].mxu1 }
 0x17d   : > { %v1824_v6 = vmul.f32 %v2685_v63, %v2312_v60  ;;  %v2681_v7 = vadd.f32 %v1772_v3, %v917_v45  ;;  %v2659_v8 = vpop.f32.mrb[2].mxu0  ;;  %v2689_v9 = vadd.f32 %v2688_v57, %v2663_v5  ;;  %v1791_v10 = vpop.f32.mrb[11].mxu1 }
 0x17e   : > { %v1820_v11 = vmul.f32 %v2680_v1, %v2312_v60  ;;  %v1822_v12 = vmul.f32 %v2687_v4, %v2312_v60  ;;  %v2682_v13 = vadd.f32 %v2659_v8, %v2539_v46  ;;  %v1775_v14 = vpop.f32.mrb[3].mxu0  ;;  %v2691_v15 = vadd.f32 %v2690_v59, %v1791_v10 }
 0x17f   : > { %v1839_v16 = vadd.f32 %v2313_v2, %v1824_v6  ;;  %v1818_v17 = vmul.f32 %v2681_v7, %v2312_v60  ;;  %v1825_v18 = vmul.f32 %v2689_v9, %v2312_v60  ;;  %v2683_v19 = vadd.f32 %v1775_v14, %v920_v47 }
 0x180   : > { %v1835_v20 = vadd.f32 %v2313_v2, %v1820_v11  ;;  %v1837_v21 = vadd.f32 %v2313_v2, %v1822_v12  ;;  %v1821_v22 = vmul.f32 %v2682_v13, %v2312_v60  ;;  %v1823_v23 = vmul.f32 %v2691_v15, %v2312_v60 }
 0x181   : > { %v1833_v24 = vadd.f32 %v2313_v2, %v1818_v17  ;;  %v1840_v25 = vadd.f32 %v2313_v2, %v1825_v18  ;;  %v1819_v26 = vmul.f32 %v2683_v19, %v2312_v60  ;;  %v1847_v29 = vmax.f32 %v1839_v16, 0.0 }
 0x182   : > { %v1836_v27 = vadd.f32 %v2313_v2, %v1821_v22  ;;  %v1838_v28 = vadd.f32 %v2313_v2, %v1823_v23  ;;  %v1843_v32 = vmax.f32 %v1835_v20, 0.0  ;;  %v1845_v33 = vmax.f32 %v1837_v21, 0.0 }
 0x183   : > { %v1848_v30 = vmax.f32 %v1840_v25, 0.0  ;;  %v1834_v31 = vadd.f32 %v2313_v2, %v1819_v26  ;;  %v1841_v36 = vmax.f32 %v1833_v24, 0.0 }
 0x184   : > { %v1844_v34 = vmax.f32 %v1836_v27, 0.0  ;;  %v1846_v35 = vmax.f32 %v1838_v28, 0.0 }
 0x185   : > { %v2335_v37 = vpack.c.bf16 %v1848_v30, %v1847_v29  ;;  %v1842_v38 = vmax.f32 %v1834_v31, 0.0 }
 0x186   : > { %v2325_v39 = vpack.c.bf16 %v1844_v34, %v1843_v32  ;;  %v2330_v40 = vpack.c.bf16 %v1846_v35, %v1845_v33 }
 0x187   : > { %2339 = vst [vmem:[%s288_s25 + $0x18] sm:$0xff] %v2335_v37   ;;  %v2320_v41 = vpack.c.bf16 %v1842_v38, %v1841_v36 }
 0x188   : > { %2337 = vst [vmem:[%s288_s25 + $0x8] sm:$0xff] %v2325_v39   ;;  %2338 = vst [vmem:[%s288_s25 + $0x10] sm:$0xff] %v2330_v40  }
 0x189   : > { %2321 = vst [vmem:[%s288_s25] sm:$0xff] %v2320_v41  }
 0x18a PF: > { %s14_s17 = sadd.s32 1, %s2899_s17   ;;  %s3228_s15 = smov %s2895_s16 }
 0x18b   : > { %p11_p5 = scmp.ge.s32.totalorder %s14_s17, 4   ;;  %s3229_s16 = smov %s3231_s18 }
 0x18d   :  { %13 = sbr.rel (!%p11_p5) target bundleno = 2 (0x2), region = 91 }

// kernel: _lambda_.7
= control target key start
LH: loop header
LB: loop body
LE: loop exit
PB: predicated region body
PF: predicated region fallthrough
CT: control target
= control target key end

     0   :  { %s3067_s18 = smov 0   ;;  %s3069_s19 = smov 0   ;;  %s3371_s0 = inlined_call_operand.vmem [shape: bf16[2,30,8,128], index: 0, kind: input, shape index: {}]   ;;  %s3372_s1 = inlined_call_operand.vmem [shape: bf16[9,128,128], index: 1, kind: input, shape index: {}]   ;;  %s3373_s2 = inlined_call_operand.vmem [shape: f32[1,128], index: 2, kind: input, shape index: {}]   ;;  %s3374_s3 = inlined_call_operand.vmem [shape: f32[1,128], index: 3, kind: input, shape index: {}]   ;;  %s3375_s4 = inlined_call_operand.vmem [shape: bf16[2,8,8,128], index: 4, kind: input, shape index: {}]   ;;  %s3376_s5 = inlined_call_operand.vmem [shape: bf16[2,8,8,128], index: 5, kind: output, shape index: {}]  }
   0x1   :  { %s3071_s20 = smov 0  }
   0x2 LB: > { %s34_s21 = sadd.s32 1, %s3031_s19  ;;  %p2122_p0 = scmp.ge.s32.totalorder %s3035_s20, 1  ;;  %s3035_s20 = sphi %s3071_s20, %s15_s20   ;;  %s3031_s19 = sphi %s3069_s19, %s3378_s19   ;;  %s3027_s18 = sphi %s3067_s18, %s3377_s18  }
   0x3   : > { %p36_p1 = scmp.ge.s32.totalorder %s34_s21, 2  ;;  %p260_p2 = scmp.lt.s32.totalorder %s3035_s20, 3 }
   0x5   : > { %s3380_s21 = smov (%p36_p1, %s34_s21), 0  ;;  %p261_p3 = pnand %p2122_p0, %p260_p2 }
   0x6   : > { %v2905_v0 = vld [vmem:[%s3372_s1 + $0x40] sm:$0xff] (!%p261_p3)   ;;  %p318_p4 = scmp.lt.s32.totalorder (!%p261_p3), %s3027_s18, 1  ;;  %v2907_v2 = vld [vmem:[%s3372_s1 + $0x48] sm:$0xff] (!%p261_p3)   ;;  %v2909_v4 = vld [vmem:[%s3372_s1 + $0x50] sm:$0xff] (!%p261_p3)  }
   0x7   : > { %264 = sbr.rel (%p261_p3) target bundleno = 396 (0x18c), region = 40  ;;  %v2906_v1 = vld [vmem:[%s3372_s1 + $0x100] sm:$0xff] (!%p261_p3)   ;;  %2584 = vmatprep.subr.bf16.mxu1 (!%p261_p3), %v2905_v0  ;;  %v2908_v3 = vld [vmem:[%s3372_s1 + $0x108] sm:$0xff] (!%p261_p3)   ;;  %v2910_v5 = vld [vmem:[%s3372_s1 + $0x110] sm:$0xff] (!%p261_p3)  }
   0x8   : > { %2680 = vmatprep.subr.bf16.mxu0 (!%p261_p3), %v2906_v1  ;;  %2585 = vmatpush3.bf16.msra.mxu1 (!%p261_p3), %v2905_v0  ;;  %v2911_v6 = vld [vmem:[%s3372_s1 + $0x58] sm:$0xff] (!%p261_p3)   ;;  %v2913_v8 = vld [vmem:[%s3372_s1 + $0x60] sm:$0xff] (!%p261_p3)   ;;  %v2915_v10 = vld [vmem:[%s3372_s1 + $0x68] sm:$0xff] (!%p261_p3)  }
   0x9   : > { %2681 = vmatpush3.bf16.msra.mxu0 (!%p261_p3), %v2906_v1  ;;  %2586 = vmatprep.subr.bf16.mxu1 (!%p261_p3), %v2907_v2  ;;  %v2912_v7 = vld [vmem:[%s3372_s1 + $0x118] sm:$0xff] (!%p261_p3)   ;;  %v2914_v9 = vld [vmem:[%s3372_s1 + $0x120] sm:$0xff] (!%p261_p3)   ;;  %v2916_v12 = vld [vmem:[%s3372_s1 + $0x128] sm:$0xff] (!%p261_p3)  }
   0xa   : > { %2682 = vmatprep.subr.bf16.mxu0 (!%p261_p3), %v2908_v3  ;;  %v2917_v14 = vld [vmem:[%s3372_s1 + $0x70] sm:$0xff] (!%p261_p3)   ;;  %v2919_v16 = vld [vmem:[%s3372_s1 + $0x78] sm:$0xff] (!%p261_p3)   ;;  %v2922_v18 = vld [vmem:[%s3372_s1] sm:$0xff] (!%p261_p3)  }
   0xb   : > { %v2918_v15 = vld [vmem:[%s3372_s1 + $0x130] sm:$0xff] (!%p261_p3)   ;;  %v2920_v17 = vld [vmem:[%s3372_s1 + $0x138] sm:$0xff] (!%p261_p3)   ;;  %v2924_v19 = vld [vmem:[%s3372_s1 + $0x140] sm:$0xff] (!%p261_p3)  }
   0xc   : > { %2587 = vmatpush3.bf16.msra.mxu1 (!%p261_p3), %v2907_v2  ;;  %v2927_v22 = vld [vmem:[%s3372_s1 + $0x8] sm:$0xff] (!%p261_p3)   ;;  %v2929_v26 = vld [vmem:[%s3372_s1 + $0x10] sm:$0xff] (!%p261_p3)   ;;  %v2931_v28 = vld [vmem:[%s3372_s1 + $0x18] sm:$0xff] (!%p261_p3)  }
   0xd   : > { %2683 = vmatpush3.bf16.msra.mxu0 (!%p261_p3), %v2908_v3  ;;  %2588 = vmatprep.subr.bf16.mxu1 (!%p261_p3), %v2909_v4  ;;  %v2928_v23 = vld [vmem:[%s3372_s1 + $0x148] sm:$0xff] (!%p261_p3)   ;;  %v2930_v27 = vld [vmem:[%s3372_s1 + $0x150] sm:$0xff] (!%p261_p3)   ;;  %v2932_v31 = vld [vmem:[%s3372_s1 + $0x158] sm:$0xff] (!%p261_p3)  }
   0xe   : > { %s3382_s18 = smov (!%p318_p4, %s3027_s18), 1  ;;  %2684 = vmatprep.subr.bf16.mxu0 %v2910_v5  ;;  %v2933_v34 = vld [vmem:[%s3372_s1 + $0x20] sm:$0xff]   ;;  %v2935_v36 = vld [vmem:[%s3372_s1 + $0x28] sm:$0xff]   ;;  %v2938_v38 = vld [vmem:[%s3372_s1 + $0x30] sm:$0xff]  }
   0xf   : > { %s2880_s13 = smul.u32 120, %s3382_s18  ;;  %v2934_v35 = vld [vmem:[%s3372_s1 + $0x160] sm:$0xff]   ;;  %v2936_v37 = vld [vmem:[%s3372_s1 + $0x168] sm:$0xff]   ;;  %v2940_v39 = vld [vmem:[%s3372_s1 + $0x170] sm:$0xff]  }
  0x10   : > { %2589 = vmatpush3.bf16.msra.mxu1 %v2909_v4  ;;  %v2943_v40 = vld [vmem:[%s3372_s1 + $0x38] sm:$0xff]   ;;  %v2946_v42 = vld [vmem:[%s3372_s1 + $0x80] sm:$0xff]   ;;  %v2951_v46 = vld [vmem:[%s3372_s1 + $0x88] sm:$0xff]  }
  0x11   : > { %2685 = vmatpush3.bf16.msra.mxu0 %v2910_v5  ;;  %2590 = vmatprep.subr.bf16.mxu1 %v2911_v6  ;;  %s3121_s24 = scalar_lea.vmem %s3371_s0, %s2880_s13  ;;  %v2944_v41 = vld [vmem:[%s3372_s1 + $0x178] sm:$0xff]   ;;  %v2948_v43 = vld [vmem:[%s3372_s1 + $0x180] sm:$0xff]   ;;  %v2952_v47 = vld [vmem:[%s3372_s1 + $0x188] sm:$0xff]  }
  0x12   : > { %2686 = vmatprep.subr.bf16.mxu0 %v2912_v7  ;;  %v2921_v11 = vld [vmem:[%s3121_s24 + $0x28] sm:$0xff]   ;;  %v2925_v20 = vld [vmem:[%s3121_s24 + $0x30] sm:$0xff]   ;;  %v2937_v24 = vld [vmem:[%s3121_s24 + $0x38] sm:$0xff]  }
  0x13   : > { %2600 = vmatprep.mubr.bf16.mxu1 %v2921_v11  ;;  %v2923_v13 = vld [vmem:[%s3121_s24 + $0x2c] sm:$0xff]   ;;  %v2926_v21 = vld [vmem:[%s3121_s24 + $0x34] sm:$0xff]   ;;  %v2939_v25 = vld [vmem:[%s3121_s24 + $0x3c] sm:$0xff]  }
  0x14   : > { %2591 = vmatpush3.bf16.msra.mxu1 %v2911_v6  ;;  %2696 = vmatprep.mubr.bf16.mxu0 %v2923_v13  ;;  %v2941_v29 = vld [vmem:[%s3121_s24 + $0x40] sm:$0xff]   ;;  %v2947_v33 = vld [vmem:[%s3121_s24 + $0x54] sm:$0xff]   ;;  %v2949_v44 = vld [vmem:[%s3121_s24 + $0x8] sm:$0xff]  }
  0x15   : > { %2687 = vmatpush3.bf16.msra.mxu0 %v2912_v7  ;;  %2592 = vmatprep.subr.bf16.mxu1 %v2913_v8  ;;  %v2942_v30 = vld [vmem:[%s3121_s24 + $0x44] sm:$0xff]   ;;  %v2950_v45 = vld [vmem:[%s3121_s24 + $0x5c] sm:$0xff]   ;;  %v2961_v48 = vld [vmem:[%s3121_s24 + $0x10] sm:$0xff]  }
  0x16   : > { %2688 = vmatprep.subr.bf16.mxu0 %v2914_v9  ;;  %v2945_v32 = vld [vmem:[%s3121_s24] sm:$0xff]   ;;  %v2953_v50 = vld [vmem:[%s3372_s1 + $0x90] sm:$0xff]   ;;  %v2955_v52 = vld [vmem:[%s3372_s1 + $0x98] sm:$0xff]  }
  0x17   : > { %v2963_v49 = vld [vmem:[%s3121_s24 + $0x64] sm:$0xff]   ;;  %v2954_v51 = vld [vmem:[%s3372_s1 + $0x190] sm:$0xff]   ;;  %v2965_v53 = vld [vmem:[%s3121_s24 + $0x18] sm:$0xff]  }
  0x18   : > { %2593 = vmatpush3.bf16.msra.mxu1 %v2913_v8  ;;  %v2966_v54 = vld [vmem:[%s3121_s24 + $0x6c] sm:$0xff]   ;;  %v2956_v55 = vld [vmem:[%s3372_s1 + $0x198] sm:$0xff]   ;;  %v2957_v58 = vld [vmem:[%s3372_s1 + $0xa0] sm:$0xff]  }
  0x19   : > { %2689 = vmatpush3.bf16.msra.mxu0 %v2914_v9  ;;  %2594 = vmatprep.subr.bf16.mxu1 %v2915_v10  ;;  %v2969_v56 = vld [vmem:[%s3121_s24 + $0x50] sm:$0xff]   ;;  %v2971_v57 = vld [vmem:[%s3121_s24 + $0x8] sm:$0xff]   ;;  %v2958_v59 = vld [vmem:[%s3372_s1 + $0x1a0] sm:$0xff]  }
  0x1a   : > { %2690 = vmatprep.subr.bf16.mxu0 %v2916_v12  ;;  %v2959_v60 = vld [vmem:[%s3372_s1 + $0xa8] sm:$0xff]   ;;  %v2962_v62 = vld [vmem:[%s3372_s1 + $0xb0] sm:$0xff]   ;;  %v2967_v0 = vld [vmem:[%s3372_s1 + $0xb8] sm:$0xff]  }
  0x1b   : > { %v2960_v61 = vld [vmem:[%s3372_s1 + $0x1a8] sm:$0xff]   ;;  %v2964_v63 = vld [vmem:[%s3372_s1 + $0x1b0] sm:$0xff]   ;;  %v2968_v1 = vld [vmem:[%s3372_s1 + $0x1b8] sm:$0xff]  }
  0x1c   : > { %2595 = vmatpush3.bf16.msra.mxu1 %v2915_v10  ;;  %v2970_v2 = vld [vmem:[%s3372_s1 + $0xc0] sm:$0xff]   ;;  %v2973_v4 = vld [vmem:[%s3121_s24 + $0x58] sm:$0xff]   ;;  %v2974_v5 = vld [vmem:[%s3121_s24 + $0x10] sm:$0xff]  }
  0x1d   : > { %2691 = vmatpush3.bf16.msra.mxu0 %v2916_v12  ;;  %2596 = vmatprep.subr.bf16.mxu1 %v2917_v14  ;;  %v2972_v3 = vld [vmem:[%s3372_s1 + $0x1c0] sm:$0xff]   ;;  %v2975_v6 = vld [vmem:[%s3372_s1 + $0xc8] sm:$0xff]   ;;  %v2986_v9 = vld [vmem:[%s3121_s24 + $0x18] sm:$0xff]  }
  0x1e   : > { %2692 = vmatprep.subr.bf16.mxu0 %v2918_v15  ;;  %v2976_v7 = vld [vmem:[%s3372_s1 + $0x1c8] sm:$0xff]   ;;  %v2985_v8 = vld [vmem:[%s3121_s24 + $0x60] sm:$0xff]   ;;  %v2977_v10 = vld [vmem:[%s3372_s1 + $0xd0] sm:$0xff]  }
  0x1f   : > { %v2978_v11 = vld [vmem:[%s3372_s1 + $0x1d0] sm:$0xff]   ;;  %v2979_v12 = vld [vmem:[%s3372_s1 + $0xd8] sm:$0xff]   ;;  %v2987_v13 = vld [vmem:[%s3121_s24 + $0x68] sm:$0xff]  }
  0x20   : > { %2597 = vmatpush3.bf16.msra.mxu1 %v2917_v14  ;;  %v2989_v14 = vld [vmem:[%s3121_s24 + $0x20] sm:$0xff]  }
  0x21   : > { %2693 = vmatpush3.bf16.msra.mxu0 %v2918_v15  ;;  %2598 = vmatprep.subr.bf16.mxu1 %v2919_v16  ;;  %v2980_v15 = vld [vmem:[%s3372_s1 + $0x1d8] sm:$0xff]  }
  0x22   : > { %2694 = vmatprep.subr.bf16.mxu0 %v2920_v17 }
  0x24   : > { %2599 = vmatpush3.bf16.msra.mxu1 %v2919_v16  ;;  %v2993_v16 = vld [vmem:[%s3121_s24 + $0x4] sm:$0xff]  }
  0x25   : > { %2695 = vmatpush3.bf16.msra.mxu0 %v2920_v17  ;;  %2608 = vmatprep.subr.bf16.mxu1 %v2922_v18  ;;  %v2994_v17 = vld [vmem:[%s3121_s24 + $0x30] sm:$0xff]  }
  0x26   : > { %2704 = vmatprep.subr.bf16.mxu0 %v2924_v19 }
  0x27   : > { %2601 = vmatmul.mubr.bf16.vlgmr.msra.gmra.mrb[0].mxu1 %v2925_v20  ;;  %v2983_v20 = vld [vmem:[%s3372_s1 + $0xe8] sm:$0xff]  }
  0x28   : > { %2609 = vmatpush3.bf16.msra.mxu1 %v2922_v18  ;;  %2697 = vmatmul.mubr.bf16.vlgmr.msra.gmra.mrb[0].mxu0 %v2926_v21  ;;  %v2981_v18 = vld [vmem:[%s3372_s1 + $0xe0] sm:$0xff]   ;;  %v2984_v21 = vld [vmem:[%s3372_s1 + $0x1e8] sm:$0xff]  }
  0x29   : > { %2705 = vmatpush3.bf16.msra.mxu0 %v2924_v19  ;;  %2610 = vmatprep.subr.bf16.mxu1 %v2927_v22  ;;  %v2982_v19 = vld [vmem:[%s3372_s1 + $0x1e0] sm:$0xff]  }
  0x2a   : > { %2706 = vmatprep.subr.bf16.mxu0 %v2928_v23  ;;  %2604 = vmatprep.mubr.bf16.mxu1 %v2937_v24  ;;  %v2991_v24 = vld [vmem:[%s3372_s1 + $0xf8] sm:$0xff]  }
  0x2b   : > { %2700 = vmatprep.mubr.bf16.mxu0 %v2939_v25  ;;  %v2992_v25 = vld [vmem:[%s3372_s1 + $0x1f8] sm:$0xff]  }
  0x2c   : > { %2611 = vmatpush3.bf16.msra.mxu1 %v2927_v22  ;;  %v2988_v22 = vld [vmem:[%s3372_s1 + $0xf0] sm:$0xff]  }
  0x2d   : > { %2707 = vmatpush3.bf16.msra.mxu0 %v2928_v23  ;;  %2612 = vmatprep.subr.bf16.mxu1 %v2929_v26  ;;  %v2990_v23 = vld [vmem:[%s3372_s1 + $0x1f0] sm:$0xff]  }
  0x2e   : > { %2708 = vmatprep.subr.bf16.mxu0 %v2930_v27 }
  0x2f   : > { %2605 = vmatmul.mubr.bf16.gmra.mrb[4].mxu1 %v2941_v29  ;;  %v2998_v29 = vld [vmem:[%s3372_s1 + $0x208] sm:$0xff]  }
  0x30   : > { %2613 = vmatpush3.bf16.msra.mxu1 %v2929_v26  ;;  %2701 = vmatmul.mubr.bf16.gmra.mrb[4].mxu0 %v2942_v30  ;;  %v2997_v26 = vld [vmem:[%s3372_s1 + $0x200] sm:$0xff]   ;;  %v2999_v30 = vld [vmem:[%s3121_s24 + $0x14] sm:$0xff]  }
  0x31   : > { %2709 = vmatpush3.bf16.msra.mxu0 %v2930_v27  ;;  %2614 = vmatprep.subr.bf16.mxu1 %v2931_v28  ;;  %v2995_v27 = vld [vmem:[%s3121_s24 + $0xc] sm:$0xff]  }
  0x32   : > { %2710 = vmatprep.subr.bf16.mxu0 %v2932_v31  ;;  %2624 = vmatprep.mubr.bf16.mxu1 %v2945_v32  ;;  %v3003_v32 = vld [vmem:[%s3372_s1 + $0x210] sm:$0xff]  }
  0x33   : > { %2720 = vmatprep.mubr.bf16.mxu0 %v2947_v33  ;;  %v3001_v33 = vld [vmem:[%s3121_s24 + $0x1c] sm:$0xff]  }
  0x34   : > { %2615 = vmatpush3.bf16.msra.mxu1 %v2931_v28  ;;  %v2996_v28 = vld [vmem:[%s3121_s24 + $0x38] sm:$0xff]  }
  0x35   : > { %2711 = vmatpush3.bf16.msra.mxu0 %v2932_v31  ;;  %2616 = vmatprep.subr.bf16.mxu1 %v2933_v34  ;;  %v3000_v31 = vld [vmem:[%s3121_s24 + $0x40] sm:$0xff]  }
  0x36   : > { %2712 = vmatprep.subr.bf16.mxu0 %v2934_v35 }
  0x38   : > { %2617 = vmatpush3.bf16.msra.mxu1 %v2933_v34  ;;  %v3002_v34 = vld [vmem:[%s3121_s24 + $0x48] sm:$0xff]  }
  0x39   : > { %2713 = vmatpush3.bf16.msra.mxu0 %v2934_v35  ;;  %2618 = vmatprep.subr.bf16.mxu1 %v2935_v36  ;;  %v3004_v35 = vld [vmem:[%s3372_s1 + $0x218] sm:$0xff]  }
  0x3a   : > { %2714 = vmatprep.subr.bf16.mxu0 %v2936_v37 }
  0x3c   : > { %2619 = vmatpush3.bf16.msra.mxu1 %v2935_v36  ;;  %v3009_v36 = vld [vmem:[%s3121_s24 + $0x58] sm:$0xff]  }
  0x3d   : > { %2715 = vmatpush3.bf16.msra.mxu0 %v2936_v37  ;;  %2620 = vmatprep.subr.bf16.mxu1 %v2938_v38  ;;  %v3010_v37 = vld [vmem:[%s3121_s24 + $0x68] sm:$0xff]  }
  0x3e   : > { %2716 = vmatprep.subr.bf16.mxu0 %v2940_v39 }
  0x40   : > { %2621 = vmatpush3.bf16.msra.mxu1 %v2938_v38  ;;  %v3005_v38 = vld [vmem:[%s3372_s1 + $0x220] sm:$0xff]  }
  0x41   : > { %2717 = vmatpush3.bf16.msra.mxu0 %v2940_v39  ;;  %2622 = vmatprep.subr.bf16.mxu1 %v2943_v40  ;;  %v3006_v39 = vld [vmem:[%s3372_s1 + $0x228] sm:$0xff]  }
  0x42   : > { %2718 = vmatprep.subr.bf16.mxu0 %v2944_v41 }
  0x44   : > { %2623 = vmatpush3.bf16.msra.mxu1 %v2943_v40  ;;  %v3007_v40 = vld [vmem:[%s3372_s1 + $0x230] sm:$0xff]  }
  0x45   : > { %2719 = vmatpush3.bf16.msra.mxu0 %v2944_v41  ;;  %2632 = vmatprep.subr.bf16.mxu1 %v2946_v42  ;;  %v3008_v41 = vld [vmem:[%s3372_s1 + $0x238] sm:$0xff]  }
  0x46   : > { %2728 = vmatprep.subr.bf16.mxu0 %v2948_v43 }
  0x47   : > { %2625 = vmatmul.mubr.bf16.vlgmr.msra.gmra.mrb[0].mxu1 %v2949_v44 }
  0x48   : > { %2633 = vmatpush3.bf16.msra.mxu1 %v2946_v42  ;;  %2721 = vmatmul.mubr.bf16.vlgmr.msra.gmra.mrb[0].mxu0 %v2950_v45  ;;  %v3012_v42 = vld [vmem:[%s3121_s24 + $0x70] sm:$0xff]  }
  0x49   : > { %2729 = vmatpush3.bf16.msra.mxu0 %v2948_v43  ;;  %2634 = vmatprep.subr.bf16.mxu1 %v2951_v46  ;;  %v3011_v43 = vld [vmem:[%s3121_s24 + $0x60] sm:$0xff]   ;;  %s2432_s24 = sshll.u32 %s3382_s18, 5 }
  0x4a   : > { %2730 = vmatprep.subr.bf16.mxu0 %v2952_v47  ;;  %2628 = vmatprep.mubr.bf16.mxu1 %v2961_v48  ;;  %s346_s6 = scalar_lea.vmem %s3375_s4, %s2432_s24  ;;  %s357_s13 = scalar_lea.vmem %s3376_s5, %s2432_s24 }
  0x4b   : > { %2724 = vmatprep.mubr.bf16.mxu0 %v2963_v49 }
  0x4c   : > { %2635 = vmatpush3.bf16.msra.mxu1 %v2951_v46 }
  0x4d   : > { %2731 = vmatpush3.bf16.msra.mxu0 %v2952_v47  ;;  %2636 = vmatprep.subr.bf16.mxu1 %v2953_v50 }
  0x4e   : > { %2732 = vmatprep.subr.bf16.mxu0 %v2954_v51 }
  0x4f   : > { %2629 = vmatmul.mubr.bf16.gmra.mrb[4].mxu1 %v2965_v53 }
  0x50   : > { %2637 = vmatpush3.bf16.msra.mxu1 %v2953_v50  ;;  %2725 = vmatmul.mubr.bf16.gmra.mrb[4].mxu0 %v2966_v54 }
  0x51   : > { %2733 = vmatpush3.bf16.msra.mxu0 %v2954_v51  ;;  %2638 = vmatprep.subr.bf16.mxu1 %v2955_v52 }
  0x52   : > { %2734 = vmatprep.subr.bf16.mxu0 %v2956_v55  ;;  %2648 = vmatprep.mubr.bf16.mxu1 %v2969_v56 }
  0x53   : > { %2744 = vmatprep.mubr.bf16.mxu0 %v2971_v57 }
  0x54   : > { %2639 = vmatpush3.bf16.msra.mxu1 %v2955_v52 }
  0x55   : > { %2735 = vmatpush3.bf16.msra.mxu0 %v2956_v55  ;;  %2640 = vmatprep.subr.bf16.mxu1 %v2957_v58 }
  0x56   : > { %2736 = vmatprep.subr.bf16.mxu0 %v2958_v59 }
  0x58   : > { %2641 = vmatpush3.bf16.msra.mxu1 %v2957_v58 }
  0x59   : > { %2737 = vmatpush3.bf16.msra.mxu0 %v2958_v59  ;;  %2642 = vmatprep.subr.bf16.mxu1 %v2959_v60 }
  0x5a   : > { %2738 = vmatprep.subr.bf16.mxu0 %v2960_v61 }
  0x5c   : > { %2643 = vmatpush3.bf16.msra.mxu1 %v2959_v60  ;;  %v2470_v60 = vld [vmem:[%s346_s6 + $0x8] sm:$0xff]  }
  0x5d   : > { %2739 = vmatpush3.bf16.msra.mxu0 %v2960_v61  ;;  %2644 = vmatprep.subr.bf16.mxu1 %v2962_v62  ;;  %v2472_v61 = vld [vmem:[%s346_s6 + $0x18] sm:$0xff]  }
  0x5e   : > { %2740 = vmatprep.subr.bf16.mxu0 %v2964_v63 }
  0x60   : > { %2645 = vmatpush3.bf16.msra.mxu1 %v2962_v62  ;;  %v2435_v62 = vld [vmem:[%s346_s6] sm:$0xff]  }
  0x61   : > { %2741 = vmatpush3.bf16.msra.mxu0 %v2964_v63  ;;  %2646 = vmatprep.subr.bf16.mxu1 %v2967_v0  ;;  %v2471_v63 = vld [vmem:[%s346_s6 + $0x10] sm:$0xff]  }
  0x62   : > { %2742 = vmatprep.subr.bf16.mxu0 %v2968_v1 }
  0x64   : > { %2647 = vmatpush3.bf16.msra.mxu1 %v2967_v0  ;;  %v2428_v0 = vld [vmem:[%s3373_s2] ss:$0 sm:$0xff] }
  0x65   : > { %2743 = vmatpush3.bf16.msra.mxu0 %v2968_v1  ;;  %2656 = vmatprep.subr.bf16.mxu1 %v2970_v2  ;;  %v2440_v1 = vunpack.c.l.bf16 %v2470_v60 }
  0x66   : > { %2752 = vmatprep.subr.bf16.mxu0 %v2972_v3 }
  0x67   : > { %2649 = vmatmul.mubr.bf16.vlgmr.msra.gmra.mrb[0].mxu1 %v2973_v4 }
  0x68   : > { %2657 = vmatpush3.bf16.msra.mxu1 %v2970_v2  ;;  %2745 = vmatmul.mubr.bf16.vlgmr.msra.gmra.mrb[0].mxu0 %v2974_v5 }
  0x69   : > { %2753 = vmatpush3.bf16.msra.mxu0 %v2972_v3  ;;  %2658 = vmatprep.subr.bf16.mxu1 %v2975_v6  ;;  %v2448_v3 = vunpack.c.l.bf16 %v2472_v61 }
  0x6a   : > { %2754 = vmatprep.subr.bf16.mxu0 %v2976_v7  ;;  %2652 = vmatprep.mubr.bf16.mxu1 %v2985_v8  ;;  %v2444_v8 = vunpack.c.l.bf16 %v2471_v63 }
  0x6b   : > { %2748 = vmatprep.mubr.bf16.mxu0 %v2986_v9  ;;  %v2441_v9 = vunpack.c.h.bf16 %v2470_v60 }
  0x6c   : > { %2659 = vmatpush3.bf16.msra.mxu1 %v2975_v6  ;;  %v2436_v6 = vunpack.c.l.bf16 %v2435_v62 }
  0x6d   : > { %2755 = vmatpush3.bf16.msra.mxu0 %v2976_v7  ;;  %2660 = vmatprep.subr.bf16.mxu1 %v2977_v10 }
  0x6e   : > { %2756 = vmatprep.subr.bf16.mxu0 %v2978_v11 }
  0x6f   : > { %2653 = vmatmul.mubr.bf16.gmra.mrb[4].mxu1 %v2987_v13 }
  0x70   : > { %2661 = vmatpush3.bf16.msra.mxu1 %v2977_v10  ;;  %2749 = vmatmul.mubr.bf16.gmra.mrb[4].mxu0 %v2989_v14 }
  0x71   : > { %2757 = vmatpush3.bf16.msra.mxu0 %v2978_v11  ;;  %2662 = vmatprep.subr.bf16.mxu1 %v2979_v12  ;;  %v2429_v11 = vld [vmem:[%s3374_s3] ss:$0 sm:$0xff] }
  0x72   : > { %2758 = vmatprep.subr.bf16.mxu0 %v2980_v15  ;;  %2672 = vmatprep.mubr.bf16.mxu1 %v2993_v16  ;;  %v2437_v16 = vunpack.c.h.bf16 %v2435_v62 }
  0x73   : > { %2768 = vmatprep.mubr.bf16.mxu0 %v2994_v17 }
  0x74   : > { %2663 = vmatpush3.bf16.msra.mxu1 %v2979_v12 }
  0x75   : > { %2759 = vmatpush3.bf16.msra.mxu0 %v2980_v15  ;;  %2664 = vmatprep.subr.bf16.mxu1 %v2981_v18  ;;  %v2449_v15 = vunpack.c.h.bf16 %v2472_v61 }
  0x76   : > { %2760 = vmatprep.subr.bf16.mxu0 %v2982_v19 }
  0x78   : > { %2665 = vmatpush3.bf16.msra.mxu1 %v2981_v18 }
  0x79   : > { %2761 = vmatpush3.bf16.msra.mxu0 %v2982_v19  ;;  %2666 = vmatprep.subr.bf16.mxu1 %v2983_v20 }
  0x7a   : > { %2762 = vmatprep.subr.bf16.mxu0 %v2984_v21 }
  0x7c   : > { %2667 = vmatpush3.bf16.msra.mxu1 %v2983_v20 }
  0x7d   : > { %2763 = vmatpush3.bf16.msra.mxu0 %v2984_v21  ;;  %2668 = vmatprep.subr.bf16.mxu1 %v2988_v22 }
  0x7e   : > { %2764 = vmatprep.subr.bf16.mxu0 %v2990_v23 }
  0x80   : > { %2669 = vmatpush3.bf16.msra.mxu1 %v2988_v22  ;;  %v2445_v22 = vunpack.c.h.bf16 %v2471_v63 }
  0x81   : > { %2765 = vmatpush3.bf16.msra.mxu0 %v2990_v23  ;;  %2670 = vmatprep.subr.bf16.mxu1 %v2991_v24 }
  0x82   : > { %2766 = vmatprep.subr.bf16.mxu0 %v2992_v25 }
  0x84   : > { %2671 = vmatpush3.bf16.msra.mxu1 %v2991_v24 }
  0x85   : > { %2767 = vmatpush3.bf16.msra.mxu0 %v2992_v25  ;;  %2800 = vmatprep.subr.bf16.mxu1 %v2997_v26 }
  0x86   : > { %2776 = vmatprep.subr.bf16.mxu0 %v2997_v26 }
  0x87   : > { %2673 = vmatmul.mubr.bf16.vlgmr.msra.gmra.mrb[0].mxu1 %v2995_v27 }
  0x88   : > { %2769 = vmatmul.mubr.bf16.vlgmr.msra.gmra.mrb[0].mxu0 %v2996_v28  ;;  %2808 = vmatpush3.bf16.msra.mxu1 %v2997_v26 }
  0x89   : > { %2777 = vmatpush3.bf16.msra.mxu0 %v2997_v26  ;;  %2801 = vmatprep.subr.bf16.mxu1 %v2998_v29 }
  0x8a   : > { %2778 = vmatprep.subr.bf16.mxu0 %v2998_v29  ;;  %2676 = vmatprep.mubr.bf16.mxu1 %v2999_v30 }
  0x8b   : > { %2772 = vmatprep.mubr.bf16.mxu0 %v3000_v31 }
  0x8c   : > { %2809 = vmatpush3.bf16.msra.mxu1 %v2998_v29 }
  0x8d   : > { %2779 = vmatpush3.bf16.msra.mxu0 %v2998_v29  ;;  %2802 = vmatprep.subr.bf16.mxu1 %v3003_v32 }
  0x8e   : > { %2780 = vmatprep.subr.bf16.mxu0 %v3003_v32 }
  0x8f   : > { %2677 = vmatmul.mubr.bf16.gmra.mrb[4].mxu1 %v3001_v33 }
  0x90   : > { %2773 = vmatmul.mubr.bf16.gmra.mrb[4].mxu0 %v3002_v34  ;;  %2810 = vmatpush3.bf16.msra.mxu1 %v3003_v32 }
  0x91   : > { %2781 = vmatpush3.bf16.msra.mxu0 %v3003_v32  ;;  %2803 = vmatprep.subr.bf16.mxu1 %v3004_v35 }
  0x92   : > { %2782 = vmatprep.subr.bf16.mxu0 %v3004_v35  ;;  %2792 = vmatprep.mubr.bf16.mxu0 %v3009_v36 }
  0x93   : > { %2796 = vmatprep.mubr.bf16.mxu1 %v3010_v37 }
  0x94   : > { %2811 = vmatpush3.bf16.msra.mxu1 %v3004_v35 }
  0x95   : > { %2783 = vmatpush3.bf16.msra.mxu0 %v3004_v35  ;;  %2804 = vmatprep.subr.bf16.mxu1 %v3005_v38 }
  0x96   : > { %2784 = vmatprep.subr.bf16.mxu0 %v3005_v38 }
  0x98   : > { %2812 = vmatpush3.bf16.msra.mxu1 %v3005_v38 }
  0x99   : > { %2785 = vmatpush3.bf16.msra.mxu0 %v3005_v38  ;;  %2805 = vmatprep.subr.bf16.mxu1 %v3006_v39 }
  0x9a   : > { %2786 = vmatprep.subr.bf16.mxu0 %v3006_v39 }
  0x9c   : > { %2813 = vmatpush3.bf16.msra.mxu1 %v3006_v39 }
  0x9d   : > { %2787 = vmatpush3.bf16.msra.mxu0 %v3006_v39  ;;  %2806 = vmatprep.subr.bf16.mxu1 %v3007_v40 }
  0x9e   : > { %2788 = vmatprep.subr.bf16.mxu0 %v3007_v40 }
  0xa0   : > { %2814 = vmatpush3.bf16.msra.mxu1 %v3007_v40 }
  0xa1   : > { %2789 = vmatpush3.bf16.msra.mxu0 %v3007_v40  ;;  %2807 = vmatprep.subr.bf16.mxu1 %v3008_v41 }
  0xa2   : > { %2790 = vmatprep.subr.bf16.mxu0 %v3008_v41 }
  0xa4   : > { %2815 = vmatpush3.bf16.msra.mxu1 %v3008_v41 }
  0xa5   : > { %2791 = vmatpush3.bf16.msra.mxu0 %v3008_v41 }
  0xa7   : > { %2797 = vmatmul.mubr.bf16.vlgmr.msra.gmra.mrb[8].mxu1 %v3012_v42 }
  0xa8   : > { %2793 = vmatmul.mubr.bf16.vlgmr.msra.gmra.mrb[0].mxu0 %v3011_v43 }
 0x15a   : > { %v2674_v44 = vpop.f32.mrb[0].mxu1 }
 0x15b   : > { %v986_v45 = vpop.f32.mrb[1].mxu1 }
 0x15c   : > { %v2675_v46 = vpop.f32.mrb[2].mxu1 }
 0x15d   : > { %v989_v47 = vpop.f32.mrb[3].mxu1 }
 0x162   : > { %v2678_v48 = vpop.f32.mrb[4].mxu1 }
 0x163   : > { %v2774_v49 = vpop.f32.mrb[4].mxu0  ;;  %v1002_v50 = vpop.f32.mrb[5].mxu1 }
 0x164   : > { %v2820_v51 = vadd.f32 %v2774_v49, %v2678_v48  ;;  %v1686_v52 = vpop.f32.mrb[5].mxu0  ;;  %v2679_v53 = vpop.f32.mrb[6].mxu1 }
 0x165   : > { %v2822_v54 = vadd.f32 %v1686_v52, %v1002_v50  ;;  %v2775_v55 = vpop.f32.mrb[6].mxu0  ;;  %v1005_v56 = vpop.f32.mrb[7].mxu1 }
 0x166   : > { %v2824_v57 = vadd.f32 %v2775_v55, %v2679_v53  ;;  %v1689_v58 = vpop.f32.mrb[7].mxu0 }
 0x167   : > { %v2826_v59 = vadd.f32 %v1689_v58, %v1005_v56 }
 0x17a   : > { %v2798_v2 = vpop.f32.mrb[8].mxu1 }
 0x17b   : > { %v2794_v4 = vpop.f32.mrb[0].mxu0  ;;  %v2821_v5 = vadd.f32 %v2820_v51, %v2798_v2  ;;  %v1857_v7 = vpop.f32.mrb[9].mxu1 }
 0x17c   : > { %v2816_v10 = vadd.f32 %v2794_v4, %v2674_v44  ;;  %v1841_v12 = vpop.f32.mrb[1].mxu0  ;;  %v2823_v13 = vadd.f32 %v2822_v54, %v1857_v7  ;;  %v2799_v14 = vpop.f32.mrb[10].mxu1 }
 0x17d   : > { %v1893_v17 = vmul.f32 %v2821_v5, %v2428_v0  ;;  %v2817_v18 = vadd.f32 %v1841_v12, %v986_v45  ;;  %v2795_v19 = vpop.f32.mrb[2].mxu0  ;;  %v2825_v20 = vadd.f32 %v2824_v57, %v2799_v14  ;;  %v1860_v21 = vpop.f32.mrb[11].mxu1 }
 0x17e   : > { %v1889_v23 = vmul.f32 %v2816_v10, %v2428_v0  ;;  %v1891_v24 = vmul.f32 %v2823_v13, %v2428_v0  ;;  %v2818_v25 = vadd.f32 %v2795_v19, %v2675_v46  ;;  %v1844_v26 = vpop.f32.mrb[3].mxu0  ;;  %v2827_v27 = vadd.f32 %v2826_v59, %v1860_v21 }
 0x17f   : > { %v1908_v28 = vadd.f32 %v2429_v11, %v1893_v17  ;;  %v1887_v29 = vmul.f32 %v2817_v18, %v2428_v0  ;;  %v1894_v30 = vmul.f32 %v2825_v20, %v2428_v0  ;;  %v2819_v31 = vadd.f32 %v1844_v26, %v989_v47 }
 0x180   : > { %v1904_v32 = vadd.f32 %v2429_v11, %v1889_v23  ;;  %v1906_v33 = vadd.f32 %v2429_v11, %v1891_v24  ;;  %v1890_v34 = vmul.f32 %v2818_v25, %v2428_v0  ;;  %v1892_v35 = vmul.f32 %v2827_v27, %v2428_v0 }
 0x181   : > { %v1932_v36 = vadd.f32 %v2448_v3, %v1908_v28  ;;  %v1902_v37 = vadd.f32 %v2429_v11, %v1887_v29  ;;  %v1909_v38 = vadd.f32 %v2429_v11, %v1894_v30  ;;  %v1888_v39 = vmul.f32 %v2819_v31, %v2428_v0 }
 0x182   : > { %v1928_v40 = vadd.f32 %v2440_v1, %v1904_v32  ;;  %v1930_v41 = vadd.f32 %v2444_v8, %v1906_v33  ;;  %v1905_v42 = vadd.f32 %v2429_v11, %v1890_v34  ;;  %v1907_v43 = vadd.f32 %v2429_v11, %v1892_v35 }
 0x183   : > { %v1926_v44 = vadd.f32 %v2436_v6, %v1902_v37  ;;  %v1933_v45 = vadd.f32 %v2449_v15, %v1909_v38  ;;  %v1903_v46 = vadd.f32 %v2429_v11, %v1888_v39  ;;  %v1940_v50 = vmax.f32 %v1932_v36, 0.0 }
 0x184   : > { %v1929_v48 = vadd.f32 %v2441_v9, %v1905_v42  ;;  %v1931_v49 = vadd.f32 %v2445_v22, %v1907_v43  ;;  %v1936_v52 = vmax.f32 %v1928_v40, 0.0  ;;  %v1938_v53 = vmax.f32 %v1930_v41, 0.0 }
 0x185   : > { %v1941_v47 = vmax.f32 %v1933_v45, 0.0  ;;  %v1927_v51 = vadd.f32 %v2437_v16, %v1903_v46  ;;  %v1934_v56 = vmax.f32 %v1926_v44, 0.0 }
 0x186   : > { %v1937_v54 = vmax.f32 %v1929_v48, 0.0  ;;  %v1939_v55 = vmax.f32 %v1931_v49, 0.0 }
 0x187   : > { %v2468_v57 = vpack.c.bf16 %v1941_v47, %v1940_v50  ;;  %v1935_v58 = vmax.f32 %v1927_v51, 0.0 }
 0x188   : > { %v2458_v59 = vpack.c.bf16 %v1937_v54, %v1936_v52  ;;  %v2463_v60 = vpack.c.bf16 %v1939_v55, %v1938_v53 }
 0x189   : > { %2475 = vst [vmem:[%s357_s13 + $0x18] sm:$0xff] %v2468_v57   ;;  %v2453_v61 = vpack.c.bf16 %v1935_v58, %v1934_v56 }
 0x18a   : > { %2473 = vst [vmem:[%s357_s13 + $0x8] sm:$0xff] %v2458_v59   ;;  %2474 = vst [vmem:[%s357_s13 + $0x10] sm:$0xff] %v2463_v60  }
 0x18b   : > { %2454 = vst [vmem:[%s357_s13] sm:$0xff] %v2453_v61  }
 0x18c PF: > { %s15_s20 = sadd.s32 1, %s3035_s20   ;;  %s3377_s18 = smov %s3031_s19 }
 0x18d   : > { %p12_p5 = scmp.ge.s32.totalorder %s15_s20, 4   ;;  %s3378_s19 = smov %s3380_s21 }
 0x18f   :  { %14 = sbr.rel (!%p12_p5) target bundleno = 2 (0x2), region = 98 }

// kernel: _lambda_.8
= control target key start
LH: loop header
LB: loop body
LE: loop exit
PB: predicated region body
PF: predicated region fallthrough
CT: control target
= control target key end

     0   :  { %s2926_s15 = smov 0   ;;  %s2928_s16 = smov 0   ;;  %s3223_s0 = inlined_call_operand.vmem [shape: bf16[2,30,8,128], index: 0, kind: input, shape index: {}]   ;;  %s3224_s1 = inlined_call_operand.vmem [shape: bf16[9,128,128], index: 1, kind: input, shape index: {}]   ;;  %s3225_s2 = inlined_call_operand.vmem [shape: f32[1,128], index: 2, kind: input, shape index: {}]   ;;  %s3226_s3 = inlined_call_operand.vmem [shape: f32[1,128], index: 3, kind: input, shape index: {}]   ;;  %s3227_s4 = inlined_call_operand.vmem [shape: bf16[2,8,8,128], index: 4, kind: output, shape index: {}]  }
   0x1   :  { %s2930_s17 = smov 0  }
   0x2 LB: > { %s33_s18 = sadd.s32 1, %s2895_s16  ;;  %p2008_p0 = scmp.ge.s32.totalorder %s2899_s17, 1  ;;  %s2899_s17 = sphi %s2930_s17, %s14_s17   ;;  %s2895_s16 = sphi %s2928_s16, %s3229_s16   ;;  %s2891_s15 = sphi %s2926_s15, %s3228_s15  }
   0x3   : > { %p35_p1 = scmp.ge.s32.totalorder %s33_s18, 2  ;;  %p215_p2 = scmp.lt.s32.totalorder %s2899_s17, 3 }
   0x5   : > { %s3231_s18 = smov (%p35_p1, %s33_s18), 0  ;;  %p216_p3 = pnand %p2008_p0, %p215_p2 }
   0x6   : > { %v2769_v0 = vld [vmem:[%s3224_s1 + $0x40] sm:$0xff] (!%p216_p3)   ;;  %p260_p4 = scmp.lt.s32.totalorder (!%p216_p3), %s2891_s15, 1  ;;  %v2771_v2 = vld [vmem:[%s3224_s1 + $0x48] sm:$0xff] (!%p216_p3)   ;;  %v2773_v4 = vld [vmem:[%s3224_s1 + $0x50] sm:$0xff] (!%p216_p3)  }
   0x7   : > { %219 = sbr.rel (%p216_p3) target bundleno = 394 (0x18a), region = 36  ;;  %v2770_v1 = vld [vmem:[%s3224_s1 + $0x100] sm:$0xff] (!%p216_p3)   ;;  %2448 = vmatprep.subr.bf16.mxu1 (!%p216_p3), %v2769_v0  ;;  %v2772_v3 = vld [vmem:[%s3224_s1 + $0x108] sm:$0xff] (!%p216_p3)   ;;  %v2774_v5 = vld [vmem:[%s3224_s1 + $0x110] sm:$0xff] (!%p216_p3)  }
   0x8   : > { %2544 = vmatprep.subr.bf16.mxu0 (!%p216_p3), %v2770_v1  ;;  %2449 = vmatpush3.bf16.msra.mxu1 (!%p216_p3), %v2769_v0  ;;  %v2775_v6 = vld [vmem:[%s3224_s1 + $0x58] sm:$0xff] (!%p216_p3)   ;;  %v2777_v8 = vld [vmem:[%s3224_s1 + $0x60] sm:$0xff] (!%p216_p3)   ;;  %v2779_v10 = vld [vmem:[%s3224_s1 + $0x68] sm:$0xff] (!%p216_p3)  }
   0x9   : > { %2545 = vmatpush3.bf16.msra.mxu0 (!%p216_p3), %v2770_v1  ;;  %2450 = vmatprep.subr.bf16.mxu1 (!%p216_p3), %v2771_v2  ;;  %v2776_v7 = vld [vmem:[%s3224_s1 + $0x118] sm:$0xff] (!%p216_p3)   ;;  %v2778_v9 = vld [vmem:[%s3224_s1 + $0x120] sm:$0xff] (!%p216_p3)   ;;  %v2780_v12 = vld [vmem:[%s3224_s1 + $0x128] sm:$0xff] (!%p216_p3)  }
   0xa   : > { %2546 = vmatprep.subr.bf16.mxu0 (!%p216_p3), %v2772_v3  ;;  %v2781_v14 = vld [vmem:[%s3224_s1 + $0x70] sm:$0xff] (!%p216_p3)   ;;  %v2783_v16 = vld [vmem:[%s3224_s1 + $0x78] sm:$0xff] (!%p216_p3)   ;;  %v2786_v18 = vld [vmem:[%s3224_s1] sm:$0xff] (!%p216_p3)  }
   0xb   : > { %v2782_v15 = vld [vmem:[%s3224_s1 + $0x130] sm:$0xff] (!%p216_p3)   ;;  %v2784_v17 = vld [vmem:[%s3224_s1 + $0x138] sm:$0xff] (!%p216_p3)   ;;  %v2788_v19 = vld [vmem:[%s3224_s1 + $0x140] sm:$0xff] (!%p216_p3)  }
   0xc   : > { %2451 = vmatpush3.bf16.msra.mxu1 (!%p216_p3), %v2771_v2  ;;  %v2791_v22 = vld [vmem:[%s3224_s1 + $0x8] sm:$0xff] (!%p216_p3)   ;;  %v2793_v26 = vld [vmem:[%s3224_s1 + $0x10] sm:$0xff] (!%p216_p3)   ;;  %v2795_v28 = vld [vmem:[%s3224_s1 + $0x18] sm:$0xff] (!%p216_p3)  }
   0xd   : > { %2547 = vmatpush3.bf16.msra.mxu0 (!%p216_p3), %v2772_v3  ;;  %2452 = vmatprep.subr.bf16.mxu1 (!%p216_p3), %v2773_v4  ;;  %v2792_v23 = vld [vmem:[%s3224_s1 + $0x148] sm:$0xff] (!%p216_p3)   ;;  %v2794_v27 = vld [vmem:[%s3224_s1 + $0x150] sm:$0xff] (!%p216_p3)   ;;  %v2796_v31 = vld [vmem:[%s3224_s1 + $0x158] sm:$0xff] (!%p216_p3)  }
   0xe   : > { %s3233_s15 = smov (!%p260_p4, %s2891_s15), 1  ;;  %2548 = vmatprep.subr.bf16.mxu0 %v2774_v5  ;;  %v2797_v34 = vld [vmem:[%s3224_s1 + $0x20] sm:$0xff]   ;;  %v2799_v36 = vld [vmem:[%s3224_s1 + $0x28] sm:$0xff]   ;;  %v2802_v38 = vld [vmem:[%s3224_s1 + $0x30] sm:$0xff]  }
   0xf   : > { %s2744_s9 = smul.u32 120, %s3233_s15  ;;  %v2798_v35 = vld [vmem:[%s3224_s1 + $0x160] sm:$0xff]   ;;  %v2800_v37 = vld [vmem:[%s3224_s1 + $0x168] sm:$0xff]   ;;  %v2804_v39 = vld [vmem:[%s3224_s1 + $0x170] sm:$0xff]   ;;  %s2316_s22 = sshll.u32 %s3233_s15, 5 }
  0x10   : > { %2453 = vmatpush3.bf16.msra.mxu1 %v2773_v4  ;;  %v2807_v40 = vld [vmem:[%s3224_s1 + $0x38] sm:$0xff]   ;;  %v2810_v42 = vld [vmem:[%s3224_s1 + $0x80] sm:$0xff]   ;;  %v2815_v46 = vld [vmem:[%s3224_s1 + $0x88] sm:$0xff]   ;;  %s288_s25 = scalar_lea.vmem %s3227_s4, %s2316_s22 }
  0x11   : > { %2549 = vmatpush3.bf16.msra.mxu0 %v2774_v5  ;;  %2454 = vmatprep.subr.bf16.mxu1 %v2775_v6  ;;  %s2980_s20 = scalar_lea.vmem %s3223_s0, %s2744_s9  ;;  %v2808_v41 = vld [vmem:[%s3224_s1 + $0x178] sm:$0xff]   ;;  %v2812_v43 = vld [vmem:[%s3224_s1 + $0x180] sm:$0xff]   ;;  %v2816_v47 = vld [vmem:[%s3224_s1 + $0x188] sm:$0xff]  }
  0x12   : > { %2550 = vmatprep.subr.bf16.mxu0 %v2776_v7  ;;  %v2785_v11 = vld [vmem:[%s2980_s20 + $0x28] sm:$0xff]   ;;  %v2789_v20 = vld [vmem:[%s2980_s20 + $0x30] sm:$0xff]   ;;  %v2801_v24 = vld [vmem:[%s2980_s20 + $0x38] sm:$0xff]  }
  0x13   : > { %2464 = vmatprep.mubr.bf16.mxu1 %v2785_v11  ;;  %v2787_v13 = vld [vmem:[%s2980_s20 + $0x2c] sm:$0xff]   ;;  %v2790_v21 = vld [vmem:[%s2980_s20 + $0x34] sm:$0xff]   ;;  %v2803_v25 = vld [vmem:[%s2980_s20 + $0x3c] sm:$0xff]  }
  0x14   : > { %2455 = vmatpush3.bf16.msra.mxu1 %v2775_v6  ;;  %2560 = vmatprep.mubr.bf16.mxu0 %v2787_v13  ;;  %v2805_v29 = vld [vmem:[%s2980_s20 + $0x40] sm:$0xff]   ;;  %v2811_v33 = vld [vmem:[%s2980_s20 + $0x54] sm:$0xff]   ;;  %v2813_v44 = vld [vmem:[%s2980_s20 + $0x8] sm:$0xff]  }
  0x15   : > { %2551 = vmatpush3.bf16.msra.mxu0 %v2776_v7  ;;  %2456 = vmatprep.subr.bf16.mxu1 %v2777_v8  ;;  %v2806_v30 = vld [vmem:[%s2980_s20 + $0x44] sm:$0xff]   ;;  %v2814_v45 = vld [vmem:[%s2980_s20 + $0x5c] sm:$0xff]   ;;  %v2825_v48 = vld [vmem:[%s2980_s20 + $0x10] sm:$0xff]  }
  0x16   : > { %2552 = vmatprep.subr.bf16.mxu0 %v2778_v9  ;;  %v2809_v32 = vld [vmem:[%s2980_s20] sm:$0xff]   ;;  %v2817_v50 = vld [vmem:[%s3224_s1 + $0x90] sm:$0xff]   ;;  %v2819_v52 = vld [vmem:[%s3224_s1 + $0x98] sm:$0xff]  }
  0x17   : > { %v2827_v49 = vld [vmem:[%s2980_s20 + $0x64] sm:$0xff]   ;;  %v2818_v51 = vld [vmem:[%s3224_s1 + $0x190] sm:$0xff]   ;;  %v2829_v53 = vld [vmem:[%s2980_s20 + $0x18] sm:$0xff]  }
  0x18   : > { %2457 = vmatpush3.bf16.msra.mxu1 %v2777_v8  ;;  %v2830_v54 = vld [vmem:[%s2980_s20 + $0x6c] sm:$0xff]   ;;  %v2820_v55 = vld [vmem:[%s3224_s1 + $0x198] sm:$0xff]   ;;  %v2821_v58 = vld [vmem:[%s3224_s1 + $0xa0] sm:$0xff]  }
  0x19   : > { %2553 = vmatpush3.bf16.msra.mxu0 %v2778_v9  ;;  %2458 = vmatprep.subr.bf16.mxu1 %v2779_v10  ;;  %v2833_v56 = vld [vmem:[%s2980_s20 + $0x50] sm:$0xff]   ;;  %v2835_v57 = vld [vmem:[%s2980_s20 + $0x8] sm:$0xff]   ;;  %v2822_v59 = vld [vmem:[%s3224_s1 + $0x1a0] sm:$0xff]  }
  0x1a   : > { %2554 = vmatprep.subr.bf16.mxu0 %v2780_v12  ;;  %v2823_v60 = vld [vmem:[%s3224_s1 + $0xa8] sm:$0xff]   ;;  %v2826_v62 = vld [vmem:[%s3224_s1 + $0xb0] sm:$0xff]   ;;  %v2831_v0 = vld [vmem:[%s3224_s1 + $0xb8] sm:$0xff]  }
  0x1b   : > { %v2824_v61 = vld [vmem:[%s3224_s1 + $0x1a8] sm:$0xff]   ;;  %v2828_v63 = vld [vmem:[%s3224_s1 + $0x1b0] sm:$0xff]   ;;  %v2832_v1 = vld [vmem:[%s3224_s1 + $0x1b8] sm:$0xff]  }
  0x1c   : > { %2459 = vmatpush3.bf16.msra.mxu1 %v2779_v10  ;;  %v2834_v2 = vld [vmem:[%s3224_s1 + $0xc0] sm:$0xff]   ;;  %v2837_v4 = vld [vmem:[%s2980_s20 + $0x58] sm:$0xff]   ;;  %v2838_v5 = vld [vmem:[%s2980_s20 + $0x10] sm:$0xff]  }
  0x1d   : > { %2555 = vmatpush3.bf16.msra.mxu0 %v2780_v12  ;;  %2460 = vmatprep.subr.bf16.mxu1 %v2781_v14  ;;  %v2836_v3 = vld [vmem:[%s3224_s1 + $0x1c0] sm:$0xff]   ;;  %v2839_v6 = vld [vmem:[%s3224_s1 + $0xc8] sm:$0xff]   ;;  %v2850_v9 = vld [vmem:[%s2980_s20 + $0x18] sm:$0xff]  }
  0x1e   : > { %2556 = vmatprep.subr.bf16.mxu0 %v2782_v15  ;;  %v2840_v7 = vld [vmem:[%s3224_s1 + $0x1c8] sm:$0xff]   ;;  %v2849_v8 = vld [vmem:[%s2980_s20 + $0x60] sm:$0xff]   ;;  %v2841_v10 = vld [vmem:[%s3224_s1 + $0xd0] sm:$0xff]  }
  0x1f   : > { %v2842_v11 = vld [vmem:[%s3224_s1 + $0x1d0] sm:$0xff]   ;;  %v2843_v12 = vld [vmem:[%s3224_s1 + $0xd8] sm:$0xff]   ;;  %v2851_v13 = vld [vmem:[%s2980_s20 + $0x68] sm:$0xff]  }
  0x20   : > { %2461 = vmatpush3.bf16.msra.mxu1 %v2781_v14  ;;  %v2853_v14 = vld [vmem:[%s2980_s20 + $0x20] sm:$0xff]  }
  0x21   : > { %2557 = vmatpush3.bf16.msra.mxu0 %v2782_v15  ;;  %2462 = vmatprep.subr.bf16.mxu1 %v2783_v16  ;;  %v2844_v15 = vld [vmem:[%s3224_s1 + $0x1d8] sm:$0xff]  }
  0x22   : > { %2558 = vmatprep.subr.bf16.mxu0 %v2784_v17 }
  0x24   : > { %2463 = vmatpush3.bf16.msra.mxu1 %v2783_v16  ;;  %v2857_v16 = vld [vmem:[%s2980_s20 + $0x4] sm:$0xff]  }
  0x25   : > { %2559 = vmatpush3.bf16.msra.mxu0 %v2784_v17  ;;  %2472 = vmatprep.subr.bf16.mxu1 %v2786_v18  ;;  %v2858_v17 = vld [vmem:[%s2980_s20 + $0x30] sm:$0xff]  }
  0x26   : > { %2568 = vmatprep.subr.bf16.mxu0 %v2788_v19 }
  0x27   : > { %2465 = vmatmul.mubr.bf16.vlgmr.msra.gmra.mrb[0].mxu1 %v2789_v20  ;;  %v2847_v20 = vld [vmem:[%s3224_s1 + $0xe8] sm:$0xff]  }
  0x28   : > { %2473 = vmatpush3.bf16.msra.mxu1 %v2786_v18  ;;  %2561 = vmatmul.mubr.bf16.vlgmr.msra.gmra.mrb[0].mxu0 %v2790_v21  ;;  %v2845_v18 = vld [vmem:[%s3224_s1 + $0xe0] sm:$0xff]   ;;  %v2848_v21 = vld [vmem:[%s3224_s1 + $0x1e8] sm:$0xff]  }
  0x29   : > { %2569 = vmatpush3.bf16.msra.mxu0 %v2788_v19  ;;  %2474 = vmatprep.subr.bf16.mxu1 %v2791_v22  ;;  %v2846_v19 = vld [vmem:[%s3224_s1 + $0x1e0] sm:$0xff]  }
  0x2a   : > { %2570 = vmatprep.subr.bf16.mxu0 %v2792_v23  ;;  %2468 = vmatprep.mubr.bf16.mxu1 %v2801_v24  ;;  %v2855_v24 = vld [vmem:[%s3224_s1 + $0xf8] sm:$0xff]  }
  0x2b   : > { %2564 = vmatprep.mubr.bf16.mxu0 %v2803_v25  ;;  %v2856_v25 = vld [vmem:[%s3224_s1 + $0x1f8] sm:$0xff]  }
  0x2c   : > { %2475 = vmatpush3.bf16.msra.mxu1 %v2791_v22  ;;  %v2852_v22 = vld [vmem:[%s3224_s1 + $0xf0] sm:$0xff]  }
  0x2d   : > { %2571 = vmatpush3.bf16.msra.mxu0 %v2792_v23  ;;  %2476 = vmatprep.subr.bf16.mxu1 %v2793_v26  ;;  %v2854_v23 = vld [vmem:[%s3224_s1 + $0x1f0] sm:$0xff]  }
  0x2e   : > { %2572 = vmatprep.subr.bf16.mxu0 %v2794_v27 }
  0x2f   : > { %2469 = vmatmul.mubr.bf16.gmra.mrb[4].mxu1 %v2805_v29  ;;  %v2862_v29 = vld [vmem:[%s3224_s1 + $0x208] sm:$0xff]  }
  0x30   : > { %2477 = vmatpush3.bf16.msra.mxu1 %v2793_v26  ;;  %2565 = vmatmul.mubr.bf16.gmra.mrb[4].mxu0 %v2806_v30  ;;  %v2861_v26 = vld [vmem:[%s3224_s1 + $0x200] sm:$0xff]   ;;  %v2863_v30 = vld [vmem:[%s2980_s20 + $0x14] sm:$0xff]  }
  0x31   : > { %2573 = vmatpush3.bf16.msra.mxu0 %v2794_v27  ;;  %2478 = vmatprep.subr.bf16.mxu1 %v2795_v28  ;;  %v2859_v27 = vld [vmem:[%s2980_s20 + $0xc] sm:$0xff]  }
  0x32   : > { %2574 = vmatprep.subr.bf16.mxu0 %v2796_v31  ;;  %2488 = vmatprep.mubr.bf16.mxu1 %v2809_v32  ;;  %v2867_v32 = vld [vmem:[%s3224_s1 + $0x210] sm:$0xff]  }
  0x33   : > { %2584 = vmatprep.mubr.bf16.mxu0 %v2811_v33  ;;  %v2865_v33 = vld [vmem:[%s2980_s20 + $0x1c] sm:$0xff]  }
  0x34   : > { %2479 = vmatpush3.bf16.msra.mxu1 %v2795_v28  ;;  %v2860_v28 = vld [vmem:[%s2980_s20 + $0x38] sm:$0xff]  }
  0x35   : > { %2575 = vmatpush3.bf16.msra.mxu0 %v2796_v31  ;;  %2480 = vmatprep.subr.bf16.mxu1 %v2797_v34  ;;  %v2864_v31 = vld [vmem:[%s2980_s20 + $0x40] sm:$0xff]  }
  0x36   : > { %2576 = vmatprep.subr.bf16.mxu0 %v2798_v35 }
  0x38   : > { %2481 = vmatpush3.bf16.msra.mxu1 %v2797_v34  ;;  %v2866_v34 = vld [vmem:[%s2980_s20 + $0x48] sm:$0xff]  }
  0x39   : > { %2577 = vmatpush3.bf16.msra.mxu0 %v2798_v35  ;;  %2482 = vmatprep.subr.bf16.mxu1 %v2799_v36  ;;  %v2868_v35 = vld [vmem:[%s3224_s1 + $0x218] sm:$0xff]  }
  0x3a   : > { %2578 = vmatprep.subr.bf16.mxu0 %v2800_v37 }
  0x3c   : > { %2483 = vmatpush3.bf16.msra.mxu1 %v2799_v36  ;;  %v2873_v36 = vld [vmem:[%s2980_s20 + $0x58] sm:$0xff]  }
  0x3d   : > { %2579 = vmatpush3.bf16.msra.mxu0 %v2800_v37  ;;  %2484 = vmatprep.subr.bf16.mxu1 %v2802_v38  ;;  %v2874_v37 = vld [vmem:[%s2980_s20 + $0x68] sm:$0xff]  }
  0x3e   : > { %2580 = vmatprep.subr.bf16.mxu0 %v2804_v39 }
  0x40   : > { %2485 = vmatpush3.bf16.msra.mxu1 %v2802_v38  ;;  %v2869_v38 = vld [vmem:[%s3224_s1 + $0x220] sm:$0xff]  }
  0x41   : > { %2581 = vmatpush3.bf16.msra.mxu0 %v2804_v39  ;;  %2486 = vmatprep.subr.bf16.mxu1 %v2807_v40  ;;  %v2870_v39 = vld [vmem:[%s3224_s1 + $0x228] sm:$0xff]  }
  0x42   : > { %2582 = vmatprep.subr.bf16.mxu0 %v2808_v41 }
  0x44   : > { %2487 = vmatpush3.bf16.msra.mxu1 %v2807_v40  ;;  %v2871_v40 = vld [vmem:[%s3224_s1 + $0x230] sm:$0xff]  }
  0x45   : > { %2583 = vmatpush3.bf16.msra.mxu0 %v2808_v41  ;;  %2496 = vmatprep.subr.bf16.mxu1 %v2810_v42  ;;  %v2872_v41 = vld [vmem:[%s3224_s1 + $0x238] sm:$0xff]  }
  0x46   : > { %2592 = vmatprep.subr.bf16.mxu0 %v2812_v43 }
  0x47   : > { %2489 = vmatmul.mubr.bf16.vlgmr.msra.gmra.mrb[0].mxu1 %v2813_v44 }
  0x48   : > { %2497 = vmatpush3.bf16.msra.mxu1 %v2810_v42  ;;  %2585 = vmatmul.mubr.bf16.vlgmr.msra.gmra.mrb[0].mxu0 %v2814_v45  ;;  %v2876_v42 = vld [vmem:[%s2980_s20 + $0x70] sm:$0xff]  }
  0x49   : > { %2593 = vmatpush3.bf16.msra.mxu0 %v2812_v43  ;;  %2498 = vmatprep.subr.bf16.mxu1 %v2815_v46  ;;  %v2875_v43 = vld [vmem:[%s2980_s20 + $0x60] sm:$0xff]  }
  0x4a   : > { %2594 = vmatprep.subr.bf16.mxu0 %v2816_v47  ;;  %2492 = vmatprep.mubr.bf16.mxu1 %v2825_v48 }
  0x4b   : > { %2588 = vmatprep.mubr.bf16.mxu0 %v2827_v49 }
  0x4c   : > { %2499 = vmatpush3.bf16.msra.mxu1 %v2815_v46 }
  0x4d   : > { %2595 = vmatpush3.bf16.msra.mxu0 %v2816_v47  ;;  %2500 = vmatprep.subr.bf16.mxu1 %v2817_v50 }
  0x4e   : > { %2596 = vmatprep.subr.bf16.mxu0 %v2818_v51 }
  0x4f   : > { %2493 = vmatmul.mubr.bf16.gmra.mrb[4].mxu1 %v2829_v53 }
  0x50   : > { %2501 = vmatpush3.bf16.msra.mxu1 %v2817_v50  ;;  %2589 = vmatmul.mubr.bf16.gmra.mrb[4].mxu0 %v2830_v54 }
  0x51   : > { %2597 = vmatpush3.bf16.msra.mxu0 %v2818_v51  ;;  %2502 = vmatprep.subr.bf16.mxu1 %v2819_v52 }
  0x52   : > { %2598 = vmatprep.subr.bf16.mxu0 %v2820_v55  ;;  %2512 = vmatprep.mubr.bf16.mxu1 %v2833_v56 }
  0x53   : > { %2608 = vmatprep.mubr.bf16.mxu0 %v2835_v57 }
  0x54   : > { %2503 = vmatpush3.bf16.msra.mxu1 %v2819_v52 }
  0x55   : > { %2599 = vmatpush3.bf16.msra.mxu0 %v2820_v55  ;;  %2504 = vmatprep.subr.bf16.mxu1 %v2821_v58 }
  0x56   : > { %2600 = vmatprep.subr.bf16.mxu0 %v2822_v59 }
  0x58   : > { %2505 = vmatpush3.bf16.msra.mxu1 %v2821_v58 }
  0x59   : > { %2601 = vmatpush3.bf16.msra.mxu0 %v2822_v59  ;;  %2506 = vmatprep.subr.bf16.mxu1 %v2823_v60 }
  0x5a   : > { %2602 = vmatprep.subr.bf16.mxu0 %v2824_v61 }
  0x5c   : > { %2507 = vmatpush3.bf16.msra.mxu1 %v2823_v60  ;;  %v2312_v60 = vld [vmem:[%s3225_s2] ss:$0 sm:$0xff] }
  0x5d   : > { %2603 = vmatpush3.bf16.msra.mxu0 %v2824_v61  ;;  %2508 = vmatprep.subr.bf16.mxu1 %v2826_v62 }
  0x5e   : > { %2604 = vmatprep.subr.bf16.mxu0 %v2828_v63 }
  0x60   : > { %2509 = vmatpush3.bf16.msra.mxu1 %v2826_v62 }
  0x61   : > { %2605 = vmatpush3.bf16.msra.mxu0 %v2828_v63  ;;  %2510 = vmatprep.subr.bf16.mxu1 %v2831_v0 }
  0x62   : > { %2606 = vmatprep.subr.bf16.mxu0 %v2832_v1 }
  0x64   : > { %2511 = vmatpush3.bf16.msra.mxu1 %v2831_v0 }
  0x65   : > { %2607 = vmatpush3.bf16.msra.mxu0 %v2832_v1  ;;  %2520 = vmatprep.subr.bf16.mxu1 %v2834_v2 }
  0x66   : > { %2616 = vmatprep.subr.bf16.mxu0 %v2836_v3 }
  0x67   : > { %2513 = vmatmul.mubr.bf16.vlgmr.msra.gmra.mrb[0].mxu1 %v2837_v4 }
  0x68   : > { %2521 = vmatpush3.bf16.msra.mxu1 %v2834_v2  ;;  %2609 = vmatmul.mubr.bf16.vlgmr.msra.gmra.mrb[0].mxu0 %v2838_v5  ;;  %v2313_v2 = vld [vmem:[%s3226_s3] ss:$0 sm:$0xff] }
  0x69   : > { %2617 = vmatpush3.bf16.msra.mxu0 %v2836_v3  ;;  %2522 = vmatprep.subr.bf16.mxu1 %v2839_v6 }
  0x6a   : > { %2618 = vmatprep.subr.bf16.mxu0 %v2840_v7  ;;  %2516 = vmatprep.mubr.bf16.mxu1 %v2849_v8 }
  0x6b   : > { %2612 = vmatprep.mubr.bf16.mxu0 %v2850_v9 }
  0x6c   : > { %2523 = vmatpush3.bf16.msra.mxu1 %v2839_v6 }
  0x6d   : > { %2619 = vmatpush3.bf16.msra.mxu0 %v2840_v7  ;;  %2524 = vmatprep.subr.bf16.mxu1 %v2841_v10 }
  0x6e   : > { %2620 = vmatprep.subr.bf16.mxu0 %v2842_v11 }
  0x6f   : > { %2517 = vmatmul.mubr.bf16.gmra.mrb[4].mxu1 %v2851_v13 }
  0x70   : > { %2525 = vmatpush3.bf16.msra.mxu1 %v2841_v10  ;;  %2613 = vmatmul.mubr.bf16.gmra.mrb[4].mxu0 %v2853_v14 }
  0x71   : > { %2621 = vmatpush3.bf16.msra.mxu0 %v2842_v11  ;;  %2526 = vmatprep.subr.bf16.mxu1 %v2843_v12 }
  0x72   : > { %2622 = vmatprep.subr.bf16.mxu0 %v2844_v15  ;;  %2536 = vmatprep.mubr.bf16.mxu1 %v2857_v16 }
  0x73   : > { %2632 = vmatprep.mubr.bf16.mxu0 %v2858_v17 }
  0x74   : > { %2527 = vmatpush3.bf16.msra.mxu1 %v2843_v12 }
  0x75   : > { %2623 = vmatpush3.bf16.msra.mxu0 %v2844_v15  ;;  %2528 = vmatprep.subr.bf16.mxu1 %v2845_v18 }
  0x76   : > { %2624 = vmatprep.subr.bf16.mxu0 %v2846_v19 }
  0x78   : > { %2529 = vmatpush3.bf16.msra.mxu1 %v2845_v18 }
  0x79   : > { %2625 = vmatpush3.bf16.msra.mxu0 %v2846_v19  ;;  %2530 = vmatprep.subr.bf16.mxu1 %v2847_v20 }
  0x7a   : > { %2626 = vmatprep.subr.bf16.mxu0 %v2848_v21 }
  0x7c   : > { %2531 = vmatpush3.bf16.msra.mxu1 %v2847_v20 }
  0x7d   : > { %2627 = vmatpush3.bf16.msra.mxu0 %v2848_v21  ;;  %2532 = vmatprep.subr.bf16.mxu1 %v2852_v22 }
  0x7e   : > { %2628 = vmatprep.subr.bf16.mxu0 %v2854_v23 }
  0x80   : > { %2533 = vmatpush3.bf16.msra.mxu1 %v2852_v22 }
  0x81   : > { %2629 = vmatpush3.bf16.msra.mxu0 %v2854_v23  ;;  %2534 = vmatprep.subr.bf16.mxu1 %v2855_v24 }
  0x82   : > { %2630 = vmatprep.subr.bf16.mxu0 %v2856_v25 }
  0x84   : > { %2535 = vmatpush3.bf16.msra.mxu1 %v2855_v24 }
  0x85   : > { %2631 = vmatpush3.bf16.msra.mxu0 %v2856_v25  ;;  %2664 = vmatprep.subr.bf16.mxu1 %v2861_v26 }
  0x86   : > { %2640 = vmatprep.subr.bf16.mxu0 %v2861_v26 }
  0x87   : > { %2537 = vmatmul.mubr.bf16.vlgmr.msra.gmra.mrb[0].mxu1 %v2859_v27 }
  0x88   : > { %2633 = vmatmul.mubr.bf16.vlgmr.msra.gmra.mrb[0].mxu0 %v2860_v28  ;;  %2672 = vmatpush3.bf16.msra.mxu1 %v2861_v26 }
  0x89   : > { %2641 = vmatpush3.bf16.msra.mxu0 %v2861_v26  ;;  %2665 = vmatprep.subr.bf16.mxu1 %v2862_v29 }
  0x8a   : > { %2642 = vmatprep.subr.bf16.mxu0 %v2862_v29  ;;  %2540 = vmatprep.mubr.bf16.mxu1 %v2863_v30 }
  0x8b   : > { %2636 = vmatprep.mubr.bf16.mxu0 %v2864_v31 }
  0x8c   : > { %2673 = vmatpush3.bf16.msra.mxu1 %v2862_v29 }
  0x8d   : > { %2643 = vmatpush3.bf16.msra.mxu0 %v2862_v29  ;;  %2666 = vmatprep.subr.bf16.mxu1 %v2867_v32 }
  0x8e   : > { %2644 = vmatprep.subr.bf16.mxu0 %v2867_v32 }
  0x8f   : > { %2541 = vmatmul.mubr.bf16.gmra.mrb[4].mxu1 %v2865_v33 }
  0x90   : > { %2637 = vmatmul.mubr.bf16.gmra.mrb[4].mxu0 %v2866_v34  ;;  %2674 = vmatpush3.bf16.msra.mxu1 %v2867_v32 }
  0x91   : > { %2645 = vmatpush3.bf16.msra.mxu0 %v2867_v32  ;;  %2667 = vmatprep.subr.bf16.mxu1 %v2868_v35 }
  0x92   : > { %2646 = vmatprep.subr.bf16.mxu0 %v2868_v35  ;;  %2656 = vmatprep.mubr.bf16.mxu0 %v2873_v36 }
  0x93   : > { %2660 = vmatprep.mubr.bf16.mxu1 %v2874_v37 }
  0x94   : > { %2675 = vmatpush3.bf16.msra.mxu1 %v2868_v35 }
  0x95   : > { %2647 = vmatpush3.bf16.msra.mxu0 %v2868_v35  ;;  %2668 = vmatprep.subr.bf16.mxu1 %v2869_v38 }
  0x96   : > { %2648 = vmatprep.subr.bf16.mxu0 %v2869_v38 }
  0x98   : > { %2676 = vmatpush3.bf16.msra.mxu1 %v2869_v38 }
  0x99   : > { %2649 = vmatpush3.bf16.msra.mxu0 %v2869_v38  ;;  %2669 = vmatprep.subr.bf16.mxu1 %v2870_v39 }
  0x9a   : > { %2650 = vmatprep.subr.bf16.mxu0 %v2870_v39 }
  0x9c   : > { %2677 = vmatpush3.bf16.msra.mxu1 %v2870_v39 }
  0x9d   : > { %2651 = vmatpush3.bf16.msra.mxu0 %v2870_v39  ;;  %2670 = vmatprep.subr.bf16.mxu1 %v2871_v40 }
  0x9e   : > { %2652 = vmatprep.subr.bf16.mxu0 %v2871_v40 }
  0xa0   : > { %2678 = vmatpush3.bf16.msra.mxu1 %v2871_v40 }
  0xa1   : > { %2653 = vmatpush3.bf16.msra.mxu0 %v2871_v40  ;;  %2671 = vmatprep.subr.bf16.mxu1 %v2872_v41 }
  0xa2   : > { %2654 = vmatprep.subr.bf16.mxu0 %v2872_v41 }
  0xa4   : > { %2679 = vmatpush3.bf16.msra.mxu1 %v2872_v41 }
  0xa5   : > { %2655 = vmatpush3.bf16.msra.mxu0 %v2872_v41 }
  0xa7   : > { %2661 = vmatmul.mubr.bf16.vlgmr.msra.gmra.mrb[8].mxu1 %v2876_v42 }
  0xa8   : > { %2657 = vmatmul.mubr.bf16.vlgmr.msra.gmra.mrb[0].mxu0 %v2875_v43 }
 0x15a   : > { %v2538_v44 = vpop.f32.mrb[0].mxu1 }
 0x15b   : > { %v917_v45 = vpop.f32.mrb[1].mxu1 }
 0x15c   : > { %v2539_v46 = vpop.f32.mrb[2].mxu1 }
 0x15d   : > { %v920_v47 = vpop.f32.mrb[3].mxu1 }
 0x162   : > { %v2542_v48 = vpop.f32.mrb[4].mxu1 }
 0x163   : > { %v2638_v49 = vpop.f32.mrb[4].mxu0  ;;  %v933_v50 = vpop.f32.mrb[5].mxu1 }
 0x164   : > { %v2684_v51 = vadd.f32 %v2638_v49, %v2542_v48  ;;  %v1617_v52 = vpop.f32.mrb[5].mxu0  ;;  %v2543_v53 = vpop.f32.mrb[6].mxu1 }
 0x165   : > { %v2686_v54 = vadd.f32 %v1617_v52, %v933_v50  ;;  %v2639_v55 = vpop.f32.mrb[6].mxu0  ;;  %v936_v56 = vpop.f32.mrb[7].mxu1 }
 0x166   : > { %v2688_v57 = vadd.f32 %v2639_v55, %v2543_v53  ;;  %v1620_v58 = vpop.f32.mrb[7].mxu0 }
 0x167   : > { %v2690_v59 = vadd.f32 %v1620_v58, %v936_v56 }
 0x17a   : > { %v2662_v61 = vpop.f32.mrb[8].mxu1 }
 0x17b   : > { %v2658_v62 = vpop.f32.mrb[0].mxu0  ;;  %v2685_v63 = vadd.f32 %v2684_v51, %v2662_v61  ;;  %v1788_v0 = vpop.f32.mrb[9].mxu1 }
 0x17c   : > { %v2680_v1 = vadd.f32 %v2658_v62, %v2538_v44  ;;  %v1772_v3 = vpop.f32.mrb[1].mxu0  ;;  %v2687_v4 = vadd.f32 %v2686_v54, %v1788_v0  ;;  %v2663_v5 = vpop.f32.mrb[10].mxu1 }
 0x17d   : > { %v1824_v6 = vmul.f32 %v2685_v63, %v2312_v60  ;;  %v2681_v7 = vadd.f32 %v1772_v3, %v917_v45  ;;  %v2659_v8 = vpop.f32.mrb[2].mxu0  ;;  %v2689_v9 = vadd.f32 %v2688_v57, %v2663_v5  ;;  %v1791_v10 = vpop.f32.mrb[11].mxu1 }
 0x17e   : > { %v1820_v11 = vmul.f32 %v2680_v1, %v2312_v60  ;;  %v1822_v12 = vmul.f32 %v2687_v4, %v2312_v60  ;;  %v2682_v13 = vadd.f32 %v2659_v8, %v2539_v46  ;;  %v1775_v14 = vpop.f32.mrb[3].mxu0  ;;  %v2691_v15 = vadd.f32 %v2690_v59, %v1791_v10 }
 0x17f   : > { %v1839_v16 = vadd.f32 %v2313_v2, %v1824_v6  ;;  %v1818_v17 = vmul.f32 %v2681_v7, %v2312_v60  ;;  %v1825_v18 = vmul.f32 %v2689_v9, %v2312_v60  ;;  %v2683_v19 = vadd.f32 %v1775_v14, %v920_v47 }
 0x180   : > { %v1835_v20 = vadd.f32 %v2313_v2, %v1820_v11  ;;  %v1837_v21 = vadd.f32 %v2313_v2, %v1822_v12  ;;  %v1821_v22 = vmul.f32 %v2682_v13, %v2312_v60  ;;  %v1823_v23 = vmul.f32 %v2691_v15, %v2312_v60 }
 0x181   : > { %v1833_v24 = vadd.f32 %v2313_v2, %v1818_v17  ;;  %v1840_v25 = vadd.f32 %v2313_v2, %v1825_v18  ;;  %v1819_v26 = vmul.f32 %v2683_v19, %v2312_v60  ;;  %v1847_v29 = vmax.f32 %v1839_v16, 0.0 }
 0x182   : > { %v1836_v27 = vadd.f32 %v2313_v2, %v1821_v22  ;;  %v1838_v28 = vadd.f32 %v2313_v2, %v1823_v23  ;;  %v1843_v32 = vmax.f32 %v1835_v20, 0.0  ;;  %v1845_v33 = vmax.f32 %v1837_v21, 0.0 }
 0x183   : > { %v1848_v30 = vmax.f32 %v1840_v25, 0.0  ;;  %v1834_v31 = vadd.f32 %v2313_v2, %v1819_v26  ;;  %v1841_v36 = vmax.f32 %v1833_v24, 0.0 }
 0x184   : > { %v1844_v34 = vmax.f32 %v1836_v27, 0.0  ;;  %v1846_v35 = vmax.f32 %v1838_v28, 0.0 }
 0x185   : > { %v2335_v37 = vpack.c.bf16 %v1848_v30, %v1847_v29  ;;  %v1842_v38 = vmax.f32 %v1834_v31, 0.0 }
 0x186   : > { %v2325_v39 = vpack.c.bf16 %v1844_v34, %v1843_v32  ;;  %v2330_v40 = vpack.c.bf16 %v1846_v35, %v1845_v33 }
 0x187   : > { %2339 = vst [vmem:[%s288_s25 + $0x18] sm:$0xff] %v2335_v37   ;;  %v2320_v41 = vpack.c.bf16 %v1842_v38, %v1841_v36 }
 0x188   : > { %2337 = vst [vmem:[%s288_s25 + $0x8] sm:$0xff] %v2325_v39   ;;  %2338 = vst [vmem:[%s288_s25 + $0x10] sm:$0xff] %v2330_v40  }
 0x189   : > { %2321 = vst [vmem:[%s288_s25] sm:$0xff] %v2320_v41  }
 0x18a PF: > { %s14_s17 = sadd.s32 1, %s2899_s17   ;;  %s3228_s15 = smov %s2895_s16 }
 0x18b   : > { %p11_p5 = scmp.ge.s32.totalorder %s14_s17, 4   ;;  %s3229_s16 = smov %s3231_s18 }
 0x18d   :  { %13 = sbr.rel (!%p11_p5) target bundleno = 2 (0x2), region = 91 }

</bundles_post_ra>
